<compile_context>
chip_gen: v7x
topology: tpu7x:2x2x1
jax: 0.10.0
libtpu: 0.0.40
codegen_flags: <defaults>
</compile_context>

<pallas_src>
import jax
import jax.numpy as jnp
from jax.experimental import pallas as pl
from jax.experimental.pallas import tpu as pltpu

CP = 128                        # lane width: cout / class axes padded to 128
VMEM_LIMIT = 32 * 1024 * 1024   # <= ~48 MiB so the same cap is safe on v7x (64 MiB VMEM)


def _round_up(v, m):
    return -(-v // m) * m


# ------------------------- tap-packed patches (im2col) ------------------------

def _im2col(x, k, stride, pad, pad_value=0.0):
    """NHWC -> (N, Mo, Kp) bf16 with ALL k*k taps packed along the K (lane) axis.

    K = k*k*C real contraction columns (order: (kh, kw, c), matching the weight
    reshape), zero padded to Kp = round_up(K, 128) so every MXU pass contracts
    real data (review: tap packing along K).  Mo = Ho*Wo exactly -> no junk
    columns, no crop, and the identity shortcut can be consumed as-is.
    """
    N, H, W, C = x.shape
    Ho = (H + 2 * pad - k) // stride + 1
    Wo = (W + 2 * pad - k) // stride + 1
    if pad > 0:
        x = jnp.pad(x, ((0, 0), (pad, pad), (pad, pad), (0, 0)),
                    constant_values=pad_value)
    cols = []
    for kh in range(k):
        for kw in range(k):
            cols.append(jax.lax.slice(
                x, (0, kh, kw, 0),
                (N, kh + (Ho - 1) * stride + 1, kw + (Wo - 1) * stride + 1, C),
                (1, stride, stride, 1)))
    lhs = jnp.concatenate(cols, axis=-1).reshape(N, Ho * Wo, k * k * C)
    K = k * k * C
    Kp = _round_up(K, CP)
    if Kp > K:
        lhs = jnp.pad(lhs, ((0, 0), (0, 0), (0, Kp - K)))
    return lhs.astype(jnp.bfloat16), Ho, Wo


# ----------------------------- fused conv kernel ------------------------------

def fused_conv(lhs, w, *, bias=None, shortcut=None, relu_out=False,
               emit_out=True, act_scale=None, act_bias=None, act_channels=None):
    """One Pallas kernel per conv:

        y   = lhs @ w  [+ bias] [+ shortcut] [relu]
        out = y                              (f32, lane-dense, optional)
        act = relu(y [* act_scale + act_bias])[:, :act_channels]   (bf16, optional)

    lhs: (N, Mo, Kp) bf16 tap-packed patches;  w: (Kp, CP) bf16 with any BN
    scale already folded in;  bias/act_scale/act_bias: (1, CP) f32;
    shortcut: (N, Mo, CP) f32.
    """
    N, Mo, Kp = lhs.shape
    has_b = bias is not None
    has_sc = shortcut is not None
    has_act = act_channels is not None
    has_affine = act_scale is not None
    assert emit_out or has_act

    args = [lhs, w]
    in_specs = [
        pl.BlockSpec((None, Mo, Kp), lambda n: (n, 0, 0)),
        # constant index_map -> weight slab stays VMEM resident for the whole grid
        pl.BlockSpec((Kp, CP), lambda n: (0, 0)),
    ]
    if has_b:
        args.append(bias)
        in_specs.append(pl.BlockSpec((1, CP), lambda n: (0, 0)))
    if has_affine:
        args += [act_scale, act_bias]
        in_specs += [pl.BlockSpec((1, CP), lambda n: (0, 0)),
                     pl.BlockSpec((1, CP), lambda n: (0, 0))]
    if has_sc:
        args.append(shortcut)
        in_specs.append(pl.BlockSpec((None, Mo, CP), lambda n: (n, 0, 0)))

    out_specs, out_shape = [], []
    if emit_out:
        out_specs.append(pl.BlockSpec((None, Mo, CP), lambda n: (n, 0, 0)))
        out_shape.append(jax.ShapeDtypeStruct((N, Mo, CP), jnp.float32))
    if has_act:
        out_specs.append(pl.BlockSpec((None, Mo, act_channels), lambda n: (n, 0, 0)))
        out_shape.append(jax.ShapeDtypeStruct((N, Mo, act_channels), jnp.bfloat16))

    def kernel(*refs):
        idx = 0
        lhs_ref = refs[idx]; idx += 1
        w_ref = refs[idx]; idx += 1
        if has_b:
            b_ref = refs[idx]; idx += 1
        if has_affine:
            as_ref, ab_ref = refs[idx], refs[idx + 1]; idx += 2
        if has_sc:
            sc_ref = refs[idx]; idx += 1
        out_ref = act_ref = None
        if emit_out:
            out_ref = refs[idx]; idx += 1
        if has_act:
            act_ref = refs[idx]; idx += 1

        # Single full-K contraction: all taps packed along K, back-to-back MXU
        # accumulation, no per-tap VMEM accumulator traffic.
        y = jnp.dot(lhs_ref[...], w_ref[...], preferred_element_type=jnp.float32)
        if has_b:
            y = y + b_ref[...]
        if has_sc:
            y = y + sc_ref[...]
        if relu_out:
            y = jnp.maximum(y, 0.0)
        if emit_out:
            out_ref[...] = y
        if has_act:
            a = y
            if has_affine:
                a = a * as_ref[...] + ab_ref[...]
            a = jnp.maximum(a, 0.0)
            # narrow bf16 store: exactly the layout the next conv's patches consume
            act_ref[...] = a[:, :act_channels].astype(act_ref.dtype)

    outs = list(pl.pallas_call(
        kernel,
        grid=(N,),
        in_specs=in_specs,
        out_specs=out_specs,
        out_shape=out_shape,
        compiler_params=pltpu.CompilerParams(
            dimension_semantics=("parallel",),
            vmem_limit_bytes=VMEM_LIMIT),
    )(*args))

    out = outs.pop(0) if emit_out else None
    act = outs.pop(0) if has_act else None
    return out, act


# ------------------------ fused global-avg-pool + FC --------------------------

def _gap_fc_kernel(x_ref, w_ref, b_ref, o_ref):
    pooled = jnp.mean(x_ref[...].astype(jnp.float32), axis=1)     # (N, C)
    o_ref[...] = jnp.dot(pooled, w_ref[...],
                         preferred_element_type=jnp.float32) + b_ref[...]


def gap_fc(x, w, b):
    """avg_pool2d(., H) + view + Linear, fused; classes padded to CP lanes."""
    N, Mo, C = x.shape
    return pl.pallas_call(
        _gap_fc_kernel,
        out_shape=jax.ShapeDtypeStruct((N, CP), jnp.float32),
        grid=(1,),
        in_specs=[pl.BlockSpec((N, Mo, C), lambda i: (0, 0, 0)),
                  pl.BlockSpec((C, CP), lambda i: (0, 0)),
                  pl.BlockSpec((1, CP), lambda i: (0, 0))],
        out_specs=pl.BlockSpec((N, CP), lambda i: (0, 0)),
        compiler_params=pltpu.CompilerParams(
            dimension_semantics=("arbitrary",),
            vmem_limit_bytes=VMEM_LIMIT),
    )(x, w, b.reshape(1, CP))


# --------------------------------- parameters ----------------------------------

def _kaiming_conv(key, cin, cout, k):
    # kaiming_normal, mode='fan_out', nonlinearity='relu' (matches initialize())
    fan_out = cout * k * k
    return jax.random.normal(key, (k, k, cin, cout), jnp.float32) * (2.0 / fan_out) ** 0.5


def _bn_fold(c, eps=1e-5):
    """Eval-mode BN after initialize(): gamma=1, beta=0, mean=0, var=1."""
    gamma = jnp.ones((c,), jnp.float32)
    beta = jnp.zeros((c,), jnp.float32)
    rmean = jnp.zeros((c,), jnp.float32)
    rvar = jnp.ones((c,), jnp.float32)
    scale = gamma / jnp.sqrt(rvar + eps)
    bias = beta - rmean * scale
    return scale, bias


def _pad_vec(v):
    return jnp.pad(v, (0, CP - v.shape[0])).reshape(1, CP)


def _pack_w(w, out_scale=None):
    """(k,k,cin,cout) f32 -> (Kp, CP) bf16, tap-packed along K (rows ordered
    (kh,kw,cin) to match _im2col); optional per-cout BN scale folded in."""
    k, _, cin, cout = w.shape
    if out_scale is not None:
        w = w * out_scale.reshape(1, 1, 1, cout)
    K = k * k * cin
    w2 = w.reshape(K, cout)
    Kp = _round_up(K, CP)
    w2 = jnp.pad(w2, ((0, Kp - K), (0, CP - cout)))
    return w2.astype(jnp.bfloat16)


def init_wrn_params(key, depth=10, in_channels=3, num_classes=10,
                    widen_factor=1, mean=0.5, std=0.25):
    assert (depth - 4) % 6 == 0
    n = (depth - 4) // 6
    nCh = [16, 16 * widen_factor, 32 * widen_factor, 64 * widen_factor]
    assert max(nCh) <= CP and num_classes <= CP   # CP=128 is a hard cap here
    keys = iter(jax.random.split(key, 64))

    params = {'num_classes': num_classes, 'mean': float(mean), 'std': float(std),
              'nCh': nCh}

    # Stem with input normalization folded in:
    #   conv(pad0((x-mean)/std), W) == conv(pad_mean(x), W/std) - (mean/std)*sum(W)
    w_stem = _kaiming_conv(next(keys), in_channels, nCh[0], 3)
    params['stem_w'] = _pack_w(w_stem / std)
    params['stem_b'] = _pad_vec(-(mean / std) * jnp.sum(w_stem, axis=(0, 1, 2)))

    blocks = []
    for (cin, cout, stride) in [(nCh[0], nCh[1], 1),
                                (nCh[1], nCh[2], 2),
                                (nCh[2], nCh[3], 2)]:
        for i in range(n):
            ci = cin if i == 0 else cout
            st = stride if i == 0 else 1
            blk = {'stride': st, 'equal': ci == cout, 'cin': ci, 'cout': cout}
            s1, b1 = _bn_fold(ci)
            blk['bn1_scale'], blk['bn1_bias'] = _pad_vec(s1), _pad_vec(b1)
            s2, b2 = _bn_fold(cout)
            # bn2 scale folded into conv1's weights; only its bias stays an operand
            blk['conv1_w'] = _pack_w(_kaiming_conv(next(keys), ci, cout, 3), out_scale=s2)
            blk['bn2_bias'] = _pad_vec(b2)
            blk['conv2_w'] = _pack_w(_kaiming_conv(next(keys), cout, cout, 3))
            if not blk['equal']:
                blk['short_w'] = _pack_w(_kaiming_conv(next(keys), ci, cout, 1))
            blocks.append(blk)
    params['blocks'] = blocks

    sf, bf = _bn_fold(nCh[3])
    params['bnf_scale'], params['bnf_bias'] = _pad_vec(sf), _pad_vec(bf)

    bound = (1.0 / nCh[3]) ** 0.5
    fc_w = jax.random.uniform(next(keys), (nCh[3], num_classes), jnp.float32,
                              -bound, bound)
    params['fc_w'] = jnp.pad(fc_w, ((0, 0), (0, CP - num_classes)))
    params['fc_b'] = jnp.zeros((CP,), jnp.float32)   # initialize() zeroes fc bias
    return params


# -------------------------------- forward pass ---------------------------------

def wideresnet_ifd_forward(params, x_nchw):
    """Default WideResNet_IFD.forward path (intermediate_propagate=0, pop=0,
    is_feat=False).  dropRate = 0 -> dropout is a no-op."""
    x = jnp.transpose(x_nchw, (0, 2, 3, 1)).astype(jnp.float32)   # NCHW -> NHWC
    N = x.shape[0]
    blocks = params['blocks']

    # Stem conv; its epilogue also emits block0's pre-activation relu(bn1(out0))
    # as narrow bf16 (exactly what block0.conv1's tap-packed patches consume).
    lhs, H, W = _im2col(x, 3, 1, 1, pad_value=params['mean'])
    out, act = fused_conv(lhs, params['stem_w'], bias=params['stem_b'],
                          emit_out=blocks[0]['equal'],
                          act_scale=blocks[0]['bn1_scale'],
                          act_bias=blocks[0]['bn1_bias'],
                          act_channels=blocks[0]['cin'])

    for bi, blk in enumerate(blocks):
        if bi + 1 < len(blocks):
            nxt_s, nxt_b = blocks[bi + 1]['bn1_scale'], blocks[bi + 1]['bn1_bias']
            need_out = blocks[bi + 1]['equal']       # next identity shortcut needs it
        else:
            nxt_s, nxt_b = params['bnf_scale'], params['bnf_bias']
            need_out = False

        ci, co, st = blk['cin'], blk['cout'], blk['stride']
        act_img = act.reshape(N, H, W, ci)

        # conv1: bn2 scale folded into the weights, ReLU fused; only the narrow
        # bf16 activation is emitted -> zero-glue input to conv2's patches.
        lhs1, Ho, Wo = _im2col(act_img, 3, st, 1)
        _, h = fused_conv(lhs1, blk['conv1_w'], bias=blk['bn2_bias'],
                          relu_out=True, emit_out=False, act_channels=co)

        # residual branch
        if blk['equal']:
            sc = out                                  # raw previous output, as-is
        else:
            lhs_s, _, _ = _im2col(act_img, 1, st, 0)  # 1x1 stride-s convShortcut(act)
            sc, _ = fused_conv(lhs_s, blk['short_w'])

        # conv2 + residual add; epilogue emits the next pre-activation
        # (relu(bn1_next(.)) for the next block, relu(bn_final(.)) at the end).
        lhs2, Ho, Wo = _im2col(h.reshape(N, Ho, Wo, co), 3, 1, 1)
        out, act = fused_conv(lhs2, blk['conv2_w'], shortcut=sc,
                              emit_out=need_out,
                              act_scale=nxt_s, act_bias=nxt_b, act_channels=co)
        H, W = Ho, Wo

    logits = gap_fc(act, params['fc_w'], params['fc_b'])
    return logits[:, :params['num_classes']]


# ------------------------------------ main --------------------------------------

if __name__ == "__main__":
    key = jax.random.PRNGKey(0)
    kp, kx = jax.random.split(key)

    # depth=10 -> 1 block/stage, widen_factor=1 -> channels [16,16,32,64].
    params = init_wrn_params(kp, depth=10, in_channels=3, num_classes=10,
                             widen_factor=1, mean=0.5, std=0.25)

    # PyTorch-style NCHW input; 16x16 so the global pool runs over 4x4.
    x = jax.random.normal(kx, (2, 3, 16, 16), jnp.float32)

    fwd = jax.jit(lambda inp: wideresnet_ifd_forward(params, inp))
    logits = jax.block_until_ready(fwd(x))
    assert logits.shape == (2, 10), logits.shape
    assert bool(jnp.all(jnp.isfinite(logits)))
    print("KERNEL_OK")
</pallas_src>

<mosaic_0001>
module attributes {stable_mosaic.version = 11 : i64} {
  func.func @kernel(%arg0: i32, %arg1: memref<1x256x128xbf16, #tpu.memory_space<vmem>>, %arg2: memref<128x128xbf16, #tpu.memory_space<vmem>>, %arg3: memref<1x128xf32, #tpu.memory_space<vmem>>, %arg4: memref<1x128xf32, #tpu.memory_space<vmem>>, %arg5: memref<1x128xf32, #tpu.memory_space<vmem>>, %arg6: memref<1x256x128xf32, #tpu.memory_space<vmem>>, %arg7: memref<1x256x16xbf16, #tpu.memory_space<vmem>>) attributes {dimension_semantics = [#tpu.dimension_semantics<parallel>], iteration_bounds = array<i64: 2>, scalar_prefetch = 0 : i64, scratch_operands = 0 : i64, tpu.core_type = #tpu.core_type<tc>, window_params = [{transform_indices = @transform_0, window_bounds = array<i64: 1, 256, 128>}, {pipeline_mode = #tpu.pipeline_mode<synchronous>, transform_indices = @transform_1, window_bounds = array<i64: 128, 128>}, {pipeline_mode = #tpu.pipeline_mode<synchronous>, transform_indices = @transform_2, window_bounds = array<i64: 1, 128>}, {pipeline_mode = #tpu.pipeline_mode<synchronous>, transform_indices = @transform_3, window_bounds = array<i64: 1, 128>}, {pipeline_mode = #tpu.pipeline_mode<synchronous>, transform_indices = @transform_4, window_bounds = array<i64: 1, 128>}, {transform_indices = @transform_5, window_bounds = array<i64: 1, 256, 128>}, {transform_indices = @transform_6, window_bounds = array<i64: 1, 256, 16>}]} {
    %c0 = arith.constant 0 : index
    %c0_0 = arith.constant 0 : index
    %c0_1 = arith.constant 0 : index
    %0 = vector.load %arg1[%c0, %c0_0, %c0_1] : memref<1x256x128xbf16, #tpu.memory_space<vmem>>, vector<1x256x128xbf16>
    %1 = vector.shape_cast %0 : vector<1x256x128xbf16> to vector<256x128xbf16>
    %c0_2 = arith.constant 0 : index
    %c0_3 = arith.constant 0 : index
    %2 = vector.load %arg2[%c0_2, %c0_3] : memref<128x128xbf16, #tpu.memory_space<vmem>>, vector<128x128xbf16>
    %cst = arith.constant dense<0.000000e+00> : vector<256x128xf32>
    %3 = tpu.matmul %1, %2, %cst {dimension_numbers = #tpu.dot_dimension_numbers<[1], [0], [0], [1], [0, 0, 1, 1], [], []>} : vector<256x128xbf16>, vector<128x128xbf16>, vector<256x128xf32> -> vector<256x128xf32>
    %c0_4 = arith.constant 0 : index
    %c0_5 = arith.constant 0 : index
    %4 = vector.load %arg3[%c0_4, %c0_5] : memref<1x128xf32, #tpu.memory_space<vmem>>, vector<1x128xf32>
    %5 = vector.broadcast %4 : vector<1x128xf32> to vector<256x128xf32>
    %6 = arith.addf %3, %5 : vector<256x128xf32>
    %c0_6 = arith.constant 0 : index
    %c0_7 = arith.constant 0 : index
    %c0_8 = arith.constant 0 : index
    %7 = vector.load %arg6[%c0_6, %c0_7, %c0_8] : memref<1x256x128xf32, #tpu.memory_space<vmem>>, vector<1x256x128xf32>
    %8 = vector.shape_cast %7 : vector<1x256x128xf32> to vector<256x128xf32>
    %9 = vector.shape_cast %6 : vector<256x128xf32> to vector<1x256x128xf32>
    tpu.vector_store %arg6[%c0_6, %c0_7, %c0_8], %9 {strides = array<i32>} : memref<1x256x128xf32, #tpu.memory_space<vmem>>, vector<1x256x128xf32>,
    %c0_9 = arith.constant 0 : index
    %c0_10 = arith.constant 0 : index
    %10 = vector.load %arg4[%c0_9, %c0_10] : memref<1x128xf32, #tpu.memory_space<vmem>>, vector<1x128xf32>
    %11 = vector.broadcast %10 : vector<1x128xf32> to vector<256x128xf32>
    %12 = arith.mulf %6, %11 : vector<256x128xf32>
    %c0_11 = arith.constant 0 : index
    %c0_12 = arith.constant 0 : index
    %13 = vector.load %arg5[%c0_11, %c0_12] : memref<1x128xf32, #tpu.memory_space<vmem>>, vector<1x128xf32>
    %14 = vector.broadcast %13 : vector<1x128xf32> to vector<256x128xf32>
    %15 = arith.addf %12, %14 : vector<256x128xf32>
    %cst_13 = arith.constant 0.000000e+00 : f32
    %16 = vector.broadcast %cst_13 : f32 to vector<256x128xf32>
    %17 = arith.maximumf %15, %16 : vector<256x128xf32>
    %18 = vector.extract_strided_slice %17 {offsets = [0, 0], sizes = [256, 16], strides = [1, 1]} : vector<256x128xf32> to vector<256x16xf32>
    %19 = arith.truncf %18 : vector<256x16xf32> to vector<256x16xbf16>
    %c0_14 = arith.constant 0 : index
    %c0_15 = arith.constant 0 : index
    %c0_16 = arith.constant 0 : index
    %20 = vector.load %arg7[%c0_14, %c0_15, %c0_16] : memref<1x256x16xbf16, #tpu.memory_space<vmem>>, vector<1x256x16xbf16>
    %21 = vector.shape_cast %20 : vector<1x256x16xbf16> to vector<256x16xbf16>
    %22 = vector.shape_cast %19 : vector<256x16xbf16> to vector<1x256x16xbf16>
    tpu.vector_store %arg7[%c0_14, %c0_15, %c0_16], %22 {strides = array<i32>} : memref<1x256x16xbf16, #tpu.memory_space<vmem>>, vector<1x256x16xbf16>,
    return
  }
  func.func @transform_0(%arg0: i32) -> (i32, i32, i32) {
    %c0_i32 = arith.constant 0 : i32
    %c0_i32_0 = arith.constant 0 : i32
    %c0_i32_1 = arith.constant 0 : i32
    return %arg0, %c0_i32, %c0_i32_0 : i32, i32, i32
  }
  func.func @transform_1(%arg0: i32) -> (i32, i32) {
    %c0_i32 = arith.constant 0 : i32
    %c0_i32_0 = arith.constant 0 : i32
    %c0_i32_1 = arith.constant 0 : i32
    return %c0_i32, %c0_i32_0 : i32, i32
  }
  func.func @transform_2(%arg0: i32) -> (i32, i32) {
    %c0_i32 = arith.constant 0 : i32
    %c0_i32_0 = arith.constant 0 : i32
    %c0_i32_1 = arith.constant 0 : i32
    return %c0_i32, %c0_i32_0 : i32, i32
  }
  func.func @transform_3(%arg0: i32) -> (i32, i32) {
    %c0_i32 = arith.constant 0 : i32
    %c0_i32_0 = arith.constant 0 : i32
    %c0_i32_1 = arith.constant 0 : i32
    return %c0_i32, %c0_i32_0 : i32, i32
  }
  func.func @transform_4(%arg0: i32) -> (i32, i32) {
    %c0_i32 = arith.constant 0 : i32
    %c0_i32_0 = arith.constant 0 : i32
    %c0_i32_1 = arith.constant 0 : i32
    return %c0_i32, %c0_i32_0 : i32, i32
  }
  func.func @transform_5(%arg0: i32) -> (i32, i32, i32) {
    %c0_i32 = arith.constant 0 : i32
    %c0_i32_0 = arith.constant 0 : i32
    %c0_i32_1 = arith.constant 0 : i32
    return %arg0, %c0_i32, %c0_i32_0 : i32, i32, i32
  }
  func.func @transform_6(%arg0: i32) -> (i32, i32, i32) {
    %c0_i32 = arith.constant 0 : i32
    %c0_i32_0 = arith.constant 0 : i32
    %c0_i32_1 = arith.constant 0 : i32
    return %arg0, %c0_i32, %c0_i32_0 : i32, i32, i32
  }
}

module attributes {stable_mosaic.version = 11 : i64} {
  func.func @kernel(%arg0: i32, %arg1: memref<1x256x256xbf16, #tpu.memory_space<vmem>>, %arg2: memref<256x128xbf16, #tpu.memory_space<vmem>>, %arg3: memref<1x128xf32, #tpu.memory_space<vmem>>, %arg4: memref<1x256x16xbf16, #tpu.memory_space<vmem>>) attributes {dimension_semantics = [#tpu.dimension_semantics<parallel>], iteration_bounds = array<i64: 2>, scalar_prefetch = 0 : i64, scratch_operands = 0 : i64, tpu.core_type = #tpu.core_type<tc>, window_params = [{transform_indices = @transform_0, window_bounds = array<i64: 1, 256, 256>}, {pipeline_mode = #tpu.pipeline_mode<synchronous>, transform_indices = @transform_1, window_bounds = array<i64: 256, 128>}, {pipeline_mode = #tpu.pipeline_mode<synchronous>, transform_indices = @transform_2, window_bounds = array<i64: 1, 128>}, {transform_indices = @transform_3, window_bounds = array<i64: 1, 256, 16>}]} {
    %c0 = arith.constant 0 : index
    %c0_0 = arith.constant 0 : index
    %c0_1 = arith.constant 0 : index
    %0 = vector.load %arg1[%c0, %c0_0, %c0_1] : memref<1x256x256xbf16, #tpu.memory_space<vmem>>, vector<1x256x256xbf16>
    %1 = vector.shape_cast %0 : vector<1x256x256xbf16> to vector<256x256xbf16>
    %c0_2 = arith.constant 0 : index
    %c0_3 = arith.constant 0 : index
    %2 = vector.load %arg2[%c0_2, %c0_3] : memref<256x128xbf16, #tpu.memory_space<vmem>>, vector<256x128xbf16>
    %cst = arith.constant dense<0.000000e+00> : vector<256x128xf32>
    %3 = tpu.matmul %1, %2, %cst {dimension_numbers = #tpu.dot_dimension_numbers<[1], [0], [0], [1], [0, 0, 1, 1], [], []>} : vector<256x256xbf16>, vector<256x128xbf16>, vector<256x128xf32> -> vector<256x128xf32>
    %c0_4 = arith.constant 0 : index
    %c0_5 = arith.constant 0 : index
    %4 = vector.load %arg3[%c0_4, %c0_5] : memref<1x128xf32, #tpu.memory_space<vmem>>, vector<1x128xf32>
    %5 = vector.broadcast %4 : vector<1x128xf32> to vector<256x128xf32>
    %6 = arith.addf %3, %5 : vector<256x128xf32>
    %cst_6 = arith.constant 0.000000e+00 : f32
    %7 = vector.broadcast %cst_6 : f32 to vector<256x128xf32>
    %8 = arith.maximumf %6, %7 : vector<256x128xf32>
    %cst_7 = arith.constant 0.000000e+00 : f32
    %9 = vector.broadcast %cst_7 : f32 to vector<256x128xf32>
    %10 = arith.maximumf %8, %9 : vector<256x128xf32>
    %11 = vector.extract_strided_slice %10 {offsets = [0, 0], sizes = [256, 16], strides = [1, 1]} : vector<256x128xf32> to vector<256x16xf32>
    %12 = arith.truncf %11 : vector<256x16xf32> to vector<256x16xbf16>
    %c0_8 = arith.constant 0 : index
    %c0_9 = arith.constant 0 : index
    %c0_10 = arith.constant 0 : index
    %13 = vector.load %arg4[%c0_8, %c0_9, %c0_10] : memref<1x256x16xbf16, #tpu.memory_space<vmem>>, vector<1x256x16xbf16>
    %14 = vector.shape_cast %13 : vector<1x256x16xbf16> to vector<256x16xbf16>
    %15 = vector.shape_cast %12 : vector<256x16xbf16> to vector<1x256x16xbf16>
    tpu.vector_store %arg4[%c0_8, %c0_9, %c0_10], %15 {strides = array<i32>} : memref<1x256x16xbf16, #tpu.memory_space<vmem>>, vector<1x256x16xbf16>,
    return
  }
  func.func @transform_0(%arg0: i32) -> (i32, i32, i32) {
    %c0_i32 = arith.constant 0 : i32
    %c0_i32_0 = arith.constant 0 : i32
    %c0_i32_1 = arith.constant 0 : i32
    return %arg0, %c0_i32, %c0_i32_0 : i32, i32, i32
  }
  func.func @transform_1(%arg0: i32) -> (i32, i32) {
    %c0_i32 = arith.constant 0 : i32
    %c0_i32_0 = arith.constant 0 : i32
    %c0_i32_1 = arith.constant 0 : i32
    return %c0_i32, %c0_i32_0 : i32, i32
  }
  func.func @transform_2(%arg0: i32) -> (i32, i32) {
    %c0_i32 = arith.constant 0 : i32
    %c0_i32_0 = arith.constant 0 : i32
    %c0_i32_1 = arith.constant 0 : i32
    return %c0_i32, %c0_i32_0 : i32, i32
  }
  func.func @transform_3(%arg0: i32) -> (i32, i32, i32) {
    %c0_i32 = arith.constant 0 : i32
    %c0_i32_0 = arith.constant 0 : i32
    %c0_i32_1 = arith.constant 0 : i32
    return %arg0, %c0_i32, %c0_i32_0 : i32, i32, i32
  }
}

module attributes {stable_mosaic.version = 11 : i64} {
  func.func @kernel(%arg0: i32, %arg1: memref<1x256x256xbf16, #tpu.memory_space<vmem>>, %arg2: memref<256x128xbf16, #tpu.memory_space<vmem>>, %arg3: memref<1x128xf32, #tpu.memory_space<vmem>>, %arg4: memref<1x128xf32, #tpu.memory_space<vmem>>, %arg5: memref<1x256x128xf32, #tpu.memory_space<vmem>>, %arg6: memref<1x256x16xbf16, #tpu.memory_space<vmem>>) attributes {dimension_semantics = [#tpu.dimension_semantics<parallel>], iteration_bounds = array<i64: 2>, scalar_prefetch = 0 : i64, scratch_operands = 0 : i64, tpu.core_type = #tpu.core_type<tc>, window_params = [{transform_indices = @transform_0, window_bounds = array<i64: 1, 256, 256>}, {pipeline_mode = #tpu.pipeline_mode<synchronous>, transform_indices = @transform_1, window_bounds = array<i64: 256, 128>}, {pipeline_mode = #tpu.pipeline_mode<synchronous>, transform_indices = @transform_2, window_bounds = array<i64: 1, 128>}, {pipeline_mode = #tpu.pipeline_mode<synchronous>, transform_indices = @transform_3, window_bounds = array<i64: 1, 128>}, {transform_indices = @transform_4, window_bounds = array<i64: 1, 256, 128>}, {transform_indices = @transform_5, window_bounds = array<i64: 1, 256, 16>}]} {
    %c0 = arith.constant 0 : index
    %c0_0 = arith.constant 0 : index
    %c0_1 = arith.constant 0 : index
    %0 = vector.load %arg1[%c0, %c0_0, %c0_1] : memref<1x256x256xbf16, #tpu.memory_space<vmem>>, vector<1x256x256xbf16>
    %1 = vector.shape_cast %0 : vector<1x256x256xbf16> to vector<256x256xbf16>
    %c0_2 = arith.constant 0 : index
    %c0_3 = arith.constant 0 : index
    %2 = vector.load %arg2[%c0_2, %c0_3] : memref<256x128xbf16, #tpu.memory_space<vmem>>, vector<256x128xbf16>
    %cst = arith.constant dense<0.000000e+00> : vector<256x128xf32>
    %3 = tpu.matmul %1, %2, %cst {dimension_numbers = #tpu.dot_dimension_numbers<[1], [0], [0], [1], [0, 0, 1, 1], [], []>} : vector<256x256xbf16>, vector<256x128xbf16>, vector<256x128xf32> -> vector<256x128xf32>
    %c0_4 = arith.constant 0 : index
    %c0_5 = arith.constant 0 : index
    %c0_6 = arith.constant 0 : index
    %4 = vector.load %arg5[%c0_4, %c0_5, %c0_6] : memref<1x256x128xf32, #tpu.memory_space<vmem>>, vector<1x256x128xf32>
    %5 = vector.shape_cast %4 : vector<1x256x128xf32> to vector<256x128xf32>
    %6 = arith.addf %3, %5 : vector<256x128xf32>
    %c0_7 = arith.constant 0 : index
    %c0_8 = arith.constant 0 : index
    %7 = vector.load %arg3[%c0_7, %c0_8] : memref<1x128xf32, #tpu.memory_space<vmem>>, vector<1x128xf32>
    %8 = vector.broadcast %7 : vector<1x128xf32> to vector<256x128xf32>
    %9 = arith.mulf %6, %8 : vector<256x128xf32>
    %c0_9 = arith.constant 0 : index
    %c0_10 = arith.constant 0 : index
    %10 = vector.load %arg4[%c0_9, %c0_10] : memref<1x128xf32, #tpu.memory_space<vmem>>, vector<1x128xf32>
    %11 = vector.broadcast %10 : vector<1x128xf32> to vector<256x128xf32>
    %12 = arith.addf %9, %11 : vector<256x128xf32>
    %cst_11 = arith.constant 0.000000e+00 : f32
    %13 = vector.broadcast %cst_11 : f32 to vector<256x128xf32>
    %14 = arith.maximumf %12, %13 : vector<256x128xf32>
    %15 = vector.extract_strided_slice %14 {offsets = [0, 0], sizes = [256, 16], strides = [1, 1]} : vector<256x128xf32> to vector<256x16xf32>
    %16 = arith.truncf %15 : vector<256x16xf32> to vector<256x16xbf16>
    %c0_12 = arith.constant 0 : index
    %c0_13 = arith.constant 0 : index
    %c0_14 = arith.constant 0 : index
    %17 = vector.load %arg6[%c0_12, %c0_13, %c0_14] : memref<1x256x16xbf16, #tpu.memory_space<vmem>>, vector<1x256x16xbf16>
    %18 = vector.shape_cast %17 : vector<1x256x16xbf16> to vector<256x16xbf16>
    %19 = vector.shape_cast %16 : vector<256x16xbf16> to vector<1x256x16xbf16>
    tpu.vector_store %arg6[%c0_12, %c0_13, %c0_14], %19 {strides = array<i32>} : memref<1x256x16xbf16, #tpu.memory_space<vmem>>, vector<1x256x16xbf16>,
    return
  }
  func.func @transform_0(%arg0: i32) -> (i32, i32, i32) {
    %c0_i32 = arith.constant 0 : i32
    %c0_i32_0 = arith.constant 0 : i32
    %c0_i32_1 = arith.constant 0 : i32
    return %arg0, %c0_i32, %c0_i32_0 : i32, i32, i32
  }
  func.func @transform_1(%arg0: i32) -> (i32, i32) {
    %c0_i32 = arith.constant 0 : i32
    %c0_i32_0 = arith.constant 0 : i32
    %c0_i32_1 = arith.constant 0 : i32
    return %c0_i32, %c0_i32_0 : i32, i32
  }
  func.func @transform_2(%arg0: i32) -> (i32, i32) {
    %c0_i32 = arith.constant 0 : i32
    %c0_i32_0 = arith.constant 0 : i32
    %c0_i32_1 = arith.constant 0 : i32
    return %c0_i32, %c0_i32_0 : i32, i32
  }
  func.func @transform_3(%arg0: i32) -> (i32, i32) {
    %c0_i32 = arith.constant 0 : i32
    %c0_i32_0 = arith.constant 0 : i32
    %c0_i32_1 = arith.constant 0 : i32
    return %c0_i32, %c0_i32_0 : i32, i32
  }
  func.func @transform_4(%arg0: i32) -> (i32, i32, i32) {
    %c0_i32 = arith.constant 0 : i32
    %c0_i32_0 = arith.constant 0 : i32
    %c0_i32_1 = arith.constant 0 : i32
    return %arg0, %c0_i32, %c0_i32_0 : i32, i32, i32
  }
  func.func @transform_5(%arg0: i32) -> (i32, i32, i32) {
    %c0_i32 = arith.constant 0 : i32
    %c0_i32_0 = arith.constant 0 : i32
    %c0_i32_1 = arith.constant 0 : i32
    return %arg0, %c0_i32, %c0_i32_0 : i32, i32, i32
  }
}

module attributes {stable_mosaic.version = 11 : i64} {
  func.func @kernel(%arg0: i32, %arg1: memref<1x64x128xbf16, #tpu.memory_space<vmem>>, %arg2: memref<128x128xbf16, #tpu.memory_space<vmem>>, %arg3: memref<1x64x128xf32, #tpu.memory_space<vmem>>) attributes {dimension_semantics = [#tpu.dimension_semantics<parallel>], iteration_bounds = array<i64: 2>, scalar_prefetch = 0 : i64, scratch_operands = 0 : i64, tpu.core_type = #tpu.core_type<tc>, window_params = [{transform_indices = @transform_0, window_bounds = array<i64: 1, 64, 128>}, {pipeline_mode = #tpu.pipeline_mode<synchronous>, transform_indices = @transform_1, window_bounds = array<i64: 128, 128>}, {transform_indices = @transform_2, window_bounds = array<i64: 1, 64, 128>}]} {
    %c0 = arith.constant 0 : index
    %c0_0 = arith.constant 0 : index
    %c0_1 = arith.constant 0 : index
    %0 = vector.load %arg1[%c0, %c0_0, %c0_1] : memref<1x64x128xbf16, #tpu.memory_space<vmem>>, vector<1x64x128xbf16>
    %1 = vector.shape_cast %0 : vector<1x64x128xbf16> to vector<64x128xbf16>
    %c0_2 = arith.constant 0 : index
    %c0_3 = arith.constant 0 : index
    %2 = vector.load %arg2[%c0_2, %c0_3] : memref<128x128xbf16, #tpu.memory_space<vmem>>, vector<128x128xbf16>
    %cst = arith.constant dense<0.000000e+00> : vector<64x128xf32>
    %3 = tpu.matmul %1, %2, %cst {dimension_numbers = #tpu.dot_dimension_numbers<[1], [0], [0], [1], [0, 0, 1, 1], [], []>} : vector<64x128xbf16>, vector<128x128xbf16>, vector<64x128xf32> -> vector<64x128xf32>
    %c0_4 = arith.constant 0 : index
    %c0_5 = arith.constant 0 : index
    %c0_6 = arith.constant 0 : index
    %4 = vector.load %arg3[%c0_4, %c0_5, %c0_6] : memref<1x64x128xf32, #tpu.memory_space<vmem>>, vector<1x64x128xf32>
    %5 = vector.shape_cast %4 : vector<1x64x128xf32> to vector<64x128xf32>
    %6 = vector.shape_cast %3 : vector<64x128xf32> to vector<1x64x128xf32>
    tpu.vector_store %arg3[%c0_4, %c0_5, %c0_6], %6 {strides = array<i32>} : memref<1x64x128xf32, #tpu.memory_space<vmem>>, vector<1x64x128xf32>,
    return
  }
  func.func @transform_0(%arg0: i32) -> (i32, i32, i32) {
    %c0_i32 = arith.constant 0 : i32
    %c0_i32_0 = arith.constant 0 : i32
    %c0_i32_1 = arith.constant 0 : i32
    return %arg0, %c0_i32, %c0_i32_0 : i32, i32, i32
  }
  func.func @transform_1(%arg0: i32) -> (i32, i32) {
    %c0_i32 = arith.constant 0 : i32
    %c0_i32_0 = arith.constant 0 : i32
    %c0_i32_1 = arith.constant 0 : i32
    return %c0_i32, %c0_i32_0 : i32, i32
  }
  func.func @transform_2(%arg0: i32) -> (i32, i32, i32) {
    %c0_i32 = arith.constant 0 : i32
    %c0_i32_0 = arith.constant 0 : i32
    %c0_i32_1 = arith.constant 0 : i32
    return %arg0, %c0_i32, %c0_i32_0 : i32, i32, i32
  }
}

module attributes {stable_mosaic.version = 11 : i64} {
  func.func @kernel(%arg0: i32, %arg1: memref<1x64x256xbf16, #tpu.memory_space<vmem>>, %arg2: memref<256x128xbf16, #tpu.memory_space<vmem>>, %arg3: memref<1x128xf32, #tpu.memory_space<vmem>>, %arg4: memref<1x64x32xbf16, #tpu.memory_space<vmem>>) attributes {dimension_semantics = [#tpu.dimension_semantics<parallel>], iteration_bounds = array<i64: 2>, scalar_prefetch = 0 : i64, scratch_operands = 0 : i64, tpu.core_type = #tpu.core_type<tc>, window_params = [{transform_indices = @transform_0, window_bounds = array<i64: 1, 64, 256>}, {pipeline_mode = #tpu.pipeline_mode<synchronous>, transform_indices = @transform_1, window_bounds = array<i64: 256, 128>}, {pipeline_mode = #tpu.pipeline_mode<synchronous>, transform_indices = @transform_2, window_bounds = array<i64: 1, 128>}, {transform_indices = @transform_3, window_bounds = array<i64: 1, 64, 32>}]} {
    %c0 = arith.constant 0 : index
    %c0_0 = arith.constant 0 : index
    %c0_1 = arith.constant 0 : index
    %0 = vector.load %arg1[%c0, %c0_0, %c0_1] : memref<1x64x256xbf16, #tpu.memory_space<vmem>>, vector<1x64x256xbf16>
    %1 = vector.shape_cast %0 : vector<1x64x256xbf16> to vector<64x256xbf16>
    %c0_2 = arith.constant 0 : index
    %c0_3 = arith.constant 0 : index
    %2 = vector.load %arg2[%c0_2, %c0_3] : memref<256x128xbf16, #tpu.memory_space<vmem>>, vector<256x128xbf16>
    %cst = arith.constant dense<0.000000e+00> : vector<64x128xf32>
    %3 = tpu.matmul %1, %2, %cst {dimension_numbers = #tpu.dot_dimension_numbers<[1], [0], [0], [1], [0, 0, 1, 1], [], []>} : vector<64x256xbf16>, vector<256x128xbf16>, vector<64x128xf32> -> vector<64x128xf32>
    %c0_4 = arith.constant 0 : index
    %c0_5 = arith.constant 0 : index
    %4 = vector.load %arg3[%c0_4, %c0_5] : memref<1x128xf32, #tpu.memory_space<vmem>>, vector<1x128xf32>
    %5 = vector.broadcast %4 : vector<1x128xf32> to vector<64x128xf32>
    %6 = arith.addf %3, %5 : vector<64x128xf32>
    %cst_6 = arith.constant 0.000000e+00 : f32
    %7 = vector.broadcast %cst_6 : f32 to vector<64x128xf32>
    %8 = arith.maximumf %6, %7 : vector<64x128xf32>
    %cst_7 = arith.constant 0.000000e+00 : f32
    %9 = vector.broadcast %cst_7 : f32 to vector<64x128xf32>
    %10 = arith.maximumf %8, %9 : vector<64x128xf32>
    %11 = vector.extract_strided_slice %10 {offsets = [0, 0], sizes = [64, 32], strides = [1, 1]} : vector<64x128xf32> to vector<64x32xf32>
    %12 = arith.truncf %11 : vector<64x32xf32> to vector<64x32xbf16>
    %c0_8 = arith.constant 0 : index
    %c0_9 = arith.constant 0 : index
    %c0_10 = arith.constant 0 : index
    %13 = vector.load %arg4[%c0_8, %c0_9, %c0_10] : memref<1x64x32xbf16, #tpu.memory_space<vmem>>, vector<1x64x32xbf16>
    %14 = vector.shape_cast %13 : vector<1x64x32xbf16> to vector<64x32xbf16>
    %15 = vector.shape_cast %12 : vector<64x32xbf16> to vector<1x64x32xbf16>
    tpu.vector_store %arg4[%c0_8, %c0_9, %c0_10], %15 {strides = array<i32>} : memref<1x64x32xbf16, #tpu.memory_space<vmem>>, vector<1x64x32xbf16>,
    return
  }
  func.func @transform_0(%arg0: i32) -> (i32, i32, i32) {
    %c0_i32 = arith.constant 0 : i32
    %c0_i32_0 = arith.constant 0 : i32
    %c0_i32_1 = arith.constant 0 : i32
    return %arg0, %c0_i32, %c0_i32_0 : i32, i32, i32
  }
  func.func @transform_1(%arg0: i32) -> (i32, i32) {
    %c0_i32 = arith.constant 0 : i32
    %c0_i32_0 = arith.constant 0 : i32
    %c0_i32_1 = arith.constant 0 : i32
    return %c0_i32, %c0_i32_0 : i32, i32
  }
  func.func @transform_2(%arg0: i32) -> (i32, i32) {
    %c0_i32 = arith.constant 0 : i32
    %c0_i32_0 = arith.constant 0 : i32
    %c0_i32_1 = arith.constant 0 : i32
    return %c0_i32, %c0_i32_0 : i32, i32
  }
  func.func @transform_3(%arg0: i32) -> (i32, i32, i32) {
    %c0_i32 = arith.constant 0 : i32
    %c0_i32_0 = arith.constant 0 : i32
    %c0_i32_1 = arith.constant 0 : i32
    return %arg0, %c0_i32, %c0_i32_0 : i32, i32, i32
  }
}

module attributes {stable_mosaic.version = 11 : i64} {
  func.func @kernel(%arg0: i32, %arg1: memref<1x64x384xbf16, #tpu.memory_space<vmem>>, %arg2: memref<384x128xbf16, #tpu.memory_space<vmem>>, %arg3: memref<1x128xf32, #tpu.memory_space<vmem>>, %arg4: memref<1x128xf32, #tpu.memory_space<vmem>>, %arg5: memref<1x64x128xf32, #tpu.memory_space<vmem>>, %arg6: memref<1x64x32xbf16, #tpu.memory_space<vmem>>) attributes {dimension_semantics = [#tpu.dimension_semantics<parallel>], iteration_bounds = array<i64: 2>, scalar_prefetch = 0 : i64, scratch_operands = 0 : i64, tpu.core_type = #tpu.core_type<tc>, window_params = [{transform_indices = @transform_0, window_bounds = array<i64: 1, 64, 384>}, {pipeline_mode = #tpu.pipeline_mode<synchronous>, transform_indices = @transform_1, window_bounds = array<i64: 384, 128>}, {pipeline_mode = #tpu.pipeline_mode<synchronous>, transform_indices = @transform_2, window_bounds = array<i64: 1, 128>}, {pipeline_mode = #tpu.pipeline_mode<synchronous>, transform_indices = @transform_3, window_bounds = array<i64: 1, 128>}, {transform_indices = @transform_4, window_bounds = array<i64: 1, 64, 128>}, {transform_indices = @transform_5, window_bounds = array<i64: 1, 64, 32>}]} {
    %c0 = arith.constant 0 : index
    %c0_0 = arith.constant 0 : index
    %c0_1 = arith.constant 0 : index
    %0 = vector.load %arg1[%c0, %c0_0, %c0_1] : memref<1x64x384xbf16, #tpu.memory_space<vmem>>, vector<1x64x384xbf16>
    %1 = vector.shape_cast %0 : vector<1x64x384xbf16> to vector<64x384xbf16>
    %c0_2 = arith.constant 0 : index
    %c0_3 = arith.constant 0 : index
    %2 = vector.load %arg2[%c0_2, %c0_3] : memref<384x128xbf16, #tpu.memory_space<vmem>>, vector<384x128xbf16>
    %cst = arith.constant dense<0.000000e+00> : vector<64x128xf32>
    %3 = tpu.matmul %1, %2, %cst {dimension_numbers = #tpu.dot_dimension_numbers<[1], [0], [0], [1], [0, 0, 1, 1], [], []>} : vector<64x384xbf16>, vector<384x128xbf16>, vector<64x128xf32> -> vector<64x128xf32>
    %c0_4 = arith.constant 0 : index
    %c0_5 = arith.constant 0 : index
    %c0_6 = arith.constant 0 : index
    %4 = vector.load %arg5[%c0_4, %c0_5, %c0_6] : memref<1x64x128xf32, #tpu.memory_space<vmem>>, vector<1x64x128xf32>
    %5 = vector.shape_cast %4 : vector<1x64x128xf32> to vector<64x128xf32>
    %6 = arith.addf %3, %5 : vector<64x128xf32>
    %c0_7 = arith.constant 0 : index
    %c0_8 = arith.constant 0 : index
    %7 = vector.load %arg3[%c0_7, %c0_8] : memref<1x128xf32, #tpu.memory_space<vmem>>, vector<1x128xf32>
    %8 = vector.broadcast %7 : vector<1x128xf32> to vector<64x128xf32>
    %9 = arith.mulf %6, %8 : vector<64x128xf32>
    %c0_9 = arith.constant 0 : index
    %c0_10 = arith.constant 0 : index
    %10 = vector.load %arg4[%c0_9, %c0_10] : memref<1x128xf32, #tpu.memory_space<vmem>>, vector<1x128xf32>
    %11 = vector.broadcast %10 : vector<1x128xf32> to vector<64x128xf32>
    %12 = arith.addf %9, %11 : vector<64x128xf32>
    %cst_11 = arith.constant 0.000000e+00 : f32
    %13 = vector.broadcast %cst_11 : f32 to vector<64x128xf32>
    %14 = arith.maximumf %12, %13 : vector<64x128xf32>
    %15 = vector.extract_strided_slice %14 {offsets = [0, 0], sizes = [64, 32], strides = [1, 1]} : vector<64x128xf32> to vector<64x32xf32>
    %16 = arith.truncf %15 : vector<64x32xf32> to vector<64x32xbf16>
    %c0_12 = arith.constant 0 : index
    %c0_13 = arith.constant 0 : index
    %c0_14 = arith.constant 0 : index
    %17 = vector.load %arg6[%c0_12, %c0_13, %c0_14] : memref<1x64x32xbf16, #tpu.memory_space<vmem>>, vector<1x64x32xbf16>
    %18 = vector.shape_cast %17 : vector<1x64x32xbf16> to vector<64x32xbf16>
    %19 = vector.shape_cast %16 : vector<64x32xbf16> to vector<1x64x32xbf16>
    tpu.vector_store %arg6[%c0_12, %c0_13, %c0_14], %19 {strides = array<i32>} : memref<1x64x32xbf16, #tpu.memory_space<vmem>>, vector<1x64x32xbf16>,
    return
  }
  func.func @transform_0(%arg0: i32) -> (i32, i32, i32) {
    %c0_i32 = arith.constant 0 : i32
    %c0_i32_0 = arith.constant 0 : i32
    %c0_i32_1 = arith.constant 0 : i32
    return %arg0, %c0_i32, %c0_i32_0 : i32, i32, i32
  }
  func.func @transform_1(%arg0: i32) -> (i32, i32) {
    %c0_i32 = arith.constant 0 : i32
    %c0_i32_0 = arith.constant 0 : i32
    %c0_i32_1 = arith.constant 0 : i32
    return %c0_i32, %c0_i32_0 : i32, i32
  }
  func.func @transform_2(%arg0: i32) -> (i32, i32) {
    %c0_i32 = arith.constant 0 : i32
    %c0_i32_0 = arith.constant 0 : i32
    %c0_i32_1 = arith.constant 0 : i32
    return %c0_i32, %c0_i32_0 : i32, i32
  }
  func.func @transform_3(%arg0: i32) -> (i32, i32) {
    %c0_i32 = arith.constant 0 : i32
    %c0_i32_0 = arith.constant 0 : i32
    %c0_i32_1 = arith.constant 0 : i32
    return %c0_i32, %c0_i32_0 : i32, i32
  }
  func.func @transform_4(%arg0: i32) -> (i32, i32, i32) {
    %c0_i32 = arith.constant 0 : i32
    %c0_i32_0 = arith.constant 0 : i32
    %c0_i32_1 = arith.constant 0 : i32
    return %arg0, %c0_i32, %c0_i32_0 : i32, i32, i32
  }
  func.func @transform_5(%arg0: i32) -> (i32, i32, i32) {
    %c0_i32 = arith.constant 0 : i32
    %c0_i32_0 = arith.constant 0 : i32
    %c0_i32_1 = arith.constant 0 : i32
    return %arg0, %c0_i32, %c0_i32_0 : i32, i32, i32
  }
}

module attributes {stable_mosaic.version = 11 : i64} {
  func.func @kernel(%arg0: i32, %arg1: memref<1x16x128xbf16, #tpu.memory_space<vmem>>, %arg2: memref<128x128xbf16, #tpu.memory_space<vmem>>, %arg3: memref<1x16x128xf32, #tpu.memory_space<vmem>>) attributes {dimension_semantics = [#tpu.dimension_semantics<parallel>], iteration_bounds = array<i64: 2>, scalar_prefetch = 0 : i64, scratch_operands = 0 : i64, tpu.core_type = #tpu.core_type<tc>, window_params = [{transform_indices = @transform_0, window_bounds = array<i64: 1, 16, 128>}, {pipeline_mode = #tpu.pipeline_mode<synchronous>, transform_indices = @transform_1, window_bounds = array<i64: 128, 128>}, {transform_indices = @transform_2, window_bounds = array<i64: 1, 16, 128>}]} {
    %c0 = arith.constant 0 : index
    %c0_0 = arith.constant 0 : index
    %c0_1 = arith.constant 0 : index
    %0 = vector.load %arg1[%c0, %c0_0, %c0_1] : memref<1x16x128xbf16, #tpu.memory_space<vmem>>, vector<1x16x128xbf16>
    %1 = vector.shape_cast %0 : vector<1x16x128xbf16> to vector<16x128xbf16>
    %c0_2 = arith.constant 0 : index
    %c0_3 = arith.constant 0 : index
    %2 = vector.load %arg2[%c0_2, %c0_3] : memref<128x128xbf16, #tpu.memory_space<vmem>>, vector<128x128xbf16>
    %cst = arith.constant dense<0.000000e+00> : vector<16x128xf32>
    %3 = tpu.matmul %1, %2, %cst {dimension_numbers = #tpu.dot_dimension_numbers<[1], [0], [0], [1], [0, 0, 1, 1], [], []>} : vector<16x128xbf16>, vector<128x128xbf16>, vector<16x128xf32> -> vector<16x128xf32>
    %c0_4 = arith.constant 0 : index
    %c0_5 = arith.constant 0 : index
    %c0_6 = arith.constant 0 : index
    %4 = vector.load %arg3[%c0_4, %c0_5, %c0_6] : memref<1x16x128xf32, #tpu.memory_space<vmem>>, vector<1x16x128xf32>
    %5 = vector.shape_cast %4 : vector<1x16x128xf32> to vector<16x128xf32>
    %6 = vector.shape_cast %3 : vector<16x128xf32> to vector<1x16x128xf32>
    tpu.vector_store %arg3[%c0_4, %c0_5, %c0_6], %6 {strides = array<i32>} : memref<1x16x128xf32, #tpu.memory_space<vmem>>, vector<1x16x128xf32>,
    return
  }
  func.func @transform_0(%arg0: i32) -> (i32, i32, i32) {
    %c0_i32 = arith.constant 0 : i32
    %c0_i32_0 = arith.constant 0 : i32
    %c0_i32_1 = arith.constant 0 : i32
    return %arg0, %c0_i32, %c0_i32_0 : i32, i32, i32
  }
  func.func @transform_1(%arg0: i32) -> (i32, i32) {
    %c0_i32 = arith.constant 0 : i32
    %c0_i32_0 = arith.constant 0 : i32
    %c0_i32_1 = arith.constant 0 : i32
    return %c0_i32, %c0_i32_0 : i32, i32
  }
  func.func @transform_2(%arg0: i32) -> (i32, i32, i32) {
    %c0_i32 = arith.constant 0 : i32
    %c0_i32_0 = arith.constant 0 : i32
    %c0_i32_1 = arith.constant 0 : i32
    return %arg0, %c0_i32, %c0_i32_0 : i32, i32, i32
  }
}

module attributes {stable_mosaic.version = 11 : i64} {
  func.func @kernel(%arg0: i32, %arg1: memref<1x16x384xbf16, #tpu.memory_space<vmem>>, %arg2: memref<384x128xbf16, #tpu.memory_space<vmem>>, %arg3: memref<1x128xf32, #tpu.memory_space<vmem>>, %arg4: memref<1x16x64xbf16, #tpu.memory_space<vmem>>) attributes {dimension_semantics = [#tpu.dimension_semantics<parallel>], iteration_bounds = array<i64: 2>, scalar_prefetch = 0 : i64, scratch_operands = 0 : i64, tpu.core_type = #tpu.core_type<tc>, window_params = [{transform_indices = @transform_0, window_bounds = array<i64: 1, 16, 384>}, {pipeline_mode = #tpu.pipeline_mode<synchronous>, transform_indices = @transform_1, window_bounds = array<i64: 384, 128>}, {pipeline_mode = #tpu.pipeline_mode<synchronous>, transform_indices = @transform_2, window_bounds = array<i64: 1, 128>}, {transform_indices = @transform_3, window_bounds = array<i64: 1, 16, 64>}]} {
    %c0 = arith.constant 0 : index
    %c0_0 = arith.constant 0 : index
    %c0_1 = arith.constant 0 : index
    %0 = vector.load %arg1[%c0, %c0_0, %c0_1] : memref<1x16x384xbf16, #tpu.memory_space<vmem>>, vector<1x16x384xbf16>
    %1 = vector.shape_cast %0 : vector<1x16x384xbf16> to vector<16x384xbf16>
    %c0_2 = arith.constant 0 : index
    %c0_3 = arith.constant 0 : index
    %2 = vector.load %arg2[%c0_2, %c0_3] : memref<384x128xbf16, #tpu.memory_space<vmem>>, vector<384x128xbf16>
    %cst = arith.constant dense<0.000000e+00> : vector<16x128xf32>
    %3 = tpu.matmul %1, %2, %cst {dimension_numbers = #tpu.dot_dimension_numbers<[1], [0], [0], [1], [0, 0, 1, 1], [], []>} : vector<16x384xbf16>, vector<384x128xbf16>, vector<16x128xf32> -> vector<16x128xf32>
    %c0_4 = arith.constant 0 : index
    %c0_5 = arith.constant 0 : index
    %4 = vector.load %arg3[%c0_4, %c0_5] : memref<1x128xf32, #tpu.memory_space<vmem>>, vector<1x128xf32>
    %5 = vector.broadcast %4 : vector<1x128xf32> to vector<16x128xf32>
    %6 = arith.addf %3, %5 : vector<16x128xf32>
    %cst_6 = arith.constant 0.000000e+00 : f32
    %7 = vector.broadcast %cst_6 : f32 to vector<16x128xf32>
    %8 = arith.maximumf %6, %7 : vector<16x128xf32>
    %cst_7 = arith.constant 0.000000e+00 : f32
    %9 = vector.broadcast %cst_7 : f32 to vector<16x128xf32>
    %10 = arith.maximumf %8, %9 : vector<16x128xf32>
    %11 = vector.extract_strided_slice %10 {offsets = [0, 0], sizes = [16, 64], strides = [1, 1]} : vector<16x128xf32> to vector<16x64xf32>
    %12 = arith.truncf %11 : vector<16x64xf32> to vector<16x64xbf16>
    %c0_8 = arith.constant 0 : index
    %c0_9 = arith.constant 0 : index
    %c0_10 = arith.constant 0 : index
    %13 = vector.load %arg4[%c0_8, %c0_9, %c0_10] : memref<1x16x64xbf16, #tpu.memory_space<vmem>>, vector<1x16x64xbf16>
    %14 = vector.shape_cast %13 : vector<1x16x64xbf16> to vector<16x64xbf16>
    %15 = vector.shape_cast %12 : vector<16x64xbf16> to vector<1x16x64xbf16>
    tpu.vector_store %arg4[%c0_8, %c0_9, %c0_10], %15 {strides = array<i32>} : memref<1x16x64xbf16, #tpu.memory_space<vmem>>, vector<1x16x64xbf16>,
    return
  }
  func.func @transform_0(%arg0: i32) -> (i32, i32, i32) {
    %c0_i32 = arith.constant 0 : i32
    %c0_i32_0 = arith.constant 0 : i32
    %c0_i32_1 = arith.constant 0 : i32
    return %arg0, %c0_i32, %c0_i32_0 : i32, i32, i32
  }
  func.func @transform_1(%arg0: i32) -> (i32, i32) {
    %c0_i32 = arith.constant 0 : i32
    %c0_i32_0 = arith.constant 0 : i32
    %c0_i32_1 = arith.constant 0 : i32
    return %c0_i32, %c0_i32_0 : i32, i32
  }
  func.func @transform_2(%arg0: i32) -> (i32, i32) {
    %c0_i32 = arith.constant 0 : i32
    %c0_i32_0 = arith.constant 0 : i32
    %c0_i32_1 = arith.constant 0 : i32
    return %c0_i32, %c0_i32_0 : i32, i32
  }
  func.func @transform_3(%arg0: i32) -> (i32, i32, i32) {
    %c0_i32 = arith.constant 0 : i32
    %c0_i32_0 = arith.constant 0 : i32
    %c0_i32_1 = arith.constant 0 : i32
    return %arg0, %c0_i32, %c0_i32_0 : i32, i32, i32
  }
}

module attributes {stable_mosaic.version = 11 : i64} {
  func.func @kernel(%arg0: i32, %arg1: memref<1x16x640xbf16, #tpu.memory_space<vmem>>, %arg2: memref<640x128xbf16, #tpu.memory_space<vmem>>, %arg3: memref<1x128xf32, #tpu.memory_space<vmem>>, %arg4: memref<1x128xf32, #tpu.memory_space<vmem>>, %arg5: memref<1x16x128xf32, #tpu.memory_space<vmem>>, %arg6: memref<1x16x64xbf16, #tpu.memory_space<vmem>>) attributes {dimension_semantics = [#tpu.dimension_semantics<parallel>], iteration_bounds = array<i64: 2>, scalar_prefetch = 0 : i64, scratch_operands = 0 : i64, tpu.core_type = #tpu.core_type<tc>, window_params = [{transform_indices = @transform_0, window_bounds = array<i64: 1, 16, 640>}, {pipeline_mode = #tpu.pipeline_mode<synchronous>, transform_indices = @transform_1, window_bounds = array<i64: 640, 128>}, {pipeline_mode = #tpu.pipeline_mode<synchronous>, transform_indices = @transform_2, window_bounds = array<i64: 1, 128>}, {pipeline_mode = #tpu.pipeline_mode<synchronous>, transform_indices = @transform_3, window_bounds = array<i64: 1, 128>}, {transform_indices = @transform_4, window_bounds = array<i64: 1, 16, 128>}, {transform_indices = @transform_5, window_bounds = array<i64: 1, 16, 64>}]} {
    %c0 = arith.constant 0 : index
    %c0_0 = arith.constant 0 : index
    %c0_1 = arith.constant 0 : index
    %0 = vector.load %arg1[%c0, %c0_0, %c0_1] : memref<1x16x640xbf16, #tpu.memory_space<vmem>>, vector<1x16x640xbf16>
    %1 = vector.shape_cast %0 : vector<1x16x640xbf16> to vector<16x640xbf16>
    %c0_2 = arith.constant 0 : index
    %c0_3 = arith.constant 0 : index
    %2 = vector.load %arg2[%c0_2, %c0_3] : memref<640x128xbf16, #tpu.memory_space<vmem>>, vector<640x128xbf16>
    %cst = arith.constant dense<0.000000e+00> : vector<16x128xf32>
    %3 = tpu.matmul %1, %2, %cst {dimension_numbers = #tpu.dot_dimension_numbers<[1], [0], [0], [1], [0, 0, 1, 1], [], []>} : vector<16x640xbf16>, vector<640x128xbf16>, vector<16x128xf32> -> vector<16x128xf32>
    %c0_4 = arith.constant 0 : index
    %c0_5 = arith.constant 0 : index
    %c0_6 = arith.constant 0 : index
    %4 = vector.load %arg5[%c0_4, %c0_5, %c0_6] : memref<1x16x128xf32, #tpu.memory_space<vmem>>, vector<1x16x128xf32>
    %5 = vector.shape_cast %4 : vector<1x16x128xf32> to vector<16x128xf32>
    %6 = arith.addf %3, %5 : vector<16x128xf32>
    %c0_7 = arith.constant 0 : index
    %c0_8 = arith.constant 0 : index
    %7 = vector.load %arg3[%c0_7, %c0_8] : memref<1x128xf32, #tpu.memory_space<vmem>>, vector<1x128xf32>
    %8 = vector.broadcast %7 : vector<1x128xf32> to vector<16x128xf32>
    %9 = arith.mulf %6, %8 : vector<16x128xf32>
    %c0_9 = arith.constant 0 : index
    %c0_10 = arith.constant 0 : index
    %10 = vector.load %arg4[%c0_9, %c0_10] : memref<1x128xf32, #tpu.memory_space<vmem>>, vector<1x128xf32>
    %11 = vector.broadcast %10 : vector<1x128xf32> to vector<16x128xf32>
    %12 = arith.addf %9, %11 : vector<16x128xf32>
    %cst_11 = arith.constant 0.000000e+00 : f32
    %13 = vector.broadcast %cst_11 : f32 to vector<16x128xf32>
    %14 = arith.maximumf %12, %13 : vector<16x128xf32>
    %15 = vector.extract_strided_slice %14 {offsets = [0, 0], sizes = [16, 64], strides = [1, 1]} : vector<16x128xf32> to vector<16x64xf32>
    %16 = arith.truncf %15 : vector<16x64xf32> to vector<16x64xbf16>
    %c0_12 = arith.constant 0 : index
    %c0_13 = arith.constant 0 : index
    %c0_14 = arith.constant 0 : index
    %17 = vector.load %arg6[%c0_12, %c0_13, %c0_14] : memref<1x16x64xbf16, #tpu.memory_space<vmem>>, vector<1x16x64xbf16>
    %18 = vector.shape_cast %17 : vector<1x16x64xbf16> to vector<16x64xbf16>
    %19 = vector.shape_cast %16 : vector<16x64xbf16> to vector<1x16x64xbf16>
    tpu.vector_store %arg6[%c0_12, %c0_13, %c0_14], %19 {strides = array<i32>} : memref<1x16x64xbf16, #tpu.memory_space<vmem>>, vector<1x16x64xbf16>,
    return
  }
  func.func @transform_0(%arg0: i32) -> (i32, i32, i32) {
    %c0_i32 = arith.constant 0 : i32
    %c0_i32_0 = arith.constant 0 : i32
    %c0_i32_1 = arith.constant 0 : i32
    return %arg0, %c0_i32, %c0_i32_0 : i32, i32, i32
  }
  func.func @transform_1(%arg0: i32) -> (i32, i32) {
    %c0_i32 = arith.constant 0 : i32
    %c0_i32_0 = arith.constant 0 : i32
    %c0_i32_1 = arith.constant 0 : i32
    return %c0_i32, %c0_i32_0 : i32, i32
  }
  func.func @transform_2(%arg0: i32) -> (i32, i32) {
    %c0_i32 = arith.constant 0 : i32
    %c0_i32_0 = arith.constant 0 : i32
    %c0_i32_1 = arith.constant 0 : i32
    return %c0_i32, %c0_i32_0 : i32, i32
  }
  func.func @transform_3(%arg0: i32) -> (i32, i32) {
    %c0_i32 = arith.constant 0 : i32
    %c0_i32_0 = arith.constant 0 : i32
    %c0_i32_1 = arith.constant 0 : i32
    return %c0_i32, %c0_i32_0 : i32, i32
  }
  func.func @transform_4(%arg0: i32) -> (i32, i32, i32) {
    %c0_i32 = arith.constant 0 : i32
    %c0_i32_0 = arith.constant 0 : i32
    %c0_i32_1 = arith.constant 0 : i32
    return %arg0, %c0_i32, %c0_i32_0 : i32, i32, i32
  }
  func.func @transform_5(%arg0: i32) -> (i32, i32, i32) {
    %c0_i32 = arith.constant 0 : i32
    %c0_i32_0 = arith.constant 0 : i32
    %c0_i32_1 = arith.constant 0 : i32
    return %arg0, %c0_i32, %c0_i32_0 : i32, i32, i32
  }
}

module attributes {stable_mosaic.version = 11 : i64} {
  func.func @_gap_fc_kernel(%arg0: i32, %arg1: memref<2x16x64xbf16, #tpu.memory_space<vmem>>, %arg2: memref<64x128xf32, #tpu.memory_space<vmem>>, %arg3: memref<1x128xf32, #tpu.memory_space<vmem>>, %arg4: memref<2x128xf32, #tpu.memory_space<vmem>>) attributes {dimension_semantics = [#tpu.dimension_semantics<arbitrary>], iteration_bounds = array<i64: 1>, scalar_prefetch = 0 : i64, scratch_operands = 0 : i64, tpu.core_type = #tpu.core_type<tc>, window_params = [{pipeline_mode = #tpu.pipeline_mode<synchronous>, transform_indices = @transform_0, window_bounds = array<i64: 2, 16, 64>}, {pipeline_mode = #tpu.pipeline_mode<synchronous>, transform_indices = @transform_1, window_bounds = array<i64: 64, 128>}, {pipeline_mode = #tpu.pipeline_mode<synchronous>, transform_indices = @transform_2, window_bounds = array<i64: 1, 128>}, {pipeline_mode = #tpu.pipeline_mode<synchronous>, transform_indices = @transform_3, window_bounds = array<i64: 2, 128>}]} {
    %c0 = arith.constant 0 : index
    %c0_0 = arith.constant 0 : index
    %c0_1 = arith.constant 0 : index
    %0 = vector.load %arg1[%c0, %c0_0, %c0_1] : memref<2x16x64xbf16, #tpu.memory_space<vmem>>, vector<2x16x64xbf16>
    %1 = arith.extf %0 : vector<2x16x64xbf16> to vector<2x16x64xf32>
    %cst = arith.constant dense<0.000000e+00> : vector<2x64xf32>
    %2 = vector.multi_reduction <add>, %1, %cst [1] : vector<2x16x64xf32> to vector<2x64xf32>
    %cst_2 = arith.constant 1.600000e+01 : f32
    %3 = vector.broadcast %cst_2 : f32 to vector<2x64xf32>
    %4 = arith.divf %2, %3 : vector<2x64xf32>
    %c0_3 = arith.constant 0 : index
    %c0_4 = arith.constant 0 : index
    %5 = vector.load %arg2[%c0_3, %c0_4] : memref<64x128xf32, #tpu.memory_space<vmem>>, vector<64x128xf32>
    %cst_5 = arith.constant dense<0.000000e+00> : vector<2x128xf32>
    %6 = tpu.matmul %4, %5, %cst_5 {dimension_numbers = #tpu.dot_dimension_numbers<[1], [0], [0], [1], [0, 0, 1, 1], [], []>} : vector<2x64xf32>, vector<64x128xf32>, vector<2x128xf32> -> vector<2x128xf32>
    %c0_6 = arith.constant 0 : index
    %c0_7 = arith.constant 0 : index
    %7 = vector.load %arg3[%c0_6, %c0_7] : memref<1x128xf32, #tpu.memory_space<vmem>>, vector<1x128xf32>
    %8 = vector.broadcast %7 : vector<1x128xf32> to vector<2x128xf32>
    %9 = arith.addf %6, %8 : vector<2x128xf32>
    %c0_8 = arith.constant 0 : index
    %c0_9 = arith.constant 0 : index
    %10 = vector.load %arg4[%c0_8, %c0_9] : memref<2x128xf32, #tpu.memory_space<vmem>>, vector<2x128xf32>
    tpu.vector_store %arg4[%c0_8, %c0_9], %9 {strides = array<i32>} : memref<2x128xf32, #tpu.memory_space<vmem>>, vector<2x128xf32>,
    return
  }
  func.func @transform_0(%arg0: i32) -> (i32, i32, i32) {
    %c0_i32 = arith.constant 0 : i32
    %c0_i32_0 = arith.constant 0 : i32
    %c0_i32_1 = arith.constant 0 : i32
    %c0_i32_2 = arith.constant 0 : i32
    return %c0_i32, %c0_i32_0, %c0_i32_1 : i32, i32, i32
  }
  func.func @transform_1(%arg0: i32) -> (i32, i32) {
    %c0_i32 = arith.constant 0 : i32
    %c0_i32_0 = arith.constant 0 : i32
    %c0_i32_1 = arith.constant 0 : i32
    return %c0_i32, %c0_i32_0 : i32, i32
  }
  func.func @transform_2(%arg0: i32) -> (i32, i32) {
    %c0_i32 = arith.constant 0 : i32
    %c0_i32_0 = arith.constant 0 : i32
    %c0_i32_1 = arith.constant 0 : i32
    return %c0_i32, %c0_i32_0 : i32, i32
  }
  func.func @transform_3(%arg0: i32) -> (i32, i32) {
    %c0_i32 = arith.constant 0 : i32
    %c0_i32_0 = arith.constant 0 : i32
    %c0_i32_1 = arith.constant 0 : i32
    return %c0_i32, %c0_i32_0 : i32, i32
  }
}

</mosaic_0001>

<bundles_post_ra>
// kernel: _lambda_.10
= control target key start
LH: loop header
LB: loop body
LE: loop exit
PB: predicated region body
PF: predicated region fallthrough
CT: control target
= control target key end

     0   :  { %s1287_s21 = smov 0   ;;  %s1568_s0 = inlined_call_operand.vmem [shape: bf16[2,256,128], index: 0, kind: input, shape index: {}]   ;;  %s1569_s1 = inlined_call_operand.vmem [shape: bf16[128,128], index: 1, kind: input, shape index: {}]   ;;  %s1570_s2 = inlined_call_operand.vmem [shape: f32[1,128], index: 2, kind: input, shape index: {}]   ;;  %s1571_s3 = inlined_call_operand.vmem [shape: f32[1,128], index: 3, kind: input, shape index: {}]   ;;  %s1572_s4 = inlined_call_operand.vmem [shape: f32[1,128], index: 4, kind: input, shape index: {}]   ;;  %s1573_s5 = inlined_call_operand.vmem [shape: f32[2,256,128], index: 5, kind: output, shape index: {0}]   ;;  %s1574_s6 = inlined_call_operand.vmem [shape: bf16[2,256,16], index: 6, kind: output, shape index: {1}]  }
   0x1 LB: > { %s1017_s22 = sadd.s32 4294967295, %s1250_s21   ;;  %p1021_p0 = scmp.ge.s32.totalorder %s1250_s21, 1  ;;  %s1250_s21 = sphi %s1287_s21, %s17_s21  }
   0x2   : > { %p215_p1 = scmp.lt.s32.totalorder %s1250_s21, 3 }
   0x4   : > { %p216_p2 = pnand %p1021_p0, %p215_p1 }
   0x5   : > { %v1220_v0 = vld [vmem:[%s1569_s1] sm:$0xff] (!%p216_p2)   ;;  %p250_p3 = scmp.lt.s32.totalorder (!%p216_p2), %s1017_s22, 1  ;;  %v1221_v1 = vld [vmem:[%s1569_s1 + $0x8] sm:$0xff] (!%p216_p2)   ;;  %v1222_v2 = vld [vmem:[%s1569_s1 + $0x10] sm:$0xff] (!%p216_p2)   ;;  %vm896_vm0 = vcmask (!%p216_p2), 125952  }
   0x6   : > { %219 = sbr.rel (%p216_p2) target bundleno = 299 (0x12b), region = 40  ;;  %1148 = vmatprep.subr.bf16.mxu0 (!%p216_p2), %v1220_v0  ;;  %1196 = vmatprep.subr.bf16.mxu1 (!%p216_p2), %v1220_v0  ;;  %v1223_v3 = vld [vmem:[%s1569_s1 + $0x18] sm:$0xff] (!%p216_p2)   ;;  %v1224_v6 = vld [vmem:[%s1569_s1 + $0x20] sm:$0xff] (!%p216_p2)   ;;  %v1225_v7 = vld [vmem:[%s1569_s1 + $0x28] sm:$0xff] (!%p216_p2)  }
   0x7   : > { %1149 = vmatpush3.bf16.msra.mxu0 (!%p216_p2), %v1220_v0  ;;  %1204 = vmatpush3.bf16.msra.mxu1 (!%p216_p2), %v1220_v0  ;;  %v1226_v8 = vld [vmem:[%s1569_s1 + $0x30] sm:$0xff] (!%p216_p2)   ;;  %v1227_v9 = vld [vmem:[%s1569_s1 + $0x38] sm:$0xff] (!%p216_p2)   ;;  %v1349_v24 = vld [vmem:[%s1570_s2] ss:$0 sm:$0xff] (!%p216_p2) }
   0x8   : > { %1150 = vmatprep.subr.bf16.mxu0 (!%p216_p2), %v1221_v1  ;;  %1197 = vmatprep.subr.bf16.mxu1 (!%p216_p2), %v1221_v1  ;;  %v1359_v26 = vld [vmem:[%s1571_s3] ss:$0 sm:$0xff] (!%p216_p2) }
   0x9   : > { %v1366_v32 = vld [vmem:[%s1572_s4] ss:$0 sm:$0xff] (!%p216_p2) }
   0xb   : > { %1151 = vmatpush3.bf16.msra.mxu0 (!%p216_p2), %v1221_v1  ;;  %1205 = vmatpush3.bf16.msra.mxu1 (!%p216_p2), %v1221_v1 }
   0xc   : > { %1152 = vmatprep.subr.bf16.mxu0 (!%p216_p2), %v1222_v2  ;;  %1198 = vmatprep.subr.bf16.mxu1 (!%p216_p2), %v1222_v2 }
   0xd   : > { %s1576_s22 = smov (!%p250_p3, %s1017_s22), 1 }
   0xe   : > { %s1089_s29 = sshll.u32 %s1576_s22, 7  ;;  %s1090_s19 = sshll.u32 %s1576_s22, 8 }
   0xf   : > { %s1312_s8 = scalar_lea.vmem %s1568_s0, %s1089_s29  ;;  %1153 = vmatpush3.bf16.msra.mxu0 %v1222_v2  ;;  %1206 = vmatpush3.bf16.msra.mxu1 %v1222_v2  ;;  %s1354_s26 = scalar_lea.vmem %s1573_s5, %s1090_s19 }
  0x10   : > { %v1228_v4 = vld [vmem:[%s1312_s8] sm:$0xff]   ;;  %1154 = vmatprep.subr.bf16.mxu0 %v1223_v3  ;;  %1199 = vmatprep.subr.bf16.mxu1 %v1223_v3  ;;  %v1230_v10 = vld [vmem:[%s1312_s8 + $0x8] sm:$0xff]   ;;  %v1232_v12 = vld [vmem:[%s1312_s8 + $0x10] sm:$0xff]   ;;  %s1401_s10 = scalar_lea.vmem %s1574_s6, %s1089_s29 }
  0x11   : > { %v1229_v5 = vld [vmem:[%s1312_s8 + $0x40] sm:$0xff]   ;;  %1164 = vmatprep.mubr.bf16.mxu0 %v1228_v4  ;;  %v1231_v11 = vld [vmem:[%s1312_s8 + $0x48] sm:$0xff]   ;;  %v1233_v13 = vld [vmem:[%s1312_s8 + $0x50] sm:$0xff]  }
  0x12   : > { %1180 = vmatprep.mubr.bf16.mxu1 %v1229_v5  ;;  %v1234_v14 = vld [vmem:[%s1312_s8 + $0x18] sm:$0xff]   ;;  %v1236_v16 = vld [vmem:[%s1312_s8 + $0x20] sm:$0xff]   ;;  %v1238_v18 = vld [vmem:[%s1312_s8 + $0x28] sm:$0xff]  }
  0x13   : > { %1155 = vmatpush3.bf16.msra.mxu0 %v1223_v3  ;;  %1207 = vmatpush3.bf16.msra.mxu1 %v1223_v3  ;;  %v1235_v15 = vld [vmem:[%s1312_s8 + $0x58] sm:$0xff]   ;;  %v1237_v17 = vld [vmem:[%s1312_s8 + $0x60] sm:$0xff]   ;;  %v1239_v19 = vld [vmem:[%s1312_s8 + $0x68] sm:$0xff]  }
  0x14   : > { %1156 = vmatprep.subr.bf16.mxu0 %v1224_v6  ;;  %1200 = vmatprep.subr.bf16.mxu1 %v1224_v6  ;;  %v1240_v20 = vld [vmem:[%s1312_s8 + $0x30] sm:$0xff]   ;;  %v1242_v22 = vld [vmem:[%s1312_s8 + $0x38] sm:$0xff]  }
  0x15   : > { %v1241_v21 = vld [vmem:[%s1312_s8 + $0x70] sm:$0xff]   ;;  %v1243_v23 = vld [vmem:[%s1312_s8 + $0x78] sm:$0xff]  }
  0x17   : > { %1157 = vmatpush3.bf16.msra.mxu0 %v1224_v6  ;;  %1208 = vmatpush3.bf16.msra.mxu1 %v1224_v6 }
  0x18   : > { %1158 = vmatprep.subr.bf16.mxu0 %v1225_v7  ;;  %1201 = vmatprep.subr.bf16.mxu1 %v1225_v7 }
  0x1b   : > { %1159 = vmatpush3.bf16.msra.mxu0 %v1225_v7  ;;  %1209 = vmatpush3.bf16.msra.mxu1 %v1225_v7 }
  0x1c   : > { %1160 = vmatprep.subr.bf16.mxu0 %v1226_v8  ;;  %1202 = vmatprep.subr.bf16.mxu1 %v1226_v8 }
  0x1f   : > { %1161 = vmatpush3.bf16.msra.mxu0 %v1226_v8  ;;  %1210 = vmatpush3.bf16.msra.mxu1 %v1226_v8 }
  0x20   : > { %1162 = vmatprep.subr.bf16.mxu0 %v1227_v9  ;;  %1203 = vmatprep.subr.bf16.mxu1 %v1227_v9 }
  0x23   : > { %1163 = vmatpush3.bf16.msra.mxu0 %v1227_v9  ;;  %1211 = vmatpush3.bf16.msra.mxu1 %v1227_v9 }
  0x26   : > { %1165 = vmatmul.mubr.bf16.vlgmr.msra.gmra.mrb[0].mxu0 %v1230_v10  ;;  %1181 = vmatmul.mubr.bf16.vlgmr.msra.gmra.mrb[0].mxu1 %v1231_v11 }
  0x27   : > { %1168 = vmatprep.mubr.bf16.mxu0 %v1232_v12  ;;  %1184 = vmatprep.mubr.bf16.mxu1 %v1233_v13 }
  0x2e   : > { %1169 = vmatmul.mubr.bf16.gmra.mrb[4].mxu0 %v1234_v14  ;;  %1185 = vmatmul.mubr.bf16.gmra.mrb[4].mxu1 %v1235_v15 }
  0x2f   : > { %1172 = vmatprep.mubr.bf16.mxu0 %v1236_v16  ;;  %1188 = vmatprep.mubr.bf16.mxu1 %v1237_v17 }
  0x36   : > { %1173 = vmatmul.mubr.bf16.gmra.mrb[8].mxu0 %v1238_v18  ;;  %1189 = vmatmul.mubr.bf16.gmra.mrb[8].mxu1 %v1239_v19 }
  0x37   : > { %1176 = vmatprep.mubr.bf16.mxu0 %v1240_v20  ;;  %1192 = vmatprep.mubr.bf16.mxu1 %v1241_v21 }
  0x3e   : > { %1177 = vmatmul.mubr.bf16.gmra.mrb[12].mxu0 %v1242_v22  ;;  %1193 = vmatmul.mubr.bf16.gmra.mrb[12].mxu1 %v1243_v23 }
  0xf9   : > { %v1166_v25 = vpop.f32.mrb[0].mxu0  ;;  %v1182_v27 = vpop.f32.mrb[0].mxu1 }
  0xfa   : > { %v508_v28 = vadd.f32 %v1166_v25, %v1349_v24  ;;  %v572_v29 = vadd.f32 %v1182_v27, %v1349_v24  ;;  %v499_v30 = vpop.f32.mrb[1].mxu0  ;;  %v563_v31 = vpop.f32.mrb[1].mxu1 }
  0xfb   : > { %v500_v33 = vadd.f32 %v1349_v24, %v499_v30  ;;  %v564_v34 = vadd.f32 %v1349_v24, %v563_v31  ;;  %v1167_v35 = vpop.f32.mrb[2].mxu0  ;;  %v1183_v36 = vpop.f32.mrb[2].mxu1 }
  0xfc   : > { %628 = vst [vmem:[%s1354_s26 + $0x10] sm:$0xff] %v508_v28  ;;  %v667_v37 = vmul.f32 %v1359_v26, %v508_v28  ;;  %644 = vst [vmem:[%s1354_s26 + $0x90] sm:$0xff] %v572_v29  ;;  %v683_v38 = vmul.f32 %v1359_v26, %v572_v29  ;;  %v511_v39 = vadd.f32 %v1167_v35, %v1349_v24  ;;  %v502_v41 = vpop.f32.mrb[3].mxu0  ;;  %v566_v42 = vpop.f32.mrb[3].mxu1 }
  0xfd   : > { %v575_v40 = vadd.f32 %v1183_v36, %v1349_v24  ;;  %626 = vst [vmem:[%s1354_s26] sm:$0xff] %v500_v33  ;;  %v665_v43 = vmul.f32 %v1359_v26, %v500_v33  ;;  %642 = vst [vmem:[%s1354_s26 + $0x80] sm:$0xff] %v564_v34  ;;  %v681_v44 = vmul.f32 %v1359_v26, %v564_v34 }
  0xfe   : > { %v503_v45 = vadd.f32 %v1349_v24, %v502_v41  ;;  %v567_v46 = vadd.f32 %v1349_v24, %v566_v42  ;;  %v706_v47 = vadd.f32 %v1366_v32, %v667_v37  ;;  %v722_v48 = vadd.f32 %v1366_v32, %v683_v38  ;;  %629 = vst [vmem:[%s1354_s26 + $0x18] sm:$0xff] %v511_v39 }
  0xff   : > { %v668_v49 = vmul.f32 %v1359_v26, %v511_v39  ;;  %645 = vst [vmem:[%s1354_s26 + $0x98] sm:$0xff] %v575_v40  ;;  %v684_v50 = vmul.f32 %v1359_v26, %v575_v40  ;;  %v704_v51 = vadd.f32 %v1366_v32, %v665_v43  ;;  %v720_v52 = vadd.f32 %v1366_v32, %v681_v44 }
 0x100   : > { %627 = vst [vmem:[%s1354_s26 + $0x8] sm:$0xff] %v503_v45  ;;  %v666_v53 = vmul.f32 %v1359_v26, %v503_v45  ;;  %643 = vst [vmem:[%s1354_s26 + $0x88] sm:$0xff] %v567_v46  ;;  %v682_v54 = vmul.f32 %v1359_v26, %v567_v46  ;;  %v738_v55 = vmax.f32 %v706_v47, 0.0  ;;  %v754_v56 = vmax.f32 %v722_v48, 0.0 }
 0x101   : > { %v707_v57 = vadd.f32 %v1366_v32, %v668_v49  ;;  %v723_v58 = vadd.f32 %v1366_v32, %v684_v50  ;;  %v736_v59 = vmax.f32 %v704_v51, 0.0  ;;  %v752_v60 = vmax.f32 %v720_v52, 0.0  ;;  %v1170_v63 = vpop.f32.mrb[4].mxu0  ;;  %v1186_v0 = vpop.f32.mrb[4].mxu1 }
 0x102   : > { %v705_v61 = vadd.f32 %v1366_v32, %v666_v53  ;;  %v721_v62 = vadd.f32 %v1366_v32, %v682_v54  ;;  %v1094_v1 = vpack.c.bf16 %v738_v55, %v738_v55  ;;  %v1110_v2 = vpack.c.bf16 %v754_v56, %v754_v56  ;;  %v515_v5 = vpop.f32.mrb[5].mxu0  ;;  %v579_v6 = vpop.f32.mrb[5].mxu1 }
 0x103   : > { %v739_v3 = vmax.f32 %v707_v57, 0.0  ;;  %v755_v4 = vmax.f32 %v723_v58, 0.0  ;;  %v1092_v7 = vpack.c.bf16 %v736_v59, %v736_v59  ;;  %v1108_v8 = vpack.c.bf16 %v752_v60, %v752_v60  ;;  %v1171_v11 = vpop.f32.mrb[6].mxu0  ;;  %v1187_v12 = vpop.f32.mrb[6].mxu1 }
 0x104   : > { %v737_v9 = vmax.f32 %v705_v61, 0.0  ;;  %v753_v10 = vmax.f32 %v721_v62, 0.0  ;;  %899 = vst.msk [vmem:[%s1401_s10 + $0x8] sm:$0xf] %vm896_vm0, %v1094_v1  ;;  %915 = vst.msk [vmem:[%s1401_s10 + $0x48] sm:$0xf] %vm896_vm0, %v1110_v2  ;;  %v524_v15 = vadd.f32 %v1170_v63, %v1349_v24  ;;  %v588_v16 = vadd.f32 %v1186_v0, %v1349_v24 }
 0x105   : > { %v1095_v13 = vpack.c.bf16 %v739_v3, %v739_v3  ;;  %v1111_v14 = vpack.c.bf16 %v755_v4, %v755_v4  ;;  %v518_v17 = vpop.f32.mrb[7].mxu0  ;;  %v582_v18 = vpop.f32.mrb[7].mxu1  ;;  %897 = vst.msk [vmem:[%s1401_s10] sm:$0xf] %vm896_vm0, %v1092_v7  ;;  %913 = vst.msk [vmem:[%s1401_s10 + $0x40] sm:$0xf] %vm896_vm0, %v1108_v8  ;;  %v516_v21 = vadd.f32 %v1349_v24, %v515_v5 }
 0x106   : > { %v1093_v19 = vpack.c.bf16 %v737_v9, %v737_v9  ;;  %v1109_v20 = vpack.c.bf16 %v753_v10, %v753_v10  ;;  %v580_v22 = vadd.f32 %v1349_v24, %v579_v6  ;;  %632 = vst [vmem:[%s1354_s26 + $0x30] sm:$0xff] %v524_v15  ;;  %v671_v23 = vmul.f32 %v1359_v26, %v524_v15 }
 0x107   : > { %900 = vst.msk [vmem:[%s1401_s10 + $0xc] sm:$0xf] %vm896_vm0, %v1095_v13  ;;  %916 = vst.msk [vmem:[%s1401_s10 + $0x4c] sm:$0xf] %vm896_vm0, %v1111_v14  ;;  %v687_v25 = vmul.f32 %v1359_v26, %v588_v16  ;;  %v527_v27 = vadd.f32 %v1171_v11, %v1349_v24  ;;  %v591_v28 = vadd.f32 %v1187_v12, %v1349_v24 }
 0x108   : > { %648 = vst [vmem:[%s1354_s26 + $0xb0] sm:$0xff] %v588_v16  ;;  %898 = vst.msk [vmem:[%s1401_s10 + $0x4] sm:$0xf] %vm896_vm0, %v1093_v19  ;;  %v669_v29 = vmul.f32 %v1359_v26, %v516_v21  ;;  %v685_v30 = vmul.f32 %v1359_v26, %v580_v22  ;;  %v519_v31 = vadd.f32 %v1349_v24, %v518_v17 }
 0x109   : > { %914 = vst.msk [vmem:[%s1401_s10 + $0x44] sm:$0xf] %vm896_vm0, %v1109_v20  ;;  %630 = vst [vmem:[%s1354_s26 + $0x20] sm:$0xff] %v516_v21  ;;  %v583_v33 = vadd.f32 %v1349_v24, %v582_v18  ;;  %v710_v34 = vadd.f32 %v1366_v32, %v671_v23  ;;  %v726_v35 = vadd.f32 %v1366_v32, %v687_v25  ;;  %v1174_v42 = vpop.f32.mrb[8].mxu0  ;;  %v1190_v43 = vpop.f32.mrb[8].mxu1 }
 0x10a   : > { %646 = vst [vmem:[%s1354_s26 + $0xa0] sm:$0xff] %v580_v22  ;;  %633 = vst [vmem:[%s1354_s26 + $0x38] sm:$0xff] %v527_v27  ;;  %v672_v36 = vmul.f32 %v1359_v26, %v527_v27  ;;  %v688_v37 = vmul.f32 %v1359_v26, %v591_v28  ;;  %v708_v38 = vadd.f32 %v1366_v32, %v669_v29  ;;  %v531_v48 = vpop.f32.mrb[9].mxu0  ;;  %v595_v49 = vpop.f32.mrb[9].mxu1 }
 0x10b   : > { %649 = vst [vmem:[%s1354_s26 + $0xb8] sm:$0xff] %v591_v28  ;;  %v724_v39 = vadd.f32 %v1366_v32, %v685_v30  ;;  %631 = vst [vmem:[%s1354_s26 + $0x28] sm:$0xff] %v519_v31  ;;  %v670_v40 = vmul.f32 %v1359_v26, %v519_v31  ;;  %v686_v41 = vmul.f32 %v1359_v26, %v583_v33  ;;  %v742_v44 = vmax.f32 %v710_v34, 0.0  ;;  %v1175_v54 = vpop.f32.mrb[10].mxu0  ;;  %v1191_v55 = vpop.f32.mrb[10].mxu1 }
 0x10c   : > { %647 = vst [vmem:[%s1354_s26 + $0xa8] sm:$0xff] %v583_v33  ;;  %v758_v45 = vmax.f32 %v726_v35, 0.0  ;;  %v711_v46 = vadd.f32 %v1366_v32, %v672_v36  ;;  %v727_v47 = vadd.f32 %v1366_v32, %v688_v37  ;;  %v740_v50 = vmax.f32 %v708_v38, 0.0  ;;  %v534_v60 = vpop.f32.mrb[11].mxu0  ;;  %v598_v61 = vpop.f32.mrb[11].mxu1 }
 0x10d   : > { %v756_v51 = vmax.f32 %v724_v39, 0.0  ;;  %v709_v52 = vadd.f32 %v1366_v32, %v670_v40  ;;  %v725_v53 = vadd.f32 %v1366_v32, %v686_v41  ;;  %v1098_v56 = vpack.c.bf16 %v742_v44, %v742_v44 }
 0x10e   : > { %v1114_v57 = vpack.c.bf16 %v758_v45, %v758_v45  ;;  %v743_v58 = vmax.f32 %v711_v46, 0.0  ;;  %v759_v59 = vmax.f32 %v727_v47, 0.0  ;;  %v1096_v62 = vpack.c.bf16 %v740_v50, %v740_v50 }
 0x10f   : > { %v1112_v63 = vpack.c.bf16 %v756_v51, %v756_v51  ;;  %v741_v0 = vmax.f32 %v709_v52, 0.0  ;;  %v757_v1 = vmax.f32 %v725_v53, 0.0  ;;  %903 = vst.msk [vmem:[%s1401_s10 + $0x18] sm:$0xf] %vm896_vm0, %v1098_v56  ;;  %v540_v4 = vadd.f32 %v1174_v42, %v1349_v24 }
 0x110   : > { %919 = vst.msk [vmem:[%s1401_s10 + $0x58] sm:$0xf] %vm896_vm0, %v1114_v57  ;;  %v1099_v2 = vpack.c.bf16 %v743_v58, %v743_v58  ;;  %v1115_v3 = vpack.c.bf16 %v759_v59, %v759_v59  ;;  %v604_v5 = vadd.f32 %v1190_v43, %v1349_v24  ;;  %901 = vst.msk [vmem:[%s1401_s10 + $0x10] sm:$0xf] %vm896_vm0, %v1096_v62 }
 0x111   : > { %917 = vst.msk [vmem:[%s1401_s10 + $0x50] sm:$0xf] %vm896_vm0, %v1112_v63  ;;  %v1097_v6 = vpack.c.bf16 %v741_v0, %v741_v0  ;;  %v1113_v7 = vpack.c.bf16 %v757_v1, %v757_v1  ;;  %v532_v8 = vadd.f32 %v1349_v24, %v531_v48  ;;  %v596_v9 = vadd.f32 %v1349_v24, %v595_v49  ;;  %v1178_v18 = vpop.f32.mrb[12].mxu0  ;;  %v1194_v19 = vpop.f32.mrb[12].mxu1 }
 0x112   : > { %904 = vst.msk [vmem:[%s1401_s10 + $0x1c] sm:$0xf] %vm896_vm0, %v1099_v2  ;;  %920 = vst.msk [vmem:[%s1401_s10 + $0x5c] sm:$0xf] %vm896_vm0, %v1115_v3  ;;  %v675_v10 = vmul.f32 %v1359_v26, %v540_v4  ;;  %v691_v11 = vmul.f32 %v1359_v26, %v604_v5  ;;  %v543_v12 = vadd.f32 %v1175_v54, %v1349_v24  ;;  %v547_v25 = vpop.f32.mrb[13].mxu0  ;;  %v611_v27 = vpop.f32.mrb[13].mxu1 }
 0x113   : > { %636 = vst [vmem:[%s1354_s26 + $0x50] sm:$0xff] %v540_v4  ;;  %652 = vst [vmem:[%s1354_s26 + $0xd0] sm:$0xff] %v604_v5  ;;  %v607_v13 = vadd.f32 %v1191_v55, %v1349_v24  ;;  %v673_v14 = vmul.f32 %v1359_v26, %v532_v8  ;;  %v689_v15 = vmul.f32 %v1359_v26, %v596_v9  ;;  %v1179_v33 = vpop.f32.mrb[14].mxu0  ;;  %v1195_v34 = vpop.f32.mrb[14].mxu1 }
 0x114   : > { %902 = vst.msk [vmem:[%s1401_s10 + $0x14] sm:$0xf] %vm896_vm0, %v1097_v6  ;;  %918 = vst.msk [vmem:[%s1401_s10 + $0x54] sm:$0xf] %vm896_vm0, %v1113_v7  ;;  %v535_v16 = vadd.f32 %v1349_v24, %v534_v60  ;;  %v599_v17 = vadd.f32 %v1349_v24, %v598_v61  ;;  %v714_v20 = vadd.f32 %v1366_v32, %v675_v10  ;;  %v550_v39 = vpop.f32.mrb[15].mxu0  ;;  %v614_v40 = vpop.f32.mrb[15].mxu1 }
 0x115   : > { %634 = vst [vmem:[%s1354_s26 + $0x40] sm:$0xff] %v532_v8  ;;  %650 = vst [vmem:[%s1354_s26 + $0xc0] sm:$0xff] %v596_v9  ;;  %v730_v21 = vadd.f32 %v1366_v32, %v691_v11  ;;  %v676_v22 = vmul.f32 %v1359_v26, %v543_v12  ;;  %v692_v23 = vmul.f32 %v1359_v26, %v607_v13 }
 0x116   : > { %637 = vst [vmem:[%s1354_s26 + $0x58] sm:$0xff] %v543_v12  ;;  %653 = vst [vmem:[%s1354_s26 + $0xd8] sm:$0xff] %v607_v13  ;;  %v712_v28 = vadd.f32 %v1366_v32, %v673_v14  ;;  %v728_v29 = vadd.f32 %v1366_v32, %v689_v15  ;;  %v674_v30 = vmul.f32 %v1359_v26, %v535_v16  ;;  %v746_v35 = vmax.f32 %v714_v20, 0.0 }
 0x117   : > { %635 = vst [vmem:[%s1354_s26 + $0x48] sm:$0xff] %v535_v16  ;;  %651 = vst [vmem:[%s1354_s26 + $0xc8] sm:$0xff] %v599_v17  ;;  %v690_v31 = vmul.f32 %v1359_v26, %v599_v17  ;;  %v762_v36 = vmax.f32 %v730_v21, 0.0  ;;  %v715_v37 = vadd.f32 %v1366_v32, %v676_v22  ;;  %v731_v38 = vadd.f32 %v1366_v32, %v692_v23 }
 0x118   : > { %v744_v41 = vmax.f32 %v712_v28, 0.0  ;;  %v760_v42 = vmax.f32 %v728_v29, 0.0  ;;  %v713_v43 = vadd.f32 %v1366_v32, %v674_v30  ;;  %v1102_v45 = vpack.c.bf16 %v746_v35, %v746_v35 }
 0x119   : > { %v729_v44 = vadd.f32 %v1366_v32, %v690_v31  ;;  %v1118_v46 = vpack.c.bf16 %v762_v36, %v762_v36  ;;  %v747_v47 = vmax.f32 %v715_v37, 0.0  ;;  %v763_v48 = vmax.f32 %v731_v38, 0.0 }
 0x11a   : > { %v1100_v49 = vpack.c.bf16 %v744_v41, %v744_v41  ;;  %v1116_v50 = vpack.c.bf16 %v760_v42, %v760_v42  ;;  %v745_v51 = vmax.f32 %v713_v43, 0.0  ;;  %907 = vst.msk [vmem:[%s1401_s10 + $0x28] sm:$0xf] %vm896_vm0, %v1102_v45  ;;  %v556_v55 = vadd.f32 %v1178_v18, %v1349_v24 }
 0x11b   : > { %v761_v52 = vmax.f32 %v729_v44, 0.0  ;;  %923 = vst.msk [vmem:[%s1401_s10 + $0x68] sm:$0xf] %vm896_vm0, %v1118_v46  ;;  %v1103_v53 = vpack.c.bf16 %v747_v47, %v747_v47  ;;  %v1119_v54 = vpack.c.bf16 %v763_v48, %v763_v48  ;;  %v620_v56 = vadd.f32 %v1194_v19, %v1349_v24 }
 0x11c   : > { %905 = vst.msk [vmem:[%s1401_s10 + $0x20] sm:$0xf] %vm896_vm0, %v1100_v49  ;;  %921 = vst.msk [vmem:[%s1401_s10 + $0x60] sm:$0xf] %vm896_vm0, %v1116_v50  ;;  %v1101_v57 = vpack.c.bf16 %v745_v51, %v745_v51  ;;  %v548_v59 = vadd.f32 %v1349_v24, %v547_v25  ;;  %v612_v60 = vadd.f32 %v1349_v24, %v611_v27 }
 0x11d   : > { %v1117_v58 = vpack.c.bf16 %v761_v52, %v761_v52  ;;  %908 = vst.msk [vmem:[%s1401_s10 + $0x2c] sm:$0xf] %vm896_vm0, %v1103_v53  ;;  %924 = vst.msk [vmem:[%s1401_s10 + $0x6c] sm:$0xf] %vm896_vm0, %v1119_v54  ;;  %v679_v61 = vmul.f32 %v1359_v26, %v556_v55  ;;  %v695_v62 = vmul.f32 %v1359_v26, %v620_v56 }
 0x11e   : > { %640 = vst [vmem:[%s1354_s26 + $0x70] sm:$0xff] %v556_v55  ;;  %656 = vst [vmem:[%s1354_s26 + $0xf0] sm:$0xff] %v620_v56  ;;  %v559_v63 = vadd.f32 %v1179_v33, %v1349_v24  ;;  %v623_v0 = vadd.f32 %v1195_v34, %v1349_v24  ;;  %v677_v1 = vmul.f32 %v1359_v26, %v548_v59 }
 0x11f   : > { %906 = vst.msk [vmem:[%s1401_s10 + $0x24] sm:$0xf] %vm896_vm0, %v1101_v57  ;;  %922 = vst.msk [vmem:[%s1401_s10 + $0x64] sm:$0xf] %vm896_vm0, %v1117_v58  ;;  %v693_v2 = vmul.f32 %v1359_v26, %v612_v60  ;;  %v551_v3 = vadd.f32 %v1349_v24, %v550_v39  ;;  %v615_v4 = vadd.f32 %v1349_v24, %v614_v40 }
 0x120   : > { %638 = vst [vmem:[%s1354_s26 + $0x60] sm:$0xff] %v548_v59  ;;  %654 = vst [vmem:[%s1354_s26 + $0xe0] sm:$0xff] %v612_v60  ;;  %v718_v5 = vadd.f32 %v1366_v32, %v679_v61  ;;  %v734_v6 = vadd.f32 %v1366_v32, %v695_v62  ;;  %v680_v7 = vmul.f32 %v1359_v26, %v559_v63 }
 0x121   : > { %641 = vst [vmem:[%s1354_s26 + $0x78] sm:$0xff] %v559_v63  ;;  %657 = vst [vmem:[%s1354_s26 + $0xf8] sm:$0xff] %v623_v0  ;;  %v696_v8 = vmul.f32 %v1359_v26, %v623_v0  ;;  %v716_v9 = vadd.f32 %v1366_v32, %v677_v1  ;;  %v732_v10 = vadd.f32 %v1366_v32, %v693_v2 }
 0x122   : > { %639 = vst [vmem:[%s1354_s26 + $0x68] sm:$0xff] %v551_v3  ;;  %v678_v11 = vmul.f32 %v1359_v26, %v551_v3  ;;  %655 = vst [vmem:[%s1354_s26 + $0xe8] sm:$0xff] %v615_v4  ;;  %v694_v24 = vmul.f32 %v1359_v26, %v615_v4  ;;  %v750_v12 = vmax.f32 %v718_v5, 0.0  ;;  %v766_v13 = vmax.f32 %v734_v6, 0.0 }
 0x123   : > { %v719_v14 = vadd.f32 %v1366_v32, %v680_v7  ;;  %v735_v15 = vadd.f32 %v1366_v32, %v696_v8  ;;  %v748_v16 = vmax.f32 %v716_v9, 0.0  ;;  %v764_v17 = vmax.f32 %v732_v10, 0.0 }
 0x124   : > { %v717_v18 = vadd.f32 %v1366_v32, %v678_v11  ;;  %v733_v19 = vadd.f32 %v1366_v32, %v694_v24  ;;  %v1106_v20 = vpack.c.bf16 %v750_v12, %v750_v12  ;;  %v1122_v21 = vpack.c.bf16 %v766_v13, %v766_v13 }
 0x125   : > { %v751_v26 = vmax.f32 %v719_v14, 0.0  ;;  %v767_v22 = vmax.f32 %v735_v15, 0.0  ;;  %v1104_v23 = vpack.c.bf16 %v748_v16, %v748_v16  ;;  %v1120_v25 = vpack.c.bf16 %v764_v17, %v764_v17 }
 0x126   : > { %v749_v27 = vmax.f32 %v717_v18, 0.0  ;;  %v765_v28 = vmax.f32 %v733_v19, 0.0  ;;  %911 = vst.msk [vmem:[%s1401_s10 + $0x38] sm:$0xf] %vm896_vm0, %v1106_v20  ;;  %927 = vst.msk [vmem:[%s1401_s10 + $0x78] sm:$0xf] %vm896_vm0, %v1122_v21 }
 0x127   : > { %v1107_v29 = vpack.c.bf16 %v751_v26, %v751_v26  ;;  %v1123_v30 = vpack.c.bf16 %v767_v22, %v767_v22  ;;  %909 = vst.msk [vmem:[%s1401_s10 + $0x30] sm:$0xf] %vm896_vm0, %v1104_v23  ;;  %925 = vst.msk [vmem:[%s1401_s10 + $0x70] sm:$0xf] %vm896_vm0, %v1120_v25 }
 0x128   : > { %v1105_v32 = vpack.c.bf16 %v749_v27, %v749_v27  ;;  %v1121_v31 = vpack.c.bf16 %v765_v28, %v765_v28 }
 0x129   : > { %912 = vst.msk [vmem:[%s1401_s10 + $0x3c] sm:$0xf] %vm896_vm0, %v1107_v29  ;;  %928 = vst.msk [vmem:[%s1401_s10 + $0x7c] sm:$0xf] %vm896_vm0, %v1123_v30 }
 0x12a   : > { %910 = vst.msk [vmem:[%s1401_s10 + $0x34] sm:$0xf] %vm896_vm0, %v1105_v32  ;;  %926 = vst.msk [vmem:[%s1401_s10 + $0x74] sm:$0xf] %vm896_vm0, %v1121_v31 }
 0x12b PF: > { %s17_s21 = sadd.s32 1, %s1250_s21  }
 0x12c   : > { %p14_p4 = scmp.ge.s32.totalorder %s17_s21, 4  }
 0x12e   :  { %16 = sbr.rel (!%p14_p4) target bundleno = 1 (0x1), region = 82 }

// kernel: _lambda_.11
= control target key start
LH: loop header
LB: loop body
LE: loop exit
PB: predicated region body
PF: predicated region fallthrough
CT: control target
= control target key end

     0   :  { %s1294_s12 = smov 0   ;;  %s1500_s0 = inlined_call_operand.vmem [shape: bf16[2,256,256], index: 0, kind: input, shape index: {}]   ;;  %s1501_s1 = inlined_call_operand.vmem [shape: bf16[256,128], index: 1, kind: input, shape index: {}]   ;;  %s1502_s2 = inlined_call_operand.vmem [shape: f32[1,128], index: 2, kind: input, shape index: {}]   ;;  %s1503_s3 = inlined_call_operand.vmem [shape: bf16[2,256,16], index: 3, kind: output, shape index: {}]  }
   0x1 LB: > { %s940_s13 = sadd.s32 4294967295, %s1272_s12   ;;  %p944_p0 = scmp.ge.s32.totalorder %s1272_s12, 1  ;;  %s1272_s12 = sphi %s1294_s12, %s13_s12  }
   0x2   : > { %p137_p1 = scmp.lt.s32.totalorder %s1272_s12, 3 }
   0x4   : > { %p138_p2 = pnand %p944_p0, %p137_p1 }
   0x5   : > { %v1202_v0 = vld [vmem:[%s1501_s1 + $0x40] sm:$0xff] (!%p138_p2)   ;;  %v1204_v2 = vld [vmem:[%s1501_s1 + $0x48] sm:$0xff] (!%p138_p2)   ;;  %p161_p3 = scmp.lt.s32.totalorder (!%p138_p2), %s940_s13, 1  ;;  %v1206_v4 = vld [vmem:[%s1501_s1 + $0x50] sm:$0xff] (!%p138_p2)   ;;  %vm852_vm0 = vcmask (!%p138_p2), 125952  }
   0x6   : > { %141 = sbr.rel (%p138_p2) target bundleno = 320 (0x140), region = 32  ;;  %v1203_v1 = vld [vmem:[%s1501_s1] sm:$0xff] (!%p138_p2)   ;;  %1066 = vmatprep.subr.bf16.mxu0 (!%p138_p2), %v1202_v0  ;;  %1178 = vmatprep.subr.bf16.mxu1 (!%p138_p2), %v1202_v0  ;;  %v1205_v3 = vld [vmem:[%s1501_s1 + $0x8] sm:$0xff] (!%p138_p2)   ;;  %v1207_v5 = vld [vmem:[%s1501_s1 + $0x10] sm:$0xff] (!%p138_p2)  }
   0x7   : > { %1067 = vmatpush3.bf16.msra.mxu0 (!%p138_p2), %v1203_v1  ;;  %1186 = vmatpush3.bf16.msra.mxu1 (!%p138_p2), %v1203_v1  ;;  %v1208_v6 = vld [vmem:[%s1501_s1 + $0x58] sm:$0xff] (!%p138_p2)   ;;  %v1210_v8 = vld [vmem:[%s1501_s1 + $0x60] sm:$0xff] (!%p138_p2)   ;;  %v1212_v10 = vld [vmem:[%s1501_s1 + $0x68] sm:$0xff] (!%p138_p2)  }
   0x8   : > { %1068 = vmatprep.subr.bf16.mxu0 (!%p138_p2), %v1204_v2  ;;  %1179 = vmatprep.subr.bf16.mxu1 (!%p138_p2), %v1204_v2  ;;  %v1209_v7 = vld [vmem:[%s1501_s1 + $0x18] sm:$0xff] (!%p138_p2)   ;;  %v1211_v9 = vld [vmem:[%s1501_s1 + $0x20] sm:$0xff] (!%p138_p2)   ;;  %v1213_v13 = vld [vmem:[%s1501_s1 + $0x28] sm:$0xff] (!%p138_p2)  }
   0x9   : > { %v1214_v14 = vld [vmem:[%s1501_s1 + $0x70] sm:$0xff] (!%p138_p2)   ;;  %v1216_v16 = vld [vmem:[%s1501_s1 + $0x78] sm:$0xff] (!%p138_p2)   ;;  %v1393_v50 = vld [vmem:[%s1502_s2] ss:$0 sm:$0xff] (!%p138_p2) }
   0xa   : > { %v1215_v15 = vld [vmem:[%s1501_s1 + $0x30] sm:$0xff] (!%p138_p2)   ;;  %v1217_v17 = vld [vmem:[%s1501_s1 + $0x38] sm:$0xff] (!%p138_p2)  }
   0xb   : > { %1069 = vmatpush3.bf16.msra.mxu0 (!%p138_p2), %v1205_v3  ;;  %1187 = vmatpush3.bf16.msra.mxu1 (!%p138_p2), %v1205_v3 }
   0xc   : > { %1070 = vmatprep.subr.bf16.mxu0 (!%p138_p2), %v1206_v4  ;;  %1180 = vmatprep.subr.bf16.mxu1 (!%p138_p2), %v1206_v4 }
   0xd   : > { %s1505_s13 = smov (!%p161_p3, %s940_s13), 1 }
   0xe   : > { %s1032_s30 = sshll.u32 %s1505_s13, 8  ;;  %s1033_s27 = sshll.u32 %s1505_s13, 7 }
   0xf   : > { %1071 = vmatpush3.bf16.msra.mxu0 %v1207_v5  ;;  %1188 = vmatpush3.bf16.msra.mxu1 %v1207_v5  ;;  %s1335_s8 = scalar_lea.vmem %s1500_s0, %s1032_s30  ;;  %s1403_s30 = scalar_lea.vmem %s1503_s3, %s1033_s27 }
  0x10   : > { %1072 = vmatprep.subr.bf16.mxu0 %v1208_v6  ;;  %1181 = vmatprep.subr.bf16.mxu1 %v1208_v6  ;;  %v1220_v11 = vld [vmem:[%s1335_s8 + $0x4] ss:$8 sps:$4 sm:$0xff]   ;;  %v1218_v18 = vld [vmem:[%s1335_s8] ss:$8 sps:$4 sm:$0xff]   ;;  %v1224_v20 = vld [vmem:[%s1335_s8 + $0x14] ss:$8 sps:$4 sm:$0xff]  }
  0x11   : > { %v1223_v12 = vld [vmem:[%s1335_s8 + $0x84] ss:$8 sps:$4 sm:$0xff]   ;;  %531 = vmatprep.mubr.bf16.mxu0 %v1220_v11  ;;  %v1221_v19 = vld [vmem:[%s1335_s8 + $0x80] ss:$8 sps:$4 sm:$0xff]   ;;  %v1226_v21 = vld [vmem:[%s1335_s8 + $0x94] ss:$8 sps:$4 sm:$0xff]  }
  0x12   : > { %595 = vmatprep.mubr.bf16.mxu1 %v1223_v12  ;;  %v1228_v22 = vld [vmem:[%s1335_s8 + $0x10] ss:$8 sps:$4 sm:$0xff]   ;;  %v1230_v24 = vld [vmem:[%s1335_s8 + $0x24] ss:$8 sps:$4 sm:$0xff]   ;;  %v1234_v26 = vld [vmem:[%s1335_s8 + $0x20] ss:$8 sps:$4 sm:$0xff]  }
  0x13   : > { %1073 = vmatpush3.bf16.msra.mxu0 %v1209_v7  ;;  %1189 = vmatpush3.bf16.msra.mxu1 %v1209_v7  ;;  %v1229_v23 = vld [vmem:[%s1335_s8 + $0x90] ss:$8 sps:$4 sm:$0xff]   ;;  %v1232_v25 = vld [vmem:[%s1335_s8 + $0xa4] ss:$8 sps:$4 sm:$0xff]   ;;  %v1235_v27 = vld [vmem:[%s1335_s8 + $0xa0] ss:$8 sps:$4 sm:$0xff]  }
  0x14   : > { %1074 = vmatprep.subr.bf16.mxu0 %v1210_v8  ;;  %1182 = vmatprep.subr.bf16.mxu1 %v1210_v8  ;;  %v1236_v28 = vld [vmem:[%s1335_s8 + $0x34] ss:$8 sps:$4 sm:$0xff]   ;;  %v1240_v30 = vld [vmem:[%s1335_s8 + $0x30] ss:$8 sps:$4 sm:$0xff]   ;;  %v1242_v32 = vld [vmem:[%s1335_s8 + $0x44] ss:$8 sps:$4 sm:$0xff]  }
  0x15   : > { %v1238_v29 = vld [vmem:[%s1335_s8 + $0xb4] ss:$8 sps:$4 sm:$0xff]   ;;  %v1241_v31 = vld [vmem:[%s1335_s8 + $0xb0] ss:$8 sps:$4 sm:$0xff]   ;;  %v1244_v33 = vld [vmem:[%s1335_s8 + $0xc4] ss:$8 sps:$4 sm:$0xff]  }
  0x16   : > { %v1246_v34 = vld [vmem:[%s1335_s8 + $0x40] ss:$8 sps:$4 sm:$0xff]   ;;  %v1248_v36 = vld [vmem:[%s1335_s8 + $0x54] ss:$8 sps:$4 sm:$0xff]   ;;  %v1252_v38 = vld [vmem:[%s1335_s8 + $0x50] ss:$8 sps:$4 sm:$0xff]  }
  0x17   : > { %1075 = vmatpush3.bf16.msra.mxu0 %v1211_v9  ;;  %1190 = vmatpush3.bf16.msra.mxu1 %v1211_v9  ;;  %v1247_v35 = vld [vmem:[%s1335_s8 + $0xc0] ss:$8 sps:$4 sm:$0xff]   ;;  %v1250_v37 = vld [vmem:[%s1335_s8 + $0xd4] ss:$8 sps:$4 sm:$0xff]   ;;  %v1253_v39 = vld [vmem:[%s1335_s8 + $0xd0] ss:$8 sps:$4 sm:$0xff]  }
  0x18   : > { %1076 = vmatprep.subr.bf16.mxu0 %v1212_v10  ;;  %1183 = vmatprep.subr.bf16.mxu1 %v1212_v10  ;;  %v1254_v40 = vld [vmem:[%s1335_s8 + $0x64] ss:$8 sps:$4 sm:$0xff]   ;;  %v1258_v42 = vld [vmem:[%s1335_s8 + $0x60] ss:$8 sps:$4 sm:$0xff]   ;;  %v1260_v44 = vld [vmem:[%s1335_s8 + $0x74] ss:$8 sps:$4 sm:$0xff]  }
  0x19   : > { %v1256_v41 = vld [vmem:[%s1335_s8 + $0xe4] ss:$8 sps:$4 sm:$0xff]   ;;  %v1259_v43 = vld [vmem:[%s1335_s8 + $0xe0] ss:$8 sps:$4 sm:$0xff]   ;;  %v1262_v45 = vld [vmem:[%s1335_s8 + $0xf4] ss:$8 sps:$4 sm:$0xff]  }
  0x1a   : > { %v1264_v46 = vld [vmem:[%s1335_s8 + $0x70] ss:$8 sps:$4 sm:$0xff]  }
  0x1b   : > { %1077 = vmatpush3.bf16.msra.mxu0 %v1213_v13  ;;  %1191 = vmatpush3.bf16.msra.mxu1 %v1213_v13  ;;  %v1265_v47 = vld [vmem:[%s1335_s8 + $0xf0] ss:$8 sps:$4 sm:$0xff]  }
  0x1c   : > { %1078 = vmatprep.subr.bf16.mxu0 %v1214_v14  ;;  %1184 = vmatprep.subr.bf16.mxu1 %v1214_v14 }
  0x1f   : > { %1079 = vmatpush3.bf16.msra.mxu0 %v1215_v15  ;;  %1192 = vmatpush3.bf16.msra.mxu1 %v1215_v15 }
  0x20   : > { %1080 = vmatprep.subr.bf16.mxu0 %v1216_v16  ;;  %1185 = vmatprep.subr.bf16.mxu1 %v1216_v16 }
  0x23   : > { %1081 = vmatpush3.bf16.msra.mxu0 %v1217_v17  ;;  %1193 = vmatpush3.bf16.msra.mxu1 %v1217_v17 }
  0x26   : > { %532 = vmatmul.mubr.bf16.vlgmr.msra.gmra.mrb[0].mxu0 %v1218_v18  ;;  %596 = vmatmul.mubr.bf16.vlgmr.msra.gmra.mrb[0].mxu1 %v1221_v19 }
  0x27   : > { %539 = vmatprep.mubr.bf16.mxu0 %v1224_v20  ;;  %603 = vmatprep.mubr.bf16.mxu1 %v1226_v21 }
  0x2e   : > { %540 = vmatmul.mubr.bf16.gmra.mrb[4].mxu0 %v1228_v22  ;;  %604 = vmatmul.mubr.bf16.gmra.mrb[4].mxu1 %v1229_v23 }
  0x2f   : > { %547 = vmatprep.mubr.bf16.mxu0 %v1230_v24  ;;  %611 = vmatprep.mubr.bf16.mxu1 %v1232_v25 }
  0x36   : > { %548 = vmatmul.mubr.bf16.gmra.mrb[8].mxu0 %v1234_v26  ;;  %612 = vmatmul.mubr.bf16.gmra.mrb[8].mxu1 %v1235_v27 }
  0x37   : > { %555 = vmatprep.mubr.bf16.mxu0 %v1236_v28  ;;  %619 = vmatprep.mubr.bf16.mxu1 %v1238_v29 }
  0x3e   : > { %556 = vmatmul.mubr.bf16.gmra.mrb[12].mxu0 %v1240_v30  ;;  %620 = vmatmul.mubr.bf16.gmra.mrb[12].mxu1 %v1241_v31 }
  0x3f   : > { %563 = vmatprep.mubr.bf16.mxu0 %v1242_v32  ;;  %627 = vmatprep.mubr.bf16.mxu1 %v1244_v33 }
  0x46   : > { %564 = vmatmul.mubr.bf16.gmra.mrb[16].mxu0 %v1246_v34  ;;  %628 = vmatmul.mubr.bf16.gmra.mrb[16].mxu1 %v1247_v35 }
  0x47   : > { %571 = vmatprep.mubr.bf16.mxu0 %v1248_v36  ;;  %635 = vmatprep.mubr.bf16.mxu1 %v1250_v37 }
  0x4e   : > { %572 = vmatmul.mubr.bf16.gmra.mrb[20].mxu0 %v1252_v38  ;;  %636 = vmatmul.mubr.bf16.gmra.mrb[20].mxu1 %v1253_v39 }
  0x4f   : > { %579 = vmatprep.mubr.bf16.mxu0 %v1254_v40  ;;  %643 = vmatprep.mubr.bf16.mxu1 %v1256_v41 }
  0x56   : > { %580 = vmatmul.mubr.bf16.gmra.mrb[24].mxu0 %v1258_v42  ;;  %644 = vmatmul.mubr.bf16.gmra.mrb[24].mxu1 %v1259_v43 }
  0x57   : > { %587 = vmatprep.mubr.bf16.mxu0 %v1260_v44  ;;  %651 = vmatprep.mubr.bf16.mxu1 %v1262_v45 }
  0x5e   : > { %588 = vmatmul.mubr.bf16.gmra.mrb[28].mxu0 %v1264_v46  ;;  %652 = vmatmul.mubr.bf16.gmra.mrb[28].mxu1 %v1265_v47 }
  0xf9   : > { %v1082_v48 = vpop.f32.mrb[0].mxu0  ;;  %v1130_v49 = vpop.f32.mrb[0].mxu1 }
  0xfa   : > { %v1083_v51 = vpop.f32.mrb[1].mxu0  ;;  %v1131_v52 = vpop.f32.mrb[1].mxu1 }
  0xfb   : > { %v1084_v53 = vadd.f32 %v1083_v51, %v1082_v48  ;;  %v1132_v54 = vadd.f32 %v1131_v52, %v1130_v49  ;;  %v1085_v55 = vpop.f32.mrb[2].mxu0  ;;  %v1133_v56 = vpop.f32.mrb[2].mxu1 }
  0xfc   : > { %v1086_v57 = vpop.f32.mrb[3].mxu0  ;;  %v1134_v58 = vpop.f32.mrb[3].mxu1 }
  0xfd   : > { %v534_v59 = vadd.f32 %v1084_v53, %v1393_v50  ;;  %v598_v60 = vadd.f32 %v1132_v54, %v1393_v50  ;;  %v1087_v61 = vadd.f32 %v1086_v57, %v1085_v55  ;;  %v1135_v62 = vadd.f32 %v1134_v58, %v1133_v56 }
  0xff   : > { %v660_v63 = vmax.f32 %v534_v59, 0.0  ;;  %v676_v0 = vmax.f32 %v598_v60, 0.0  ;;  %v537_v1 = vadd.f32 %v1087_v61, %v1393_v50  ;;  %v601_v2 = vadd.f32 %v1135_v62, %v1393_v50 }
 0x101   : > { %v692_v3 = vmax.f32 %v660_v63, 0.0  ;;  %v708_v4 = vmax.f32 %v676_v0, 0.0  ;;  %v661_v5 = vmax.f32 %v537_v1, 0.0  ;;  %v677_v6 = vmax.f32 %v601_v2, 0.0  ;;  %v1088_v7 = vpop.f32.mrb[4].mxu0  ;;  %v1136_v8 = vpop.f32.mrb[4].mxu1 }
 0x102   : > { %v1089_v9 = vpop.f32.mrb[5].mxu0  ;;  %v1137_v10 = vpop.f32.mrb[5].mxu1 }
 0x103   : > { %v1034_v11 = vpack.c.bf16 %v692_v3, %v692_v3  ;;  %v1050_v12 = vpack.c.bf16 %v708_v4, %v708_v4  ;;  %v693_v13 = vmax.f32 %v661_v5, 0.0  ;;  %v709_v14 = vmax.f32 %v677_v6, 0.0  ;;  %v1091_v15 = vpop.f32.mrb[6].mxu0  ;;  %v1139_v16 = vpop.f32.mrb[6].mxu1 }
 0x104   : > { %v1090_v17 = vadd.f32 %v1089_v9, %v1088_v7  ;;  %v1138_v18 = vadd.f32 %v1137_v10, %v1136_v8  ;;  %v1092_v19 = vpop.f32.mrb[7].mxu0  ;;  %v1140_v20 = vpop.f32.mrb[7].mxu1 }
 0x105   : > { %853 = vst.msk [vmem:[%s1403_s30] sm:$0xf] %vm852_vm0, %v1034_v11  ;;  %869 = vst.msk [vmem:[%s1403_s30 + $0x40] sm:$0xf] %vm852_vm0, %v1050_v12  ;;  %v1035_v21 = vpack.c.bf16 %v693_v13, %v693_v13  ;;  %v1051_v22 = vpack.c.bf16 %v709_v14, %v709_v14  ;;  %v1093_v23 = vadd.f32 %v1092_v19, %v1091_v15 }
 0x106   : > { %v1141_v24 = vadd.f32 %v1140_v20, %v1139_v16  ;;  %v542_v25 = vadd.f32 %v1090_v17, %v1393_v50  ;;  %v606_v26 = vadd.f32 %v1138_v18, %v1393_v50 }
 0x107   : > { %854 = vst.msk [vmem:[%s1403_s30 + $0x4] sm:$0xf] %vm852_vm0, %v1035_v21  ;;  %870 = vst.msk [vmem:[%s1403_s30 + $0x44] sm:$0xf] %vm852_vm0, %v1051_v22  ;;  %v545_v27 = vadd.f32 %v1093_v23, %v1393_v50 }
 0x108   : > { %v609_v28 = vadd.f32 %v1141_v24, %v1393_v50  ;;  %v662_v29 = vmax.f32 %v542_v25, 0.0  ;;  %v678_v30 = vmax.f32 %v606_v26, 0.0 }
 0x109   : > { %v663_v31 = vmax.f32 %v545_v27, 0.0  ;;  %v1094_v33 = vpop.f32.mrb[8].mxu0  ;;  %v1142_v34 = vpop.f32.mrb[8].mxu1 }
 0x10a   : > { %v679_v32 = vmax.f32 %v609_v28, 0.0  ;;  %v694_v35 = vmax.f32 %v662_v29, 0.0  ;;  %v710_v36 = vmax.f32 %v678_v30, 0.0  ;;  %v1095_v37 = vpop.f32.mrb[9].mxu0  ;;  %v1143_v38 = vpop.f32.mrb[9].mxu1 }
 0x10b   : > { %v695_v39 = vmax.f32 %v663_v31, 0.0  ;;  %v1096_v41 = vadd.f32 %v1095_v37, %v1094_v33  ;;  %v1144_v42 = vadd.f32 %v1143_v38, %v1142_v34  ;;  %v1097_v43 = vpop.f32.mrb[10].mxu0  ;;  %v1145_v44 = vpop.f32.mrb[10].mxu1 }
 0x10c   : > { %v711_v40 = vmax.f32 %v679_v32, 0.0  ;;  %v1036_v45 = vpack.c.bf16 %v694_v35, %v694_v35  ;;  %v1052_v46 = vpack.c.bf16 %v710_v36, %v710_v36  ;;  %v1098_v47 = vpop.f32.mrb[11].mxu0  ;;  %v1146_v48 = vpop.f32.mrb[11].mxu1 }
 0x10d   : > { %v1037_v49 = vpack.c.bf16 %v695_v39, %v695_v39  ;;  %v550_v52 = vadd.f32 %v1096_v41, %v1393_v50  ;;  %v614_v53 = vadd.f32 %v1144_v42, %v1393_v50  ;;  %v1099_v54 = vadd.f32 %v1098_v47, %v1097_v43 }
 0x10e   : > { %v1053_v51 = vpack.c.bf16 %v711_v40, %v711_v40  ;;  %855 = vst.msk [vmem:[%s1403_s30 + $0x8] sm:$0xf] %vm852_vm0, %v1036_v45  ;;  %871 = vst.msk [vmem:[%s1403_s30 + $0x48] sm:$0xf] %vm852_vm0, %v1052_v46  ;;  %v1147_v55 = vadd.f32 %v1146_v48, %v1145_v44 }
 0x10f   : > { %856 = vst.msk [vmem:[%s1403_s30 + $0xc] sm:$0xf] %vm852_vm0, %v1037_v49  ;;  %v664_v56 = vmax.f32 %v550_v52, 0.0  ;;  %v680_v57 = vmax.f32 %v614_v53, 0.0  ;;  %v553_v58 = vadd.f32 %v1099_v54, %v1393_v50 }
 0x110   : > { %872 = vst.msk [vmem:[%s1403_s30 + $0x4c] sm:$0xf] %vm852_vm0, %v1053_v51  ;;  %v617_v59 = vadd.f32 %v1147_v55, %v1393_v50 }
 0x111   : > { %v696_v60 = vmax.f32 %v664_v56, 0.0  ;;  %v712_v61 = vmax.f32 %v680_v57, 0.0  ;;  %v1100_v62 = vpop.f32.mrb[12].mxu0  ;;  %v1148_v63 = vpop.f32.mrb[12].mxu1  ;;  %v665_v0 = vmax.f32 %v553_v58, 0.0 }
 0x112   : > { %v681_v1 = vmax.f32 %v617_v59, 0.0  ;;  %v1101_v2 = vpop.f32.mrb[13].mxu0  ;;  %v1149_v3 = vpop.f32.mrb[13].mxu1 }
 0x113   : > { %v1038_v4 = vpack.c.bf16 %v696_v60, %v696_v60  ;;  %v1054_v5 = vpack.c.bf16 %v712_v61, %v712_v61  ;;  %v1102_v6 = vadd.f32 %v1101_v2, %v1100_v62  ;;  %v1150_v7 = vadd.f32 %v1149_v3, %v1148_v63  ;;  %v1103_v8 = vpop.f32.mrb[14].mxu0  ;;  %v1151_v9 = vpop.f32.mrb[14].mxu1 }
 0x114   : > { %v697_v10 = vmax.f32 %v665_v0, 0.0  ;;  %v713_v11 = vmax.f32 %v681_v1, 0.0  ;;  %v1104_v12 = vpop.f32.mrb[15].mxu0  ;;  %v1152_v13 = vpop.f32.mrb[15].mxu1 }
 0x115   : > { %857 = vst.msk [vmem:[%s1403_s30 + $0x10] sm:$0xf] %vm852_vm0, %v1038_v4  ;;  %873 = vst.msk [vmem:[%s1403_s30 + $0x50] sm:$0xf] %vm852_vm0, %v1054_v5  ;;  %v558_v14 = vadd.f32 %v1102_v6, %v1393_v50  ;;  %v622_v15 = vadd.f32 %v1150_v7, %v1393_v50  ;;  %v1105_v16 = vadd.f32 %v1104_v12, %v1103_v8 }
 0x116   : > { %v1153_v17 = vadd.f32 %v1152_v13, %v1151_v9  ;;  %v1039_v18 = vpack.c.bf16 %v697_v10, %v697_v10  ;;  %v1055_v19 = vpack.c.bf16 %v713_v11, %v713_v11 }
 0x117   : > { %v666_v20 = vmax.f32 %v558_v14, 0.0  ;;  %v682_v21 = vmax.f32 %v622_v15, 0.0  ;;  %v561_v22 = vadd.f32 %v1105_v16, %v1393_v50 }
 0x118   : > { %v625_v23 = vadd.f32 %v1153_v17, %v1393_v50  ;;  %858 = vst.msk [vmem:[%s1403_s30 + $0x14] sm:$0xf] %vm852_vm0, %v1039_v18  ;;  %874 = vst.msk [vmem:[%s1403_s30 + $0x54] sm:$0xf] %vm852_vm0, %v1055_v19 }
 0x119   : > { %v698_v24 = vmax.f32 %v666_v20, 0.0  ;;  %v714_v25 = vmax.f32 %v682_v21, 0.0  ;;  %v667_v26 = vmax.f32 %v561_v22, 0.0  ;;  %v1106_v28 = vpop.f32.mrb[16].mxu0  ;;  %v1154_v29 = vpop.f32.mrb[16].mxu1 }
 0x11a   : > { %v683_v27 = vmax.f32 %v625_v23, 0.0  ;;  %v1107_v30 = vpop.f32.mrb[17].mxu0  ;;  %v1155_v31 = vpop.f32.mrb[17].mxu1 }
 0x11b   : > { %v1040_v32 = vpack.c.bf16 %v698_v24, %v698_v24  ;;  %v1056_v33 = vpack.c.bf16 %v714_v25, %v714_v25  ;;  %v699_v34 = vmax.f32 %v667_v26, 0.0  ;;  %v1109_v36 = vpop.f32.mrb[18].mxu0  ;;  %v1157_v37 = vpop.f32.mrb[18].mxu1  ;;  %v1108_v38 = vadd.f32 %v1107_v30, %v1106_v28 }
 0x11c   : > { %v715_v35 = vmax.f32 %v683_v27, 0.0  ;;  %v1156_v39 = vadd.f32 %v1155_v31, %v1154_v29  ;;  %v1110_v40 = vpop.f32.mrb[19].mxu0  ;;  %v1158_v41 = vpop.f32.mrb[19].mxu1 }
 0x11d   : > { %859 = vst.msk [vmem:[%s1403_s30 + $0x18] sm:$0xf] %vm852_vm0, %v1040_v32  ;;  %875 = vst.msk [vmem:[%s1403_s30 + $0x58] sm:$0xf] %vm852_vm0, %v1056_v33  ;;  %v1041_v42 = vpack.c.bf16 %v699_v34, %v699_v34  ;;  %v1111_v44 = vadd.f32 %v1110_v40, %v1109_v36  ;;  %v1159_v45 = vadd.f32 %v1158_v41, %v1157_v37 }
 0x11e   : > { %v1057_v43 = vpack.c.bf16 %v715_v35, %v715_v35  ;;  %v566_v46 = vadd.f32 %v1108_v38, %v1393_v50  ;;  %v630_v47 = vadd.f32 %v1156_v39, %v1393_v50 }
 0x11f   : > { %860 = vst.msk [vmem:[%s1403_s30 + $0x1c] sm:$0xf] %vm852_vm0, %v1041_v42  ;;  %v569_v48 = vadd.f32 %v1111_v44, %v1393_v50  ;;  %v633_v49 = vadd.f32 %v1159_v45, %v1393_v50 }
 0x120   : > { %876 = vst.msk [vmem:[%s1403_s30 + $0x5c] sm:$0xf] %vm852_vm0, %v1057_v43  ;;  %v668_v51 = vmax.f32 %v566_v46, 0.0  ;;  %v684_v52 = vmax.f32 %v630_v47, 0.0 }
 0x121   : > { %v669_v53 = vmax.f32 %v569_v48, 0.0  ;;  %v685_v54 = vmax.f32 %v633_v49, 0.0  ;;  %v1112_v55 = vpop.f32.mrb[20].mxu0  ;;  %v1160_v56 = vpop.f32.mrb[20].mxu1 }
 0x122   : > { %v700_v57 = vmax.f32 %v668_v51, 0.0  ;;  %v716_v58 = vmax.f32 %v684_v52, 0.0  ;;  %v1113_v59 = vpop.f32.mrb[21].mxu0  ;;  %v1161_v60 = vpop.f32.mrb[21].mxu1 }
 0x123   : > { %v701_v61 = vmax.f32 %v669_v53, 0.0  ;;  %v717_v62 = vmax.f32 %v685_v54, 0.0  ;;  %v1114_v63 = vadd.f32 %v1113_v59, %v1112_v55  ;;  %v1162_v0 = vadd.f32 %v1161_v60, %v1160_v56  ;;  %v1115_v1 = vpop.f32.mrb[22].mxu0  ;;  %v1163_v2 = vpop.f32.mrb[22].mxu1 }
 0x124   : > { %v1042_v3 = vpack.c.bf16 %v700_v57, %v700_v57  ;;  %v1058_v4 = vpack.c.bf16 %v716_v58, %v716_v58  ;;  %v1116_v5 = vpop.f32.mrb[23].mxu0  ;;  %v1164_v6 = vpop.f32.mrb[23].mxu1 }
 0x125   : > { %v1043_v7 = vpack.c.bf16 %v701_v61, %v701_v61  ;;  %v1059_v8 = vpack.c.bf16 %v717_v62, %v717_v62  ;;  %v574_v9 = vadd.f32 %v1114_v63, %v1393_v50  ;;  %v638_v10 = vadd.f32 %v1162_v0, %v1393_v50 }
 0x126   : > { %861 = vst.msk [vmem:[%s1403_s30 + $0x20] sm:$0xf] %vm852_vm0, %v1042_v3  ;;  %877 = vst.msk [vmem:[%s1403_s30 + $0x60] sm:$0xf] %vm852_vm0, %v1058_v4  ;;  %v1117_v11 = vadd.f32 %v1116_v5, %v1115_v1  ;;  %v1165_v12 = vadd.f32 %v1164_v6, %v1163_v2 }
 0x127   : > { %862 = vst.msk [vmem:[%s1403_s30 + $0x24] sm:$0xf] %vm852_vm0, %v1043_v7  ;;  %878 = vst.msk [vmem:[%s1403_s30 + $0x64] sm:$0xf] %vm852_vm0, %v1059_v8  ;;  %v670_v13 = vmax.f32 %v574_v9, 0.0  ;;  %v686_v14 = vmax.f32 %v638_v10, 0.0 }
 0x128   : > { %v577_v15 = vadd.f32 %v1117_v11, %v1393_v50  ;;  %v641_v16 = vadd.f32 %v1165_v12, %v1393_v50 }
 0x129   : > { %v702_v17 = vmax.f32 %v670_v13, 0.0  ;;  %v718_v18 = vmax.f32 %v686_v14, 0.0  ;;  %v1118_v19 = vpop.f32.mrb[24].mxu0  ;;  %v1166_v20 = vpop.f32.mrb[24].mxu1 }
 0x12a   : > { %v671_v21 = vmax.f32 %v577_v15, 0.0  ;;  %v687_v22 = vmax.f32 %v641_v16, 0.0  ;;  %v1119_v23 = vpop.f32.mrb[25].mxu0  ;;  %v1167_v24 = vpop.f32.mrb[25].mxu1 }
 0x12b   : > { %v1044_v25 = vpack.c.bf16 %v702_v17, %v702_v17  ;;  %v1060_v26 = vpack.c.bf16 %v718_v18, %v718_v18  ;;  %v1120_v27 = vadd.f32 %v1119_v23, %v1118_v19  ;;  %v1168_v28 = vadd.f32 %v1167_v24, %v1166_v20  ;;  %v1121_v29 = vpop.f32.mrb[26].mxu0  ;;  %v1169_v30 = vpop.f32.mrb[26].mxu1 }
 0x12c   : > { %v703_v31 = vmax.f32 %v671_v21, 0.0  ;;  %v719_v32 = vmax.f32 %v687_v22, 0.0  ;;  %v1122_v33 = vpop.f32.mrb[27].mxu0  ;;  %v1170_v34 = vpop.f32.mrb[27].mxu1 }
 0x12d   : > { %863 = vst.msk [vmem:[%s1403_s30 + $0x28] sm:$0xf] %vm852_vm0, %v1044_v25  ;;  %879 = vst.msk [vmem:[%s1403_s30 + $0x68] sm:$0xf] %vm852_vm0, %v1060_v26  ;;  %v582_v35 = vadd.f32 %v1120_v27, %v1393_v50  ;;  %v646_v36 = vadd.f32 %v1168_v28, %v1393_v50  ;;  %v1123_v37 = vadd.f32 %v1122_v33, %v1121_v29 }
 0x12e   : > { %v1171_v38 = vadd.f32 %v1170_v34, %v1169_v30  ;;  %v1045_v39 = vpack.c.bf16 %v703_v31, %v703_v31  ;;  %v1061_v40 = vpack.c.bf16 %v719_v32, %v719_v32 }
 0x12f   : > { %v672_v41 = vmax.f32 %v582_v35, 0.0  ;;  %v688_v42 = vmax.f32 %v646_v36, 0.0  ;;  %v585_v43 = vadd.f32 %v1123_v37, %v1393_v50 }
 0x130   : > { %v649_v44 = vadd.f32 %v1171_v38, %v1393_v50  ;;  %864 = vst.msk [vmem:[%s1403_s30 + $0x2c] sm:$0xf] %vm852_vm0, %v1045_v39  ;;  %880 = vst.msk [vmem:[%s1403_s30 + $0x6c] sm:$0xf] %vm852_vm0, %v1061_v40 }
 0x131   : > { %v704_v45 = vmax.f32 %v672_v41, 0.0  ;;  %v720_v46 = vmax.f32 %v688_v42, 0.0  ;;  %v673_v47 = vmax.f32 %v585_v43, 0.0  ;;  %v1124_v49 = vpop.f32.mrb[28].mxu0  ;;  %v1172_v51 = vpop.f32.mrb[28].mxu1 }
 0x132   : > { %v689_v48 = vmax.f32 %v649_v44, 0.0  ;;  %v1125_v52 = vpop.f32.mrb[29].mxu0  ;;  %v1173_v53 = vpop.f32.mrb[29].mxu1 }
 0x133   : > { %v1046_v54 = vpack.c.bf16 %v704_v45, %v704_v45  ;;  %v1062_v55 = vpack.c.bf16 %v720_v46, %v720_v46  ;;  %v705_v56 = vmax.f32 %v673_v47, 0.0  ;;  %v1127_v58 = vpop.f32.mrb[30].mxu0  ;;  %v1175_v59 = vpop.f32.mrb[30].mxu1  ;;  %v1126_v60 = vadd.f32 %v1125_v52, %v1124_v49 }
 0x134   : > { %v721_v57 = vmax.f32 %v689_v48, 0.0  ;;  %v1174_v61 = vadd.f32 %v1173_v53, %v1172_v51  ;;  %v1128_v62 = vpop.f32.mrb[31].mxu0  ;;  %v1176_v63 = vpop.f32.mrb[31].mxu1 }
 0x135   : > { %865 = vst.msk [vmem:[%s1403_s30 + $0x30] sm:$0xf] %vm852_vm0, %v1046_v54  ;;  %881 = vst.msk [vmem:[%s1403_s30 + $0x70] sm:$0xf] %vm852_vm0, %v1062_v55  ;;  %v1047_v0 = vpack.c.bf16 %v705_v56, %v705_v56  ;;  %v1129_v2 = vadd.f32 %v1128_v62, %v1127_v58  ;;  %v1177_v3 = vadd.f32 %v1176_v63, %v1175_v59 }
 0x136   : > { %v1063_v1 = vpack.c.bf16 %v721_v57, %v721_v57  ;;  %v590_v4 = vadd.f32 %v1126_v60, %v1393_v50  ;;  %v654_v5 = vadd.f32 %v1174_v61, %v1393_v50 }
 0x137   : > { %866 = vst.msk [vmem:[%s1403_s30 + $0x34] sm:$0xf] %vm852_vm0, %v1047_v0  ;;  %v593_v6 = vadd.f32 %v1129_v2, %v1393_v50  ;;  %v657_v7 = vadd.f32 %v1177_v3, %v1393_v50 }
 0x138   : > { %882 = vst.msk [vmem:[%s1403_s30 + $0x74] sm:$0xf] %vm852_vm0, %v1063_v1  ;;  %v674_v8 = vmax.f32 %v590_v4, 0.0  ;;  %v690_v9 = vmax.f32 %v654_v5, 0.0 }
 0x139   : > { %v675_v10 = vmax.f32 %v593_v6, 0.0  ;;  %v691_v11 = vmax.f32 %v657_v7, 0.0 }
 0x13a   : > { %v706_v12 = vmax.f32 %v674_v8, 0.0  ;;  %v722_v13 = vmax.f32 %v690_v9, 0.0 }
 0x13b   : > { %v707_v14 = vmax.f32 %v675_v10, 0.0  ;;  %v723_v15 = vmax.f32 %v691_v11, 0.0 }
 0x13c   : > { %v1048_v16 = vpack.c.bf16 %v706_v12, %v706_v12  ;;  %v1064_v17 = vpack.c.bf16 %v722_v13, %v722_v13 }
 0x13d   : > { %v1049_v18 = vpack.c.bf16 %v707_v14, %v707_v14  ;;  %v1065_v19 = vpack.c.bf16 %v723_v15, %v723_v15 }
 0x13e   : > { %867 = vst.msk [vmem:[%s1403_s30 + $0x38] sm:$0xf] %vm852_vm0, %v1048_v16  ;;  %883 = vst.msk [vmem:[%s1403_s30 + $0x78] sm:$0xf] %vm852_vm0, %v1064_v17 }
 0x13f   : > { %868 = vst.msk [vmem:[%s1403_s30 + $0x3c] sm:$0xf] %vm852_vm0, %v1049_v18  ;;  %884 = vst.msk [vmem:[%s1403_s30 + $0x7c] sm:$0xf] %vm852_vm0, %v1065_v19 }
 0x140 PF: > { %s13_s12 = sadd.s32 1, %s1272_s12  }
 0x141   : > { %p10_p4 = scmp.ge.s32.totalorder %s13_s12, 4  }
 0x143   :  { %12 = sbr.rel (!%p10_p4) target bundleno = 1 (0x1), region = 62 }

// kernel: _lambda_.14
= control target key start
LH: loop header
LB: loop body
LE: loop exit
PB: predicated region body
PF: predicated region fallthrough
CT: control target
= control target key end

     0   :  { %s489_s9 = smov 0   ;;  %s540_s0 = inlined_call_operand.vmem [shape: bf16[2,64,128], index: 0, kind: input, shape index: {}]   ;;  %s541_s1 = inlined_call_operand.vmem [shape: bf16[128,128], index: 1, kind: input, shape index: {}]   ;;  %s542_s2 = inlined_call_operand.vmem [shape: f32[2,64,128], index: 2, kind: output, shape index: {}]  }
   0x1 LB: > { %s369_s10 = sadd.s32 4294967295, %s472_s9   ;;  %p373_p0 = scmp.ge.s32.totalorder %s472_s9, 1  ;;  %s472_s9 = sphi %s489_s9, %s12_s9  }
   0x2   : > { %p112_p1 = scmp.lt.s32.totalorder %s472_s9, 3 }
   0x4   : > { %p113_p2 = pnand %p373_p0, %p112_p1 }
   0x5   : > { %v454_v0 = vld [vmem:[%s541_s1] sm:$0xff] (!%p113_p2)   ;;  %p134_p3 = scmp.lt.s32.totalorder (!%p113_p2), %s369_s10, 1  ;;  %v455_v1 = vld [vmem:[%s541_s1 + $0x8] sm:$0xff] (!%p113_p2)   ;;  %v456_v2 = vld [vmem:[%s541_s1 + $0x10] sm:$0xff] (!%p113_p2)  }
   0x6   : > { %116 = sbr.rel (%p113_p2) target bundleno = 254 (0xfe), region = 28  ;;  %406 = vmatprep.subr.bf16.mxu0 (!%p113_p2), %v454_v0  ;;  %430 = vmatprep.subr.bf16.mxu1 (!%p113_p2), %v454_v0  ;;  %v457_v3 = vld [vmem:[%s541_s1 + $0x18] sm:$0xff] (!%p113_p2)   ;;  %v458_v6 = vld [vmem:[%s541_s1 + $0x20] sm:$0xff] (!%p113_p2)   ;;  %v459_v7 = vld [vmem:[%s541_s1 + $0x28] sm:$0xff] (!%p113_p2)  }
   0x7   : > { %407 = vmatpush3.bf16.msra.mxu0 (!%p113_p2), %v454_v0  ;;  %438 = vmatpush3.bf16.msra.mxu1 (!%p113_p2), %v454_v0  ;;  %v460_v8 = vld [vmem:[%s541_s1 + $0x30] sm:$0xff] (!%p113_p2)   ;;  %v461_v9 = vld [vmem:[%s541_s1 + $0x38] sm:$0xff] (!%p113_p2)  }
   0x8   : > { %408 = vmatprep.subr.bf16.mxu0 (!%p113_p2), %v455_v1  ;;  %431 = vmatprep.subr.bf16.mxu1 (!%p113_p2), %v455_v1 }
   0xb   : > { %409 = vmatpush3.bf16.msra.mxu0 (!%p113_p2), %v455_v1  ;;  %439 = vmatpush3.bf16.msra.mxu1 (!%p113_p2), %v455_v1 }
   0xc   : > { %410 = vmatprep.subr.bf16.mxu0 (!%p113_p2), %v456_v2  ;;  %432 = vmatprep.subr.bf16.mxu1 (!%p113_p2), %v456_v2 }
   0xd   : > { %s544_s10 = smov (!%p134_p3, %s369_s10), 1 }
   0xe   : > { %s392_s17 = sshll.u32 %s544_s10, 5  ;;  %s393_s3 = sshll.u32 %s544_s10, 6 }
   0xf   : > { %s512_s20 = scalar_lea.vmem %s540_s0, %s392_s17  ;;  %411 = vmatpush3.bf16.msra.mxu0 %v456_v2  ;;  %440 = vmatpush3.bf16.msra.mxu1 %v456_v2  ;;  %s143_s6 = scalar_lea.vmem %s542_s2, %s393_s3 }
  0x10   : > { %v462_v4 = vld [vmem:[%s512_s20] sm:$0xff]   ;;  %v463_v5 = vld [vmem:[%s512_s20 + $0x10] sm:$0xff]   ;;  %412 = vmatprep.subr.bf16.mxu0 %v457_v3  ;;  %433 = vmatprep.subr.bf16.mxu1 %v457_v3  ;;  %v464_v10 = vld [vmem:[%s512_s20 + $0x8] sm:$0xff]  }
  0x11   : > { %422 = vmatprep.mubr.bf16.mxu0 %v462_v4  ;;  %426 = vmatprep.mubr.bf16.mxu1 %v463_v5  ;;  %v465_v11 = vld [vmem:[%s512_s20 + $0x18] sm:$0xff]  }
  0x13   : > { %413 = vmatpush3.bf16.msra.mxu0 %v457_v3  ;;  %441 = vmatpush3.bf16.msra.mxu1 %v457_v3 }
  0x14   : > { %414 = vmatprep.subr.bf16.mxu0 %v458_v6  ;;  %434 = vmatprep.subr.bf16.mxu1 %v458_v6 }
  0x17   : > { %415 = vmatpush3.bf16.msra.mxu0 %v458_v6  ;;  %442 = vmatpush3.bf16.msra.mxu1 %v458_v6 }
  0x18   : > { %416 = vmatprep.subr.bf16.mxu0 %v459_v7  ;;  %435 = vmatprep.subr.bf16.mxu1 %v459_v7 }
  0x1b   : > { %417 = vmatpush3.bf16.msra.mxu0 %v459_v7  ;;  %443 = vmatpush3.bf16.msra.mxu1 %v459_v7 }
  0x1c   : > { %418 = vmatprep.subr.bf16.mxu0 %v460_v8  ;;  %436 = vmatprep.subr.bf16.mxu1 %v460_v8 }
  0x1f   : > { %419 = vmatpush3.bf16.msra.mxu0 %v460_v8  ;;  %444 = vmatpush3.bf16.msra.mxu1 %v460_v8 }
  0x20   : > { %420 = vmatprep.subr.bf16.mxu0 %v461_v9  ;;  %437 = vmatprep.subr.bf16.mxu1 %v461_v9 }
  0x23   : > { %421 = vmatpush3.bf16.msra.mxu0 %v461_v9  ;;  %445 = vmatpush3.bf16.msra.mxu1 %v461_v9 }
  0x26   : > { %423 = vmatmul.mubr.bf16.vlgmr.msra.gmra.mrb[0].mxu0 %v464_v10  ;;  %427 = vmatmul.mubr.bf16.vlgmr.msra.gmra.mrb[0].mxu1 %v465_v11 }
  0xf9   : > { %v424_v12 = vpop.f32.mrb[0].mxu0  ;;  %v428_v13 = vpop.f32.mrb[0].mxu1 }
  0xfa   : > { %308 = vst [vmem:[%s143_s6 + $0x10] sm:$0xff] %v424_v12  ;;  %312 = vst [vmem:[%s143_s6 + $0x30] sm:$0xff] %v428_v13  ;;  %v275_v14 = vpop.f32.mrb[1].mxu0  ;;  %v291_v15 = vpop.f32.mrb[1].mxu1 }
  0xfb   : > { %306 = vst [vmem:[%s143_s6] sm:$0xff] %v275_v14  ;;  %310 = vst [vmem:[%s143_s6 + $0x20] sm:$0xff] %v291_v15  ;;  %v425_v16 = vpop.f32.mrb[2].mxu0  ;;  %v429_v17 = vpop.f32.mrb[2].mxu1 }
  0xfc   : > { %309 = vst [vmem:[%s143_s6 + $0x18] sm:$0xff] %v425_v16  ;;  %313 = vst [vmem:[%s143_s6 + $0x38] sm:$0xff] %v429_v17  ;;  %v278_v18 = vpop.f32.mrb[3].mxu0  ;;  %v294_v19 = vpop.f32.mrb[3].mxu1 }
  0xfd   : > { %307 = vst [vmem:[%s143_s6 + $0x8] sm:$0xff] %v278_v18  ;;  %311 = vst [vmem:[%s143_s6 + $0x28] sm:$0xff] %v294_v19 }
  0xfe PF: > { %s12_s9 = sadd.s32 1, %s472_s9  }
  0xff   : > { %p9_p4 = scmp.ge.s32.totalorder %s12_s9, 4  }
 0x101   :  { %11 = sbr.rel (!%p9_p4) target bundleno = 1 (0x1), region = 58 }

// kernel: _lambda_.12
= control target key start
LH: loop header
LB: loop body
LE: loop exit
PB: predicated region body
PF: predicated region fallthrough
CT: control target
= control target key end

     0   :  { %s1465_s18 = smov 0   ;;  %s1749_s0 = inlined_call_operand.vmem [shape: bf16[2,256,256], index: 0, kind: input, shape index: {}]   ;;  %s1750_s1 = inlined_call_operand.vmem [shape: bf16[256,128], index: 1, kind: input, shape index: {}]   ;;  %s1751_s2 = inlined_call_operand.vmem [shape: f32[1,128], index: 2, kind: input, shape index: {}]   ;;  %s1752_s3 = inlined_call_operand.vmem [shape: f32[1,128], index: 3, kind: input, shape index: {}]   ;;  %s1753_s4 = inlined_call_operand.vmem [shape: f32[2,256,128], index: 4, kind: input, shape index: {}]   ;;  %s1754_s5 = inlined_call_operand.vmem [shape: bf16[2,256,16], index: 5, kind: output, shape index: {}]  }
   0x1 LB: > { %s1097_s19 = sadd.s32 4294967295, %s1433_s18   ;;  %p1101_p0 = scmp.ge.s32.totalorder %s1433_s18, 1  ;;  %s1433_s18 = sphi %s1465_s18, %s15_s18  }
   0x2   : > { %p197_p1 = scmp.lt.s32.totalorder %s1433_s18, 3 }
   0x4   : > { %p198_p2 = pnand %p1101_p0, %p197_p1 }
   0x5   : > { %v1363_v0 = vld [vmem:[%s1750_s1 + $0x40] sm:$0xff] (!%p198_p2)   ;;  %v1365_v2 = vld [vmem:[%s1750_s1 + $0x48] sm:$0xff] (!%p198_p2)   ;;  %p230_p3 = scmp.lt.s32.totalorder (!%p198_p2), %s1097_s19, 1  ;;  %v1367_v4 = vld [vmem:[%s1750_s1 + $0x50] sm:$0xff] (!%p198_p2)   ;;  %vm997_vm0 = vcmask (!%p198_p2), 125952  }
   0x6   : > { %201 = sbr.rel (%p198_p2) target bundleno = 323 (0x143), region = 40  ;;  %v1364_v1 = vld [vmem:[%s1750_s1] sm:$0xff] (!%p198_p2)   ;;  %1227 = vmatprep.subr.bf16.mxu0 (!%p198_p2), %v1363_v0  ;;  %1339 = vmatprep.subr.bf16.mxu1 (!%p198_p2), %v1363_v0  ;;  %v1366_v3 = vld [vmem:[%s1750_s1 + $0x8] sm:$0xff] (!%p198_p2)   ;;  %v1368_v5 = vld [vmem:[%s1750_s1 + $0x10] sm:$0xff] (!%p198_p2)  }
   0x7   : > { %1228 = vmatpush3.bf16.msra.mxu0 (!%p198_p2), %v1364_v1  ;;  %1347 = vmatpush3.bf16.msra.mxu1 (!%p198_p2), %v1364_v1  ;;  %v1369_v6 = vld [vmem:[%s1750_s1 + $0x58] sm:$0xff] (!%p198_p2)   ;;  %v1371_v8 = vld [vmem:[%s1750_s1 + $0x60] sm:$0xff] (!%p198_p2)   ;;  %v1373_v10 = vld [vmem:[%s1750_s1 + $0x68] sm:$0xff] (!%p198_p2)  }
   0x8   : > { %1229 = vmatprep.subr.bf16.mxu0 (!%p198_p2), %v1365_v2  ;;  %1340 = vmatprep.subr.bf16.mxu1 (!%p198_p2), %v1365_v2  ;;  %v1370_v7 = vld [vmem:[%s1750_s1 + $0x18] sm:$0xff] (!%p198_p2)   ;;  %v1372_v9 = vld [vmem:[%s1750_s1 + $0x20] sm:$0xff] (!%p198_p2)   ;;  %v1374_v13 = vld [vmem:[%s1750_s1 + $0x28] sm:$0xff] (!%p198_p2)  }
   0x9   : > { %v1375_v14 = vld [vmem:[%s1750_s1 + $0x70] sm:$0xff] (!%p198_p2)   ;;  %v1377_v16 = vld [vmem:[%s1750_s1 + $0x78] sm:$0xff] (!%p198_p2)   ;;  %v1575_v58 = vld [vmem:[%s1751_s2] ss:$0 sm:$0xff] (!%p198_p2) }
   0xa   : > { %v1376_v15 = vld [vmem:[%s1750_s1 + $0x30] sm:$0xff] (!%p198_p2)   ;;  %v1378_v17 = vld [vmem:[%s1750_s1 + $0x38] sm:$0xff] (!%p198_p2)  }
   0xb   : > { %1230 = vmatpush3.bf16.msra.mxu0 (!%p198_p2), %v1366_v3  ;;  %1348 = vmatpush3.bf16.msra.mxu1 (!%p198_p2), %v1366_v3  ;;  %v1582_v3 = vld [vmem:[%s1752_s3] ss:$0 sm:$0xff] (!%p198_p2) }
   0xc   : > { %1231 = vmatprep.subr.bf16.mxu0 (!%p198_p2), %v1367_v4  ;;  %1341 = vmatprep.subr.bf16.mxu1 (!%p198_p2), %v1367_v4 }
   0xd   : > { %s1756_s19 = smov (!%p230_p3, %s1097_s19), 1 }
   0xe   : > { %s1192_s11 = sshll.u32 %s1756_s19, 8  ;;  %s1194_s15 = sshll.u32 %s1756_s19, 7 }
   0xf   : > { %1232 = vmatpush3.bf16.msra.mxu0 %v1368_v5  ;;  %1349 = vmatpush3.bf16.msra.mxu1 %v1368_v5  ;;  %s1508_s16 = scalar_lea.vmem %s1749_s0, %s1192_s11  ;;  %s1568_s10 = scalar_lea.vmem %s1753_s4, %s1192_s11 }
  0x10   : > { %1233 = vmatprep.subr.bf16.mxu0 %v1369_v6  ;;  %1342 = vmatprep.subr.bf16.mxu1 %v1369_v6  ;;  %v1381_v11 = vld [vmem:[%s1508_s16 + $0x4] ss:$8 sps:$4 sm:$0xff]   ;;  %v1379_v18 = vld [vmem:[%s1508_s16] ss:$8 sps:$4 sm:$0xff]   ;;  %v1385_v20 = vld [vmem:[%s1508_s16 + $0x14] ss:$8 sps:$4 sm:$0xff]   ;;  %s1598_s17 = scalar_lea.vmem %s1754_s5, %s1194_s15 }
  0x11   : > { %v1384_v12 = vld [vmem:[%s1508_s16 + $0x84] ss:$8 sps:$4 sm:$0xff]   ;;  %630 = vmatprep.mubr.bf16.mxu0 %v1381_v11  ;;  %v1382_v19 = vld [vmem:[%s1508_s16 + $0x80] ss:$8 sps:$4 sm:$0xff]   ;;  %v1387_v21 = vld [vmem:[%s1508_s16 + $0x94] ss:$8 sps:$4 sm:$0xff]  }
  0x12   : > { %694 = vmatprep.mubr.bf16.mxu1 %v1384_v12  ;;  %v1389_v22 = vld [vmem:[%s1508_s16 + $0x10] ss:$8 sps:$4 sm:$0xff]   ;;  %v1391_v24 = vld [vmem:[%s1508_s16 + $0x24] ss:$8 sps:$4 sm:$0xff]   ;;  %v1395_v26 = vld [vmem:[%s1508_s16 + $0x20] ss:$8 sps:$4 sm:$0xff]  }
  0x13   : > { %1234 = vmatpush3.bf16.msra.mxu0 %v1370_v7  ;;  %1350 = vmatpush3.bf16.msra.mxu1 %v1370_v7  ;;  %v1390_v23 = vld [vmem:[%s1508_s16 + $0x90] ss:$8 sps:$4 sm:$0xff]   ;;  %v1393_v25 = vld [vmem:[%s1508_s16 + $0xa4] ss:$8 sps:$4 sm:$0xff]   ;;  %v1396_v27 = vld [vmem:[%s1508_s16 + $0xa0] ss:$8 sps:$4 sm:$0xff]  }
  0x14   : > { %1235 = vmatprep.subr.bf16.mxu0 %v1371_v8  ;;  %1343 = vmatprep.subr.bf16.mxu1 %v1371_v8  ;;  %v1397_v28 = vld [vmem:[%s1508_s16 + $0x34] ss:$8 sps:$4 sm:$0xff]   ;;  %v1401_v30 = vld [vmem:[%s1508_s16 + $0x30] ss:$8 sps:$4 sm:$0xff]   ;;  %v1403_v32 = vld [vmem:[%s1508_s16 + $0x44] ss:$8 sps:$4 sm:$0xff]  }
  0x15   : > { %v1399_v29 = vld [vmem:[%s1508_s16 + $0xb4] ss:$8 sps:$4 sm:$0xff]   ;;  %v1402_v31 = vld [vmem:[%s1508_s16 + $0xb0] ss:$8 sps:$4 sm:$0xff]   ;;  %v1405_v33 = vld [vmem:[%s1508_s16 + $0xc4] ss:$8 sps:$4 sm:$0xff]  }
  0x16   : > { %v1407_v34 = vld [vmem:[%s1508_s16 + $0x40] ss:$8 sps:$4 sm:$0xff]   ;;  %v1409_v36 = vld [vmem:[%s1508_s16 + $0x54] ss:$8 sps:$4 sm:$0xff]   ;;  %v1413_v38 = vld [vmem:[%s1508_s16 + $0x50] ss:$8 sps:$4 sm:$0xff]  }
  0x17   : > { %1236 = vmatpush3.bf16.msra.mxu0 %v1372_v9  ;;  %1351 = vmatpush3.bf16.msra.mxu1 %v1372_v9  ;;  %v1408_v35 = vld [vmem:[%s1508_s16 + $0xc0] ss:$8 sps:$4 sm:$0xff]   ;;  %v1411_v37 = vld [vmem:[%s1508_s16 + $0xd4] ss:$8 sps:$4 sm:$0xff]   ;;  %v1414_v39 = vld [vmem:[%s1508_s16 + $0xd0] ss:$8 sps:$4 sm:$0xff]  }
  0x18   : > { %1237 = vmatprep.subr.bf16.mxu0 %v1373_v10  ;;  %1344 = vmatprep.subr.bf16.mxu1 %v1373_v10  ;;  %v1415_v40 = vld [vmem:[%s1508_s16 + $0x64] ss:$8 sps:$4 sm:$0xff]   ;;  %v1419_v42 = vld [vmem:[%s1508_s16 + $0x60] ss:$8 sps:$4 sm:$0xff]   ;;  %v1421_v44 = vld [vmem:[%s1508_s16 + $0x74] ss:$8 sps:$4 sm:$0xff]  }
  0x19   : > { %v1417_v41 = vld [vmem:[%s1508_s16 + $0xe4] ss:$8 sps:$4 sm:$0xff]   ;;  %v1420_v43 = vld [vmem:[%s1508_s16 + $0xe0] ss:$8 sps:$4 sm:$0xff]   ;;  %v1423_v45 = vld [vmem:[%s1508_s16 + $0xf4] ss:$8 sps:$4 sm:$0xff]  }
  0x1a   : > { %v1425_v46 = vld [vmem:[%s1508_s16 + $0x70] ss:$8 sps:$4 sm:$0xff]   ;;  %v310_v50 = vld [vmem:[%s1568_s10] sm:$0xff]  ;;  %v311_v59 = vld [vmem:[%s1568_s10 + $0x8] sm:$0xff] }
  0x1b   : > { %1238 = vmatpush3.bf16.msra.mxu0 %v1374_v13  ;;  %1352 = vmatpush3.bf16.msra.mxu1 %v1374_v13  ;;  %v1426_v47 = vld [vmem:[%s1508_s16 + $0xf0] ss:$8 sps:$4 sm:$0xff]   ;;  %v326_v52 = vld [vmem:[%s1568_s10 + $0x80] sm:$0xff]  ;;  %v327_v61 = vld [vmem:[%s1568_s10 + $0x88] sm:$0xff] }
  0x1c   : > { %1239 = vmatprep.subr.bf16.mxu0 %v1375_v14  ;;  %1345 = vmatprep.subr.bf16.mxu1 %v1375_v14 }
  0x1f   : > { %1240 = vmatpush3.bf16.msra.mxu0 %v1376_v15  ;;  %1353 = vmatpush3.bf16.msra.mxu1 %v1376_v15 }
  0x20   : > { %1241 = vmatprep.subr.bf16.mxu0 %v1377_v16  ;;  %1346 = vmatprep.subr.bf16.mxu1 %v1377_v16 }
  0x23   : > { %1242 = vmatpush3.bf16.msra.mxu0 %v1378_v17  ;;  %1354 = vmatpush3.bf16.msra.mxu1 %v1378_v17 }
  0x26   : > { %631 = vmatmul.mubr.bf16.vlgmr.msra.gmra.mrb[0].mxu0 %v1379_v18  ;;  %695 = vmatmul.mubr.bf16.vlgmr.msra.gmra.mrb[0].mxu1 %v1382_v19 }
  0x27   : > { %638 = vmatprep.mubr.bf16.mxu0 %v1385_v20  ;;  %702 = vmatprep.mubr.bf16.mxu1 %v1387_v21  ;;  %v312_v20 = vld [vmem:[%s1568_s10 + $0x10] sm:$0xff] }
  0x28   : > { %v328_v21 = vld [vmem:[%s1568_s10 + $0x90] sm:$0xff] }
  0x2e   : > { %639 = vmatmul.mubr.bf16.gmra.mrb[4].mxu0 %v1389_v22  ;;  %703 = vmatmul.mubr.bf16.gmra.mrb[4].mxu1 %v1390_v23 }
  0x2f   : > { %646 = vmatprep.mubr.bf16.mxu0 %v1391_v24  ;;  %710 = vmatprep.mubr.bf16.mxu1 %v1393_v25 }
  0x36   : > { %647 = vmatmul.mubr.bf16.gmra.mrb[8].mxu0 %v1395_v26  ;;  %711 = vmatmul.mubr.bf16.gmra.mrb[8].mxu1 %v1396_v27 }
  0x37   : > { %654 = vmatprep.mubr.bf16.mxu0 %v1397_v28  ;;  %718 = vmatprep.mubr.bf16.mxu1 %v1399_v29 }
  0x3e   : > { %655 = vmatmul.mubr.bf16.gmra.mrb[12].mxu0 %v1401_v30  ;;  %719 = vmatmul.mubr.bf16.gmra.mrb[12].mxu1 %v1402_v31 }
  0x3f   : > { %662 = vmatprep.mubr.bf16.mxu0 %v1403_v32  ;;  %726 = vmatprep.mubr.bf16.mxu1 %v1405_v33  ;;  %v313_v32 = vld [vmem:[%s1568_s10 + $0x18] sm:$0xff] }
  0x40   : > { %v329_v33 = vld [vmem:[%s1568_s10 + $0x98] sm:$0xff] }
  0x46   : > { %663 = vmatmul.mubr.bf16.gmra.mrb[16].mxu0 %v1407_v34  ;;  %727 = vmatmul.mubr.bf16.gmra.mrb[16].mxu1 %v1408_v35 }
  0x47   : > { %670 = vmatprep.mubr.bf16.mxu0 %v1409_v36  ;;  %734 = vmatprep.mubr.bf16.mxu1 %v1411_v37 }
  0x4e   : > { %671 = vmatmul.mubr.bf16.gmra.mrb[20].mxu0 %v1413_v38  ;;  %735 = vmatmul.mubr.bf16.gmra.mrb[20].mxu1 %v1414_v39 }
  0x4f   : > { %678 = vmatprep.mubr.bf16.mxu0 %v1415_v40  ;;  %742 = vmatprep.mubr.bf16.mxu1 %v1417_v41 }
  0x56   : > { %679 = vmatmul.mubr.bf16.gmra.mrb[24].mxu0 %v1419_v42  ;;  %743 = vmatmul.mubr.bf16.gmra.mrb[24].mxu1 %v1420_v43 }
  0x57   : > { %686 = vmatprep.mubr.bf16.mxu0 %v1421_v44  ;;  %750 = vmatprep.mubr.bf16.mxu1 %v1423_v45 }
  0x5e   : > { %687 = vmatmul.mubr.bf16.gmra.mrb[28].mxu0 %v1425_v46  ;;  %751 = vmatmul.mubr.bf16.gmra.mrb[28].mxu1 %v1426_v47 }
  0xf9   : > { %v1243_v48 = vpop.f32.mrb[0].mxu0  ;;  %v1291_v49 = vpop.f32.mrb[0].mxu1 }
  0xfa   : > { %v1244_v51 = vpop.f32.mrb[1].mxu0  ;;  %v1292_v53 = vpop.f32.mrb[1].mxu1 }
  0xfb   : > { %v1245_v54 = vadd.f32 %v1244_v51, %v1243_v48  ;;  %v1293_v55 = vadd.f32 %v1292_v53, %v1291_v49  ;;  %v1246_v56 = vpop.f32.mrb[2].mxu0  ;;  %v1294_v57 = vpop.f32.mrb[2].mxu1 }
  0xfc   : > { %v1247_v60 = vpop.f32.mrb[3].mxu0  ;;  %v1295_v62 = vpop.f32.mrb[3].mxu1 }
  0xfd   : > { %v633_v63 = vadd.f32 %v1245_v54, %v310_v50  ;;  %v697_v0 = vadd.f32 %v1293_v55, %v326_v52  ;;  %v1248_v1 = vadd.f32 %v1247_v60, %v1246_v56  ;;  %v1296_v2 = vadd.f32 %v1295_v62, %v1294_v57  ;;  %v314_v50 = vld [vmem:[%s1568_s10 + $0x20] sm:$0xff] }
  0xfe   : > { %v330_v52 = vld [vmem:[%s1568_s10 + $0xa0] sm:$0xff] }
  0xff   : > { %v766_v4 = vmul.f32 %v1575_v58, %v633_v63  ;;  %v782_v5 = vmul.f32 %v1575_v58, %v697_v0  ;;  %v636_v6 = vadd.f32 %v1248_v1, %v311_v59  ;;  %v700_v7 = vadd.f32 %v1296_v2, %v327_v61  ;;  %v315_v63 = vld [vmem:[%s1568_s10 + $0x28] sm:$0xff] }
 0x100   : > { %v331_v1 = vld [vmem:[%s1568_s10 + $0xa8] sm:$0xff] }
 0x101   : > { %v805_v8 = vadd.f32 %v1582_v3, %v766_v4  ;;  %v821_v9 = vadd.f32 %v1582_v3, %v782_v5  ;;  %v767_v10 = vmul.f32 %v1575_v58, %v636_v6  ;;  %v783_v11 = vmul.f32 %v1575_v58, %v700_v7  ;;  %v1249_v12 = vpop.f32.mrb[4].mxu0  ;;  %v1297_v13 = vpop.f32.mrb[4].mxu1 }
 0x102   : > { %v1250_v14 = vpop.f32.mrb[5].mxu0  ;;  %v1298_v15 = vpop.f32.mrb[5].mxu1 }
 0x103   : > { %v837_v16 = vmax.f32 %v805_v8, 0.0  ;;  %v853_v17 = vmax.f32 %v821_v9, 0.0  ;;  %v806_v18 = vadd.f32 %v1582_v3, %v767_v10  ;;  %v822_v19 = vadd.f32 %v1582_v3, %v783_v11  ;;  %v1252_v22 = vpop.f32.mrb[6].mxu0  ;;  %v1300_v23 = vpop.f32.mrb[6].mxu1 }
 0x104   : > { %v1251_v24 = vadd.f32 %v1250_v14, %v1249_v12  ;;  %v1299_v25 = vadd.f32 %v1298_v15, %v1297_v13  ;;  %v1253_v26 = vpop.f32.mrb[7].mxu0  ;;  %v1301_v27 = vpop.f32.mrb[7].mxu1 }
 0x105   : > { %v1195_v28 = vpack.c.bf16 %v837_v16, %v837_v16  ;;  %v1211_v29 = vpack.c.bf16 %v853_v17, %v853_v17  ;;  %v838_v30 = vmax.f32 %v806_v18, 0.0  ;;  %v854_v31 = vmax.f32 %v822_v19, 0.0 }
 0x106   : > { %v641_v34 = vadd.f32 %v1251_v24, %v312_v20  ;;  %v705_v35 = vadd.f32 %v1299_v25, %v328_v21  ;;  %v1254_v36 = vadd.f32 %v1253_v26, %v1252_v22  ;;  %v1302_v37 = vadd.f32 %v1301_v27, %v1300_v23 }
 0x107   : > { %998 = vst.msk [vmem:[%s1598_s17] sm:$0xf] %vm997_vm0, %v1195_v28  ;;  %1014 = vst.msk [vmem:[%s1598_s17 + $0x40] sm:$0xf] %vm997_vm0, %v1211_v29  ;;  %v1196_v38 = vpack.c.bf16 %v838_v30, %v838_v30  ;;  %v1212_v39 = vpack.c.bf16 %v854_v31, %v854_v31  ;;  %v316_v30 = vld [vmem:[%s1568_s10 + $0x30] sm:$0xff] }
 0x108   : > { %v768_v40 = vmul.f32 %v1575_v58, %v641_v34  ;;  %v784_v41 = vmul.f32 %v1575_v58, %v705_v35  ;;  %v644_v42 = vadd.f32 %v1254_v36, %v313_v32  ;;  %v708_v43 = vadd.f32 %v1302_v37, %v329_v33  ;;  %v332_v31 = vld [vmem:[%s1568_s10 + $0xb0] sm:$0xff] }
 0x109   : > { %999 = vst.msk [vmem:[%s1598_s17 + $0x4] sm:$0xf] %vm997_vm0, %v1196_v38  ;;  %1015 = vst.msk [vmem:[%s1598_s17 + $0x44] sm:$0xf] %vm997_vm0, %v1212_v39  ;;  %v1255_v44 = vpop.f32.mrb[8].mxu0  ;;  %v1303_v45 = vpop.f32.mrb[8].mxu1 }
 0x10a   : > { %v807_v46 = vadd.f32 %v1582_v3, %v768_v40  ;;  %v823_v47 = vadd.f32 %v1582_v3, %v784_v41  ;;  %v769_v48 = vmul.f32 %v1575_v58, %v644_v42  ;;  %v785_v49 = vmul.f32 %v1575_v58, %v708_v43  ;;  %v1256_v51 = vpop.f32.mrb[9].mxu0  ;;  %v1304_v53 = vpop.f32.mrb[9].mxu1  ;;  %v317_v42 = vld [vmem:[%s1568_s10 + $0x38] sm:$0xff] }
 0x10b   : > { %v1257_v54 = vadd.f32 %v1256_v51, %v1255_v44  ;;  %v1305_v55 = vadd.f32 %v1304_v53, %v1303_v45  ;;  %v1258_v56 = vpop.f32.mrb[10].mxu0  ;;  %v1306_v57 = vpop.f32.mrb[10].mxu1  ;;  %v333_v43 = vld [vmem:[%s1568_s10 + $0xb8] sm:$0xff] }
 0x10c   : > { %v839_v59 = vmax.f32 %v807_v46, 0.0  ;;  %v855_v60 = vmax.f32 %v823_v47, 0.0  ;;  %v808_v61 = vadd.f32 %v1582_v3, %v769_v48  ;;  %v824_v62 = vadd.f32 %v1582_v3, %v785_v49  ;;  %v1259_v0 = vpop.f32.mrb[11].mxu0  ;;  %v1307_v2 = vpop.f32.mrb[11].mxu1 }
 0x10d   : > { %v649_v4 = vadd.f32 %v1257_v54, %v314_v50  ;;  %v713_v5 = vadd.f32 %v1305_v55, %v330_v52  ;;  %v1260_v6 = vadd.f32 %v1259_v0, %v1258_v56  ;;  %v1308_v7 = vadd.f32 %v1307_v2, %v1306_v57 }
 0x10e   : > { %v1197_v8 = vpack.c.bf16 %v839_v59, %v839_v59  ;;  %v1213_v9 = vpack.c.bf16 %v855_v60, %v855_v60  ;;  %v840_v10 = vmax.f32 %v808_v61, 0.0  ;;  %v856_v11 = vmax.f32 %v824_v62, 0.0  ;;  %v318_v61 = vld [vmem:[%s1568_s10 + $0x40] sm:$0xff] }
 0x10f   : > { %v770_v12 = vmul.f32 %v1575_v58, %v649_v4  ;;  %v786_v13 = vmul.f32 %v1575_v58, %v713_v5  ;;  %v652_v14 = vadd.f32 %v1260_v6, %v315_v63  ;;  %v716_v15 = vadd.f32 %v1308_v7, %v331_v1  ;;  %v334_v63 = vld [vmem:[%s1568_s10 + $0xc0] sm:$0xff] }
 0x110   : > { %1000 = vst.msk [vmem:[%s1598_s17 + $0x8] sm:$0xf] %vm997_vm0, %v1197_v8  ;;  %1016 = vst.msk [vmem:[%s1598_s17 + $0x48] sm:$0xf] %vm997_vm0, %v1213_v9  ;;  %v1198_v16 = vpack.c.bf16 %v840_v10, %v840_v10  ;;  %v1214_v17 = vpack.c.bf16 %v856_v11, %v856_v11  ;;  %v319_v10 = vld [vmem:[%s1568_s10 + $0x48] sm:$0xff] }
 0x111   : > { %v809_v18 = vadd.f32 %v1582_v3, %v770_v12  ;;  %v825_v19 = vadd.f32 %v1582_v3, %v786_v13  ;;  %v771_v20 = vmul.f32 %v1575_v58, %v652_v14  ;;  %v787_v21 = vmul.f32 %v1575_v58, %v716_v15  ;;  %v1261_v22 = vpop.f32.mrb[12].mxu0  ;;  %v1309_v23 = vpop.f32.mrb[12].mxu1  ;;  %v335_v12 = vld [vmem:[%s1568_s10 + $0xc8] sm:$0xff] }
 0x112   : > { %1001 = vst.msk [vmem:[%s1598_s17 + $0xc] sm:$0xf] %vm997_vm0, %v1198_v16  ;;  %1017 = vst.msk [vmem:[%s1598_s17 + $0x4c] sm:$0xf] %vm997_vm0, %v1214_v17  ;;  %v1262_v24 = vpop.f32.mrb[13].mxu0  ;;  %v1310_v25 = vpop.f32.mrb[13].mxu1 }
 0x113   : > { %v841_v26 = vmax.f32 %v809_v18, 0.0  ;;  %v857_v27 = vmax.f32 %v825_v19, 0.0  ;;  %v810_v28 = vadd.f32 %v1582_v3, %v771_v20  ;;  %v826_v29 = vadd.f32 %v1582_v3, %v787_v21  ;;  %v1264_v32 = vpop.f32.mrb[14].mxu0  ;;  %v1312_v33 = vpop.f32.mrb[14].mxu1 }
 0x114   : > { %v1263_v34 = vadd.f32 %v1262_v24, %v1261_v22  ;;  %v1311_v35 = vadd.f32 %v1310_v25, %v1309_v23  ;;  %v1265_v36 = vpop.f32.mrb[15].mxu0  ;;  %v1313_v37 = vpop.f32.mrb[15].mxu1 }
 0x115   : > { %v1199_v38 = vpack.c.bf16 %v841_v26, %v841_v26  ;;  %v1215_v39 = vpack.c.bf16 %v857_v27, %v857_v27  ;;  %v842_v40 = vmax.f32 %v810_v28, 0.0  ;;  %v858_v41 = vmax.f32 %v826_v29, 0.0 }
 0x116   : > { %v657_v44 = vadd.f32 %v1263_v34, %v316_v30  ;;  %v721_v45 = vadd.f32 %v1311_v35, %v332_v31  ;;  %v1266_v46 = vadd.f32 %v1265_v36, %v1264_v32  ;;  %v1314_v47 = vadd.f32 %v1313_v37, %v1312_v33 }
 0x117   : > { %1002 = vst.msk [vmem:[%s1598_s17 + $0x10] sm:$0xf] %vm997_vm0, %v1199_v38  ;;  %1018 = vst.msk [vmem:[%s1598_s17 + $0x50] sm:$0xf] %vm997_vm0, %v1215_v39  ;;  %v1200_v48 = vpack.c.bf16 %v842_v40, %v842_v40  ;;  %v1216_v49 = vpack.c.bf16 %v858_v41, %v858_v41  ;;  %v320_v40 = vld [vmem:[%s1568_s10 + $0x50] sm:$0xff] }
 0x118   : > { %v772_v50 = vmul.f32 %v1575_v58, %v657_v44  ;;  %v788_v51 = vmul.f32 %v1575_v58, %v721_v45  ;;  %v660_v52 = vadd.f32 %v1266_v46, %v317_v42  ;;  %v724_v53 = vadd.f32 %v1314_v47, %v333_v43  ;;  %v336_v41 = vld [vmem:[%s1568_s10 + $0xd0] sm:$0xff] }
 0x119   : > { %1003 = vst.msk [vmem:[%s1598_s17 + $0x14] sm:$0xf] %vm997_vm0, %v1200_v48  ;;  %1019 = vst.msk [vmem:[%s1598_s17 + $0x54] sm:$0xf] %vm997_vm0, %v1216_v49  ;;  %v1267_v54 = vpop.f32.mrb[16].mxu0  ;;  %v1315_v55 = vpop.f32.mrb[16].mxu1 }
 0x11a   : > { %v811_v56 = vadd.f32 %v1582_v3, %v772_v50  ;;  %v827_v57 = vadd.f32 %v1582_v3, %v788_v51  ;;  %v773_v59 = vmul.f32 %v1575_v58, %v660_v52  ;;  %v789_v60 = vmul.f32 %v1575_v58, %v724_v53  ;;  %v1268_v62 = vpop.f32.mrb[17].mxu0  ;;  %v1316_v0 = vpop.f32.mrb[17].mxu1  ;;  %v321_v52 = vld [vmem:[%s1568_s10 + $0x58] sm:$0xff] }
 0x11b   : > { %v1269_v1 = vadd.f32 %v1268_v62, %v1267_v54  ;;  %v1317_v2 = vadd.f32 %v1316_v0, %v1315_v55  ;;  %v1270_v4 = vpop.f32.mrb[18].mxu0  ;;  %v1318_v5 = vpop.f32.mrb[18].mxu1  ;;  %v337_v53 = vld [vmem:[%s1568_s10 + $0xd8] sm:$0xff] }
 0x11c   : > { %v843_v6 = vmax.f32 %v811_v56, 0.0  ;;  %v859_v7 = vmax.f32 %v827_v57, 0.0  ;;  %v812_v8 = vadd.f32 %v1582_v3, %v773_v59  ;;  %v828_v9 = vadd.f32 %v1582_v3, %v789_v60  ;;  %v1271_v11 = vpop.f32.mrb[19].mxu0  ;;  %v1319_v13 = vpop.f32.mrb[19].mxu1 }
 0x11d   : > { %v665_v14 = vadd.f32 %v1269_v1, %v318_v61  ;;  %v729_v15 = vadd.f32 %v1317_v2, %v334_v63  ;;  %v1272_v16 = vadd.f32 %v1271_v11, %v1270_v4  ;;  %v1320_v17 = vadd.f32 %v1319_v13, %v1318_v5 }
 0x11e   : > { %v1201_v18 = vpack.c.bf16 %v843_v6, %v843_v6  ;;  %v1217_v19 = vpack.c.bf16 %v859_v7, %v859_v7  ;;  %v844_v20 = vmax.f32 %v812_v8, 0.0  ;;  %v860_v21 = vmax.f32 %v828_v9, 0.0  ;;  %v322_v8 = vld [vmem:[%s1568_s10 + $0x60] sm:$0xff] }
 0x11f   : > { %v774_v22 = vmul.f32 %v1575_v58, %v665_v14  ;;  %v790_v23 = vmul.f32 %v1575_v58, %v729_v15  ;;  %v668_v24 = vadd.f32 %v1272_v16, %v319_v10  ;;  %v732_v25 = vadd.f32 %v1320_v17, %v335_v12  ;;  %v338_v10 = vld [vmem:[%s1568_s10 + $0xe0] sm:$0xff] }
 0x120   : > { %1004 = vst.msk [vmem:[%s1598_s17 + $0x18] sm:$0xf] %vm997_vm0, %v1201_v18  ;;  %1020 = vst.msk [vmem:[%s1598_s17 + $0x58] sm:$0xf] %vm997_vm0, %v1217_v19  ;;  %v1202_v26 = vpack.c.bf16 %v844_v20, %v844_v20  ;;  %v1218_v27 = vpack.c.bf16 %v860_v21, %v860_v21  ;;  %v323_v20 = vld [vmem:[%s1568_s10 + $0x68] sm:$0xff] }
 0x121   : > { %v813_v28 = vadd.f32 %v1582_v3, %v774_v22  ;;  %v829_v29 = vadd.f32 %v1582_v3, %v790_v23  ;;  %v775_v30 = vmul.f32 %v1575_v58, %v668_v24  ;;  %v791_v31 = vmul.f32 %v1575_v58, %v732_v25  ;;  %v1273_v32 = vpop.f32.mrb[20].mxu0  ;;  %v1321_v33 = vpop.f32.mrb[20].mxu1  ;;  %v339_v22 = vld [vmem:[%s1568_s10 + $0xe8] sm:$0xff] }
 0x122   : > { %1005 = vst.msk [vmem:[%s1598_s17 + $0x1c] sm:$0xf] %vm997_vm0, %v1202_v26  ;;  %1021 = vst.msk [vmem:[%s1598_s17 + $0x5c] sm:$0xf] %vm997_vm0, %v1218_v27  ;;  %v1274_v34 = vpop.f32.mrb[21].mxu0  ;;  %v1322_v35 = vpop.f32.mrb[21].mxu1 }
 0x123   : > { %v845_v36 = vmax.f32 %v813_v28, 0.0  ;;  %v861_v37 = vmax.f32 %v829_v29, 0.0  ;;  %v814_v38 = vadd.f32 %v1582_v3, %v775_v30  ;;  %v830_v39 = vadd.f32 %v1582_v3, %v791_v31  ;;  %v1276_v42 = vpop.f32.mrb[22].mxu0  ;;  %v1324_v43 = vpop.f32.mrb[22].mxu1 }
 0x124   : > { %v1275_v44 = vadd.f32 %v1274_v34, %v1273_v32  ;;  %v1323_v45 = vadd.f32 %v1322_v35, %v1321_v33  ;;  %v1277_v46 = vpop.f32.mrb[23].mxu0  ;;  %v1325_v47 = vpop.f32.mrb[23].mxu1 }
 0x125   : > { %v1203_v48 = vpack.c.bf16 %v845_v36, %v845_v36  ;;  %v1219_v49 = vpack.c.bf16 %v861_v37, %v861_v37  ;;  %v846_v50 = vmax.f32 %v814_v38, 0.0  ;;  %v862_v51 = vmax.f32 %v830_v39, 0.0 }
 0x126   : > { %v673_v54 = vadd.f32 %v1275_v44, %v320_v40  ;;  %v737_v55 = vadd.f32 %v1323_v45, %v336_v41  ;;  %v1278_v56 = vadd.f32 %v1277_v46, %v1276_v42  ;;  %v1326_v57 = vadd.f32 %v1325_v47, %v1324_v43 }
 0x127   : > { %1006 = vst.msk [vmem:[%s1598_s17 + $0x20] sm:$0xf] %vm997_vm0, %v1203_v48  ;;  %1022 = vst.msk [vmem:[%s1598_s17 + $0x60] sm:$0xf] %vm997_vm0, %v1219_v49  ;;  %v1204_v59 = vpack.c.bf16 %v846_v50, %v846_v50  ;;  %v1220_v60 = vpack.c.bf16 %v862_v51, %v862_v51  ;;  %v324_v50 = vld [vmem:[%s1568_s10 + $0x70] sm:$0xff] }
 0x128   : > { %v776_v61 = vmul.f32 %v1575_v58, %v673_v54  ;;  %v792_v62 = vmul.f32 %v1575_v58, %v737_v55  ;;  %v676_v63 = vadd.f32 %v1278_v56, %v321_v52  ;;  %v740_v0 = vadd.f32 %v1326_v57, %v337_v53  ;;  %v340_v51 = vld [vmem:[%s1568_s10 + $0xf0] sm:$0xff] }
 0x129   : > { %1007 = vst.msk [vmem:[%s1598_s17 + $0x24] sm:$0xf] %vm997_vm0, %v1204_v59  ;;  %1023 = vst.msk [vmem:[%s1598_s17 + $0x64] sm:$0xf] %vm997_vm0, %v1220_v60  ;;  %v1279_v1 = vpop.f32.mrb[24].mxu0  ;;  %v1327_v2 = vpop.f32.mrb[24].mxu1 }
 0x12a   : > { %v815_v4 = vadd.f32 %v1582_v3, %v776_v61  ;;  %v831_v5 = vadd.f32 %v1582_v3, %v792_v62  ;;  %v777_v6 = vmul.f32 %v1575_v58, %v676_v63  ;;  %v793_v7 = vmul.f32 %v1575_v58, %v740_v0  ;;  %v1280_v9 = vpop.f32.mrb[25].mxu0  ;;  %v1328_v11 = vpop.f32.mrb[25].mxu1  ;;  %v325_v63 = vld [vmem:[%s1568_s10 + $0x78] sm:$0xff] }
 0x12b   : > { %v1281_v12 = vadd.f32 %v1280_v9, %v1279_v1  ;;  %v1329_v13 = vadd.f32 %v1328_v11, %v1327_v2  ;;  %v1282_v14 = vpop.f32.mrb[26].mxu0  ;;  %v1330_v15 = vpop.f32.mrb[26].mxu1  ;;  %v341_v0 = vld [vmem:[%s1568_s10 + $0xf8] sm:$0xff] }
 0x12c   : > { %v847_v16 = vmax.f32 %v815_v4, 0.0  ;;  %v863_v17 = vmax.f32 %v831_v5, 0.0  ;;  %v816_v18 = vadd.f32 %v1582_v3, %v777_v6  ;;  %v832_v19 = vadd.f32 %v1582_v3, %v793_v7  ;;  %v1283_v21 = vpop.f32.mrb[27].mxu0  ;;  %v1331_v23 = vpop.f32.mrb[27].mxu1 }
 0x12d   : > { %v681_v24 = vadd.f32 %v1281_v12, %v322_v8  ;;  %v745_v25 = vadd.f32 %v1329_v13, %v338_v10  ;;  %v1284_v26 = vadd.f32 %v1283_v21, %v1282_v14  ;;  %v1332_v27 = vadd.f32 %v1331_v23, %v1330_v15 }
 0x12e   : > { %v1205_v28 = vpack.c.bf16 %v847_v16, %v847_v16  ;;  %v1221_v29 = vpack.c.bf16 %v863_v17, %v863_v17  ;;  %v848_v30 = vmax.f32 %v816_v18, 0.0  ;;  %v864_v31 = vmax.f32 %v832_v19, 0.0 }
 0x12f   : > { %v778_v32 = vmul.f32 %v1575_v58, %v681_v24  ;;  %v794_v33 = vmul.f32 %v1575_v58, %v745_v25  ;;  %v684_v34 = vadd.f32 %v1284_v26, %v323_v20  ;;  %v748_v35 = vadd.f32 %v1332_v27, %v339_v22 }
 0x130   : > { %1008 = vst.msk [vmem:[%s1598_s17 + $0x28] sm:$0xf] %vm997_vm0, %v1205_v28  ;;  %1024 = vst.msk [vmem:[%s1598_s17 + $0x68] sm:$0xf] %vm997_vm0, %v1221_v29  ;;  %v1206_v36 = vpack.c.bf16 %v848_v30, %v848_v30  ;;  %v1222_v37 = vpack.c.bf16 %v864_v31, %v864_v31 }
 0x131   : > { %v817_v38 = vadd.f32 %v1582_v3, %v778_v32  ;;  %v833_v39 = vadd.f32 %v1582_v3, %v794_v33  ;;  %v779_v40 = vmul.f32 %v1575_v58, %v684_v34  ;;  %v795_v41 = vmul.f32 %v1575_v58, %v748_v35  ;;  %v1285_v42 = vpop.f32.mrb[28].mxu0  ;;  %v1333_v43 = vpop.f32.mrb[28].mxu1 }
 0x132   : > { %1009 = vst.msk [vmem:[%s1598_s17 + $0x2c] sm:$0xf] %vm997_vm0, %v1206_v36  ;;  %1025 = vst.msk [vmem:[%s1598_s17 + $0x6c] sm:$0xf] %vm997_vm0, %v1222_v37  ;;  %v1286_v44 = vpop.f32.mrb[29].mxu0  ;;  %v1334_v45 = vpop.f32.mrb[29].mxu1 }
 0x133   : > { %v849_v46 = vmax.f32 %v817_v38, 0.0  ;;  %v865_v47 = vmax.f32 %v833_v39, 0.0  ;;  %v818_v48 = vadd.f32 %v1582_v3, %v779_v40  ;;  %v834_v49 = vadd.f32 %v1582_v3, %v795_v41  ;;  %v1288_v52 = vpop.f32.mrb[30].mxu0  ;;  %v1336_v53 = vpop.f32.mrb[30].mxu1 }
 0x134   : > { %v1287_v54 = vadd.f32 %v1286_v44, %v1285_v42  ;;  %v1335_v55 = vadd.f32 %v1334_v45, %v1333_v43  ;;  %v1289_v56 = vpop.f32.mrb[31].mxu0  ;;  %v1337_v57 = vpop.f32.mrb[31].mxu1 }
 0x135   : > { %v1207_v59 = vpack.c.bf16 %v849_v46, %v849_v46  ;;  %v1223_v60 = vpack.c.bf16 %v865_v47, %v865_v47  ;;  %v850_v61 = vmax.f32 %v818_v48, 0.0  ;;  %v866_v62 = vmax.f32 %v834_v49, 0.0 }
 0x136   : > { %v689_v1 = vadd.f32 %v1287_v54, %v324_v50  ;;  %v753_v2 = vadd.f32 %v1335_v55, %v340_v51  ;;  %v1290_v4 = vadd.f32 %v1289_v56, %v1288_v52  ;;  %v1338_v5 = vadd.f32 %v1337_v57, %v1336_v53 }
 0x137   : > { %1010 = vst.msk [vmem:[%s1598_s17 + $0x30] sm:$0xf] %vm997_vm0, %v1207_v59  ;;  %1026 = vst.msk [vmem:[%s1598_s17 + $0x70] sm:$0xf] %vm997_vm0, %v1223_v60  ;;  %v1208_v6 = vpack.c.bf16 %v850_v61, %v850_v61  ;;  %v1224_v7 = vpack.c.bf16 %v866_v62, %v866_v62 }
 0x138   : > { %v780_v8 = vmul.f32 %v1575_v58, %v689_v1  ;;  %v796_v9 = vmul.f32 %v1575_v58, %v753_v2  ;;  %v692_v10 = vadd.f32 %v1290_v4, %v325_v63  ;;  %v756_v11 = vadd.f32 %v1338_v5, %v341_v0 }
 0x139   : > { %1011 = vst.msk [vmem:[%s1598_s17 + $0x34] sm:$0xf] %vm997_vm0, %v1208_v6  ;;  %1027 = vst.msk [vmem:[%s1598_s17 + $0x74] sm:$0xf] %vm997_vm0, %v1224_v7 }
 0x13a   : > { %v819_v12 = vadd.f32 %v1582_v3, %v780_v8  ;;  %v835_v13 = vadd.f32 %v1582_v3, %v796_v9  ;;  %v781_v14 = vmul.f32 %v1575_v58, %v692_v10  ;;  %v797_v15 = vmul.f32 %v1575_v58, %v756_v11 }
 0x13c   : > { %v851_v16 = vmax.f32 %v819_v12, 0.0  ;;  %v867_v17 = vmax.f32 %v835_v13, 0.0  ;;  %v820_v18 = vadd.f32 %v1582_v3, %v781_v14  ;;  %v836_v19 = vadd.f32 %v1582_v3, %v797_v15 }
 0x13e   : > { %v1209_v20 = vpack.c.bf16 %v851_v16, %v851_v16  ;;  %v1225_v21 = vpack.c.bf16 %v867_v17, %v867_v17  ;;  %v852_v22 = vmax.f32 %v820_v18, 0.0  ;;  %v868_v23 = vmax.f32 %v836_v19, 0.0 }
 0x140   : > { %1012 = vst.msk [vmem:[%s1598_s17 + $0x38] sm:$0xf] %vm997_vm0, %v1209_v20  ;;  %1028 = vst.msk [vmem:[%s1598_s17 + $0x78] sm:$0xf] %vm997_vm0, %v1225_v21  ;;  %v1210_v24 = vpack.c.bf16 %v852_v22, %v852_v22  ;;  %v1226_v25 = vpack.c.bf16 %v868_v23, %v868_v23 }
 0x142   : > { %1013 = vst.msk [vmem:[%s1598_s17 + $0x3c] sm:$0xf] %vm997_vm0, %v1210_v24  ;;  %1029 = vst.msk [vmem:[%s1598_s17 + $0x7c] sm:$0xf] %vm997_vm0, %v1226_v25 }
 0x143 PF: > { %s15_s18 = sadd.s32 1, %s1433_s18  }
 0x144   : > { %p12_p4 = scmp.ge.s32.totalorder %s15_s18, 4  }
 0x146   :  { %14 = sbr.rel (!%p12_p4) target bundleno = 1 (0x1), region = 73 }

// kernel: _lambda_.13
= control target key start
LH: loop header
LB: loop body
LE: loop exit
PB: predicated region body
PF: predicated region fallthrough
CT: control target
= control target key end

     0   :  { %s706_s12 = smov 0   ;;  %s806_s0 = inlined_call_operand.vmem [shape: bf16[2,64,256], index: 0, kind: input, shape index: {}]   ;;  %s807_s1 = inlined_call_operand.vmem [shape: bf16[256,128], index: 1, kind: input, shape index: {}]   ;;  %s808_s2 = inlined_call_operand.vmem [shape: f32[1,128], index: 2, kind: input, shape index: {}]   ;;  %s809_s3 = inlined_call_operand.vmem [shape: bf16[2,64,32], index: 3, kind: output, shape index: {}]  }
   0x1 LB: > { %s532_s13 = sadd.s32 4294967295, %s684_s12   ;;  %p536_p0 = scmp.ge.s32.totalorder %s684_s12, 1  ;;  %s684_s12 = sphi %s706_s12, %s13_s12  }
   0x2   : > { %p137_p1 = scmp.lt.s32.totalorder %s684_s12, 3 }
   0x4   : > { %p138_p2 = pnand %p536_p0, %p137_p1 }
   0x5   : > { %v650_v0 = vld [vmem:[%s807_s1 + $0x40] sm:$0xff] (!%p138_p2)   ;;  %v652_v2 = vld [vmem:[%s807_s1 + $0x48] sm:$0xff] (!%p138_p2)   ;;  %p161_p3 = scmp.lt.s32.totalorder (!%p138_p2), %s532_s13, 1  ;;  %v654_v4 = vld [vmem:[%s807_s1 + $0x50] sm:$0xff] (!%p138_p2)   ;;  %vm468_vm0 = vcmask (!%p138_p2), 257024  }
   0x6   : > { %141 = sbr.rel (%p138_p2) target bundleno = 273 (0x111), region = 32  ;;  %v651_v1 = vld [vmem:[%s807_s1] sm:$0xff] (!%p138_p2)   ;;  %586 = vmatprep.subr.bf16.mxu0 (!%p138_p2), %v650_v0  ;;  %626 = vmatprep.subr.bf16.mxu1 (!%p138_p2), %v650_v0  ;;  %v653_v3 = vld [vmem:[%s807_s1 + $0x8] sm:$0xff] (!%p138_p2)   ;;  %v655_v5 = vld [vmem:[%s807_s1 + $0x10] sm:$0xff] (!%p138_p2)  }
   0x7   : > { %587 = vmatpush3.bf16.msra.mxu0 (!%p138_p2), %v651_v1  ;;  %634 = vmatpush3.bf16.msra.mxu1 (!%p138_p2), %v651_v1  ;;  %v656_v6 = vld [vmem:[%s807_s1 + $0x58] sm:$0xff] (!%p138_p2)   ;;  %v658_v8 = vld [vmem:[%s807_s1 + $0x60] sm:$0xff] (!%p138_p2)   ;;  %v660_v10 = vld [vmem:[%s807_s1 + $0x68] sm:$0xff] (!%p138_p2)  }
   0x8   : > { %588 = vmatprep.subr.bf16.mxu0 (!%p138_p2), %v652_v2  ;;  %627 = vmatprep.subr.bf16.mxu1 (!%p138_p2), %v652_v2  ;;  %v657_v7 = vld [vmem:[%s807_s1 + $0x18] sm:$0xff] (!%p138_p2)   ;;  %v659_v9 = vld [vmem:[%s807_s1 + $0x20] sm:$0xff] (!%p138_p2)   ;;  %v661_v13 = vld [vmem:[%s807_s1 + $0x28] sm:$0xff] (!%p138_p2)  }
   0x9   : > { %v662_v14 = vld [vmem:[%s807_s1 + $0x70] sm:$0xff] (!%p138_p2)   ;;  %v664_v16 = vld [vmem:[%s807_s1 + $0x78] sm:$0xff] (!%p138_p2)   ;;  %v541_v26 = vld [vmem:[%s808_s2] ss:$0 sm:$0xff] (!%p138_p2) }
   0xa   : > { %v663_v15 = vld [vmem:[%s807_s1 + $0x30] sm:$0xff] (!%p138_p2)   ;;  %v665_v17 = vld [vmem:[%s807_s1 + $0x38] sm:$0xff] (!%p138_p2)  }
   0xb   : > { %589 = vmatpush3.bf16.msra.mxu0 (!%p138_p2), %v653_v3  ;;  %635 = vmatpush3.bf16.msra.mxu1 (!%p138_p2), %v653_v3 }
   0xc   : > { %590 = vmatprep.subr.bf16.mxu0 (!%p138_p2), %v654_v4  ;;  %628 = vmatprep.subr.bf16.mxu1 (!%p138_p2), %v654_v4 }
   0xd   : > { %s811_s13 = smov (!%p161_p3, %s532_s13), 1 }
   0xe   : > { %s576_s30 = sshll.u32 %s811_s13, 6  ;;  %s577_s27 = sshll.u32 %s811_s13, 5 }
   0xf   : > { %591 = vmatpush3.bf16.msra.mxu0 %v655_v5  ;;  %636 = vmatpush3.bf16.msra.mxu1 %v655_v5  ;;  %s747_s8 = scalar_lea.vmem %s806_s0, %s576_s30  ;;  %s785_s30 = scalar_lea.vmem %s809_s3, %s577_s27 }
  0x10   : > { %592 = vmatprep.subr.bf16.mxu0 %v656_v6  ;;  %629 = vmatprep.subr.bf16.mxu1 %v656_v6  ;;  %v668_v11 = vld [vmem:[%s747_s8 + $0x4] ss:$8 sps:$4 sm:$0xff]   ;;  %v666_v18 = vld [vmem:[%s747_s8] ss:$8 sps:$4 sm:$0xff]   ;;  %v672_v20 = vld [vmem:[%s747_s8 + $0x14] ss:$8 sps:$4 sm:$0xff]  }
  0x11   : > { %v671_v12 = vld [vmem:[%s747_s8 + $0x24] ss:$8 sps:$4 sm:$0xff]   ;;  %387 = vmatprep.mubr.bf16.mxu0 %v668_v11  ;;  %v669_v19 = vld [vmem:[%s747_s8 + $0x20] ss:$8 sps:$4 sm:$0xff]   ;;  %v674_v21 = vld [vmem:[%s747_s8 + $0x34] ss:$8 sps:$4 sm:$0xff]  }
  0x12   : > { %403 = vmatprep.mubr.bf16.mxu1 %v671_v12  ;;  %v676_v22 = vld [vmem:[%s747_s8 + $0x10] ss:$8 sps:$4 sm:$0xff]  }
  0x13   : > { %593 = vmatpush3.bf16.msra.mxu0 %v657_v7  ;;  %637 = vmatpush3.bf16.msra.mxu1 %v657_v7  ;;  %v677_v23 = vld [vmem:[%s747_s8 + $0x30] ss:$8 sps:$4 sm:$0xff]  }
  0x14   : > { %594 = vmatprep.subr.bf16.mxu0 %v658_v8  ;;  %630 = vmatprep.subr.bf16.mxu1 %v658_v8 }
  0x17   : > { %595 = vmatpush3.bf16.msra.mxu0 %v659_v9  ;;  %638 = vmatpush3.bf16.msra.mxu1 %v659_v9 }
  0x18   : > { %596 = vmatprep.subr.bf16.mxu0 %v660_v10  ;;  %631 = vmatprep.subr.bf16.mxu1 %v660_v10 }
  0x1b   : > { %597 = vmatpush3.bf16.msra.mxu0 %v661_v13  ;;  %639 = vmatpush3.bf16.msra.mxu1 %v661_v13 }
  0x1c   : > { %598 = vmatprep.subr.bf16.mxu0 %v662_v14  ;;  %632 = vmatprep.subr.bf16.mxu1 %v662_v14 }
  0x1f   : > { %599 = vmatpush3.bf16.msra.mxu0 %v663_v15  ;;  %640 = vmatpush3.bf16.msra.mxu1 %v663_v15 }
  0x20   : > { %600 = vmatprep.subr.bf16.mxu0 %v664_v16  ;;  %633 = vmatprep.subr.bf16.mxu1 %v664_v16 }
  0x23   : > { %601 = vmatpush3.bf16.msra.mxu0 %v665_v17  ;;  %641 = vmatpush3.bf16.msra.mxu1 %v665_v17 }
  0x26   : > { %388 = vmatmul.mubr.bf16.vlgmr.msra.gmra.mrb[0].mxu0 %v666_v18  ;;  %404 = vmatmul.mubr.bf16.vlgmr.msra.gmra.mrb[0].mxu1 %v669_v19 }
  0x27   : > { %395 = vmatprep.mubr.bf16.mxu0 %v672_v20  ;;  %411 = vmatprep.mubr.bf16.mxu1 %v674_v21 }
  0x2e   : > { %396 = vmatmul.mubr.bf16.gmra.mrb[4].mxu0 %v676_v22  ;;  %412 = vmatmul.mubr.bf16.gmra.mrb[4].mxu1 %v677_v23 }
  0xf9   : > { %v602_v24 = vpop.f32.mrb[0].mxu0  ;;  %v614_v25 = vpop.f32.mrb[0].mxu1 }
  0xfa   : > { %v603_v27 = vpop.f32.mrb[1].mxu0  ;;  %v615_v28 = vpop.f32.mrb[1].mxu1 }
  0xfb   : > { %v604_v29 = vadd.f32 %v603_v27, %v602_v24  ;;  %v616_v30 = vadd.f32 %v615_v28, %v614_v25  ;;  %v605_v31 = vpop.f32.mrb[2].mxu0  ;;  %v617_v32 = vpop.f32.mrb[2].mxu1 }
  0xfc   : > { %v606_v33 = vpop.f32.mrb[3].mxu0  ;;  %v618_v34 = vpop.f32.mrb[3].mxu1 }
  0xfd   : > { %v390_v35 = vadd.f32 %v604_v29, %v541_v26  ;;  %v406_v36 = vadd.f32 %v616_v30, %v541_v26  ;;  %v607_v37 = vadd.f32 %v606_v33, %v605_v31  ;;  %v619_v38 = vadd.f32 %v618_v34, %v617_v32 }
  0xff   : > { %v420_v39 = vmax.f32 %v390_v35, 0.0  ;;  %v424_v40 = vmax.f32 %v406_v36, 0.0  ;;  %v393_v41 = vadd.f32 %v607_v37, %v541_v26  ;;  %v409_v42 = vadd.f32 %v619_v38, %v541_v26 }
 0x101   : > { %v428_v43 = vmax.f32 %v420_v39, 0.0  ;;  %v432_v44 = vmax.f32 %v424_v40, 0.0  ;;  %v421_v45 = vmax.f32 %v393_v41, 0.0  ;;  %v425_v46 = vmax.f32 %v409_v42, 0.0  ;;  %v608_v47 = vpop.f32.mrb[4].mxu0  ;;  %v620_v48 = vpop.f32.mrb[4].mxu1 }
 0x102   : > { %v609_v49 = vpop.f32.mrb[5].mxu0  ;;  %v621_v50 = vpop.f32.mrb[5].mxu1 }
 0x103   : > { %v578_v51 = vpack.c.bf16 %v428_v43, %v428_v43  ;;  %v582_v52 = vpack.c.bf16 %v432_v44, %v432_v44  ;;  %v429_v53 = vmax.f32 %v421_v45, 0.0  ;;  %v433_v54 = vmax.f32 %v425_v46, 0.0  ;;  %v611_v55 = vpop.f32.mrb[6].mxu0  ;;  %v623_v56 = vpop.f32.mrb[6].mxu1 }
 0x104   : > { %v610_v57 = vadd.f32 %v609_v49, %v608_v47  ;;  %v622_v58 = vadd.f32 %v621_v50, %v620_v48  ;;  %v612_v59 = vpop.f32.mrb[7].mxu0  ;;  %v624_v60 = vpop.f32.mrb[7].mxu1 }
 0x105   : > { %469 = vst.msk [vmem:[%s785_s30] sm:$0xf] %vm468_vm0, %v578_v51  ;;  %473 = vst.msk [vmem:[%s785_s30 + $0x10] sm:$0xf] %vm468_vm0, %v582_v52  ;;  %v579_v61 = vpack.c.bf16 %v429_v53, %v429_v53  ;;  %v583_v62 = vpack.c.bf16 %v433_v54, %v433_v54  ;;  %v613_v63 = vadd.f32 %v612_v59, %v611_v55 }
 0x106   : > { %v625_v0 = vadd.f32 %v624_v60, %v623_v56  ;;  %v398_v1 = vadd.f32 %v610_v57, %v541_v26  ;;  %v414_v2 = vadd.f32 %v622_v58, %v541_v26 }
 0x107   : > { %470 = vst.msk [vmem:[%s785_s30 + $0x4] sm:$0xf] %vm468_vm0, %v579_v61  ;;  %474 = vst.msk [vmem:[%s785_s30 + $0x14] sm:$0xf] %vm468_vm0, %v583_v62  ;;  %v401_v3 = vadd.f32 %v613_v63, %v541_v26 }
 0x108   : > { %v417_v4 = vadd.f32 %v625_v0, %v541_v26  ;;  %v422_v5 = vmax.f32 %v398_v1, 0.0  ;;  %v426_v6 = vmax.f32 %v414_v2, 0.0 }
 0x109   : > { %v423_v7 = vmax.f32 %v401_v3, 0.0 }
 0x10a   : > { %v427_v8 = vmax.f32 %v417_v4, 0.0  ;;  %v430_v9 = vmax.f32 %v422_v5, 0.0  ;;  %v434_v10 = vmax.f32 %v426_v6, 0.0 }
 0x10b   : > { %v431_v11 = vmax.f32 %v423_v7, 0.0 }
 0x10c   : > { %v435_v12 = vmax.f32 %v427_v8, 0.0  ;;  %v580_v13 = vpack.c.bf16 %v430_v9, %v430_v9  ;;  %v584_v14 = vpack.c.bf16 %v434_v10, %v434_v10 }
 0x10d   : > { %v581_v15 = vpack.c.bf16 %v431_v11, %v431_v11 }
 0x10e   : > { %v585_v16 = vpack.c.bf16 %v435_v12, %v435_v12  ;;  %471 = vst.msk [vmem:[%s785_s30 + $0x8] sm:$0xf] %vm468_vm0, %v580_v13  ;;  %475 = vst.msk [vmem:[%s785_s30 + $0x18] sm:$0xf] %vm468_vm0, %v584_v14 }
 0x10f   : > { %472 = vst.msk [vmem:[%s785_s30 + $0xc] sm:$0xf] %vm468_vm0, %v581_v15 }
 0x110   : > { %476 = vst.msk [vmem:[%s785_s30 + $0x1c] sm:$0xf] %vm468_vm0, %v585_v16 }
 0x111 PF: > { %s13_s12 = sadd.s32 1, %s684_s12  }
 0x112   : > { %p10_p4 = scmp.ge.s32.totalorder %s13_s12, 4  }
 0x114   :  { %12 = sbr.rel (!%p10_p4) target bundleno = 1 (0x1), region = 62 }

// kernel: _lambda_.15
= control target key start
LH: loop header
LB: loop body
LE: loop exit
PB: predicated region body
PF: predicated region fallthrough
CT: control target
= control target key end

     0   :  { %s1033_s18 = smov 0   ;;  %s1202_s0 = inlined_call_operand.vmem [shape: bf16[2,64,384], index: 0, kind: input, shape index: {}]   ;;  %s1203_s1 = inlined_call_operand.vmem [shape: bf16[384,128], index: 1, kind: input, shape index: {}]   ;;  %s1204_s2 = inlined_call_operand.vmem [shape: f32[1,128], index: 2, kind: input, shape index: {}]   ;;  %s1205_s3 = inlined_call_operand.vmem [shape: f32[1,128], index: 3, kind: input, shape index: {}]   ;;  %s1206_s4 = inlined_call_operand.vmem [shape: f32[2,64,128], index: 4, kind: input, shape index: {}]   ;;  %s1207_s5 = inlined_call_operand.vmem [shape: bf16[2,64,32], index: 5, kind: output, shape index: {}]  }
   0x1 LB: > { %s802_s19 = sadd.s32 4294967295, %s1001_s18   ;;  %p806_p0 = scmp.ge.s32.totalorder %s1001_s18, 1  ;;  %s1001_s18 = sphi %s1033_s18, %s15_s18  }
   0x2   : > { %p197_p1 = scmp.lt.s32.totalorder %s1001_s18, 3 }
   0x4   : > { %p198_p2 = pnand %p806_p0, %p197_p1 }
   0x5   : > { %v955_v0 = vld [vmem:[%s1203_s1 + $0x40] sm:$0xff] (!%p198_p2)   ;;  %v957_v2 = vld [vmem:[%s1203_s1 + $0x48] sm:$0xff] (!%p198_p2)   ;;  %v960_v5 = vld [vmem:[%s1203_s1 + $0x50] sm:$0xff] (!%p198_p2)   ;;  %p230_p3 = scmp.lt.s32.totalorder (!%p198_p2), %s802_s19, 1  ;;  %vm726_vm0 = vcmask (!%p198_p2), 257024  }
   0x6   : > { %201 = sbr.rel (%p198_p2) target bundleno = 292 (0x124), region = 40  ;;  %v956_v1 = vld [vmem:[%s1203_s1] sm:$0xff] (!%p198_p2)   ;;  %870 = vmatprep.subr.bf16.mxu0 (!%p198_p2), %v955_v0  ;;  %v959_v4 = vld [vmem:[%s1203_s1 + $0x8] sm:$0xff] (!%p198_p2)   ;;  %v962_v7 = vld [vmem:[%s1203_s1 + $0x10] sm:$0xff] (!%p198_p2)  }
   0x7   : > { %871 = vmatpush3.bf16.msra.mxu0 (!%p198_p2), %v956_v1  ;;  %v958_v3 = vld [vmem:[%s1203_s1 + $0x80] sm:$0xff] (!%p198_p2)   ;;  %v961_v6 = vld [vmem:[%s1203_s1 + $0x88] sm:$0xff] (!%p198_p2)   ;;  %v963_v8 = vld [vmem:[%s1203_s1 + $0x58] sm:$0xff] (!%p198_p2)  }
   0x8   : > { %872 = vmatprep.subr.bf16.mxu0 (!%p198_p2), %v957_v2  ;;  %922 = vmatprep.subr.bf16.mxu1 (!%p198_p2), %v958_v3  ;;  %v964_v9 = vld [vmem:[%s1203_s1 + $0x90] sm:$0xff] (!%p198_p2)   ;;  %v965_v10 = vld [vmem:[%s1203_s1 + $0x18] sm:$0xff] (!%p198_p2)   ;;  %v966_v11 = vld [vmem:[%s1203_s1 + $0x60] sm:$0xff] (!%p198_p2)  }
   0x9   : > { %923 = vmatpush3.bf16.msra.mxu1 (!%p198_p2), %v958_v3  ;;  %v967_v12 = vld [vmem:[%s1203_s1 + $0x98] sm:$0xff] (!%p198_p2)   ;;  %v968_v13 = vld [vmem:[%s1203_s1 + $0x20] sm:$0xff] (!%p198_p2)   ;;  %v969_v15 = vld [vmem:[%s1203_s1 + $0x68] sm:$0xff] (!%p198_p2)  }
   0xa   : > { %924 = vmatprep.subr.bf16.mxu1 (!%p198_p2), %v961_v6  ;;  %v970_v14 = vld [vmem:[%s1203_s1 + $0xa0] sm:$0xff] (!%p198_p2)   ;;  %v971_v16 = vld [vmem:[%s1203_s1 + $0x28] sm:$0xff] (!%p198_p2)   ;;  %v972_v18 = vld [vmem:[%s1203_s1 + $0x70] sm:$0xff] (!%p198_p2)  }
   0xb   : > { %873 = vmatpush3.bf16.msra.mxu0 (!%p198_p2), %v959_v4  ;;  %v973_v17 = vld [vmem:[%s1203_s1 + $0xa8] sm:$0xff] (!%p198_p2)   ;;  %v974_v19 = vld [vmem:[%s1203_s1 + $0x30] sm:$0xff] (!%p198_p2)   ;;  %v975_v20 = vld [vmem:[%s1203_s1 + $0x78] sm:$0xff] (!%p198_p2)  }
   0xc   : > { %874 = vmatprep.subr.bf16.mxu0 (!%p198_p2), %v960_v5  ;;  %v976_v21 = vld [vmem:[%s1203_s1 + $0xb0] sm:$0xff] (!%p198_p2)   ;;  %v977_v23 = vld [vmem:[%s1203_s1 + $0x38] sm:$0xff] (!%p198_p2)   ;;  %v1148_v47 = vld [vmem:[%s1204_s2] ss:$0 sm:$0xff] (!%p198_p2) }
   0xd   : > { %925 = vmatpush3.bf16.msra.mxu1 %v961_v6  ;;  %s1209_s19 = smov (!%p230_p3, %s802_s19), 1  ;;  %v981_v25 = vld [vmem:[%s1203_s1 + $0xb8] sm:$0xff]   ;;  %v1153_v52 = vld [vmem:[%s1205_s3] ss:$0 sm:$0xff] }
   0xe   : > { %926 = vmatprep.subr.bf16.mxu1 %v964_v9  ;;  %s946_s29 = smul.u32 96, %s1209_s19  ;;  %s860_s26 = sshll.u32 %s1209_s19, 6 }
   0xf   : > { %875 = vmatpush3.bf16.msra.mxu0 %v962_v7  ;;  %s861_s9 = sshll.u32 %s1209_s19, 5 }
  0x10   : > { %876 = vmatprep.subr.bf16.mxu0 %v963_v8  ;;  %s1111_s15 = scalar_lea.vmem %s1202_s0, %s946_s29  ;;  %s1141_s29 = scalar_lea.vmem %s1206_s4, %s860_s26 }
  0x11   : > { %927 = vmatpush3.bf16.msra.mxu1 %v964_v9  ;;  %v980_v22 = vld [vmem:[%s1111_s15 + $0x4] ss:$12 sps:$4 sm:$0xff]   ;;  %v982_v24 = vld [vmem:[%s1111_s15 + $0x8] ss:$12 sps:$4 sm:$0xff]   ;;  %v978_v26 = vld [vmem:[%s1111_s15] ss:$12 sps:$4 sm:$0xff]   ;;  %s1165_s19 = scalar_lea.vmem %s1207_s5, %s861_s9 }
  0x12   : > { %928 = vmatprep.subr.bf16.mxu1 %v967_v12  ;;  %558 = vmatprep.mubr.bf16.mxu0 %v980_v22  ;;  %v984_v27 = vld [vmem:[%s1111_s15 + $0x1c] ss:$12 sps:$4 sm:$0xff]   ;;  %v983_v28 = vld [vmem:[%s1111_s15 + $0x20] ss:$12 sps:$4 sm:$0xff]   ;;  %v990_v29 = vld [vmem:[%s1111_s15 + $0x38] ss:$12 sps:$4 sm:$0xff]  }
  0x13   : > { %877 = vmatpush3.bf16.msra.mxu0 %v965_v10  ;;  %938 = vmatprep.mubr.bf16.mxu1 %v982_v24  ;;  %v986_v30 = vld [vmem:[%s1111_s15 + $0x18] ss:$12 sps:$4 sm:$0xff]   ;;  %v987_v31 = vld [vmem:[%s1111_s15 + $0x34] ss:$12 sps:$4 sm:$0xff]   ;;  %v991_v32 = vld [vmem:[%s1111_s15 + $0x50] ss:$12 sps:$4 sm:$0xff]  }
  0x14   : > { %878 = vmatprep.subr.bf16.mxu0 %v966_v11  ;;  %v989_v33 = vld [vmem:[%s1111_s15 + $0x30] ss:$12 sps:$4 sm:$0xff]   ;;  %v992_v34 = vld [vmem:[%s1111_s15 + $0x4c] ss:$12 sps:$4 sm:$0xff]   ;;  %v994_v35 = vld [vmem:[%s1111_s15 + $0x48] ss:$12 sps:$4 sm:$0xff]  }
  0x15   : > { %929 = vmatpush3.bf16.msra.mxu1 %v967_v12  ;;  %v310_v38 = vld [vmem:[%s1141_s29] sm:$0xff]  ;;  %v311_v43 = vld [vmem:[%s1141_s29 + $0x8] sm:$0xff]  ;;  %v312_v56 = vld [vmem:[%s1141_s29 + $0x10] sm:$0xff] }
  0x16   : > { %930 = vmatprep.subr.bf16.mxu1 %v970_v14  ;;  %v313_v62 = vld [vmem:[%s1141_s29 + $0x18] sm:$0xff] }
  0x17   : > { %879 = vmatpush3.bf16.msra.mxu0 %v968_v13 }
  0x18   : > { %880 = vmatprep.subr.bf16.mxu0 %v969_v15 }
  0x19   : > { %931 = vmatpush3.bf16.msra.mxu1 %v970_v14 }
  0x1a   : > { %932 = vmatprep.subr.bf16.mxu1 %v973_v17 }
  0x1b   : > { %881 = vmatpush3.bf16.msra.mxu0 %v971_v16 }
  0x1c   : > { %882 = vmatprep.subr.bf16.mxu0 %v972_v18 }
  0x1d   : > { %933 = vmatpush3.bf16.msra.mxu1 %v973_v17  ;;  %v314_v17 = vld [vmem:[%s1141_s29 + $0x20] sm:$0xff] }
  0x1e   : > { %934 = vmatprep.subr.bf16.mxu1 %v976_v21 }
  0x1f   : > { %883 = vmatpush3.bf16.msra.mxu0 %v974_v19 }
  0x20   : > { %884 = vmatprep.subr.bf16.mxu0 %v975_v20 }
  0x21   : > { %935 = vmatpush3.bf16.msra.mxu1 %v976_v21 }
  0x22   : > { %936 = vmatprep.subr.bf16.mxu1 %v981_v25 }
  0x23   : > { %885 = vmatpush3.bf16.msra.mxu0 %v977_v23  ;;  %v315_v23 = vld [vmem:[%s1141_s29 + $0x28] sm:$0xff] }
  0x25   : > { %937 = vmatpush3.bf16.msra.mxu1 %v981_v25 }
  0x26   : > { %559 = vmatmul.mubr.bf16.vlgmr.msra.gmra.mrb[0].mxu0 %v978_v26 }
  0x27   : > { %566 = vmatprep.mubr.bf16.mxu0 %v984_v27 }
  0x28   : > { %939 = vmatmul.mubr.bf16.vlgmr.msra.gmra.mrb[0].mxu1 %v983_v28 }
  0x29   : > { %942 = vmatprep.mubr.bf16.mxu1 %v990_v29 }
  0x2e   : > { %567 = vmatmul.mubr.bf16.gmra.mrb[4].mxu0 %v986_v30 }
  0x2f   : > { %574 = vmatprep.mubr.bf16.mxu0 %v987_v31 }
  0x30   : > { %943 = vmatmul.mubr.bf16.gmra.mrb[4].mxu1 %v991_v32 }
  0x36   : > { %575 = vmatmul.mubr.bf16.gmra.mrb[8].mxu0 %v989_v33 }
  0x37   : > { %582 = vmatprep.mubr.bf16.mxu0 %v992_v34 }
  0x3e   : > { %583 = vmatmul.mubr.bf16.gmra.mrb[12].mxu0 %v994_v35 }
  0xf9   : > { %v886_v36 = vpop.f32.mrb[0].mxu0 }
  0xfa   : > { %v887_v37 = vpop.f32.mrb[1].mxu0 }
  0xfb   : > { %v888_v39 = vadd.f32 %v887_v37, %v886_v36  ;;  %v889_v40 = vpop.f32.mrb[2].mxu0  ;;  %v940_v42 = vpop.f32.mrb[0].mxu1  ;;  %v316_v36 = vld [vmem:[%s1141_s29 + $0x30] sm:$0xff] }
  0xfc   : > { %v890_v41 = vpop.f32.mrb[3].mxu0  ;;  %v625_v46 = vpop.f32.mrb[1].mxu1 }
  0xfd   : > { %v891_v44 = vadd.f32 %v890_v41, %v889_v40  ;;  %v561_v45 = vadd.f32 %v888_v39, %v310_v38  ;;  %v941_v48 = vpop.f32.mrb[2].mxu1 }
  0xfe   : > { %v628_v51 = vpop.f32.mrb[3].mxu1 }
  0xff   : > { %v626_v49 = vadd.f32 %v625_v46, %v561_v45  ;;  %v564_v50 = vadd.f32 %v891_v44, %v311_v43 }
 0x101   : > { %v663_v53 = vmul.f32 %v1148_v47, %v626_v49  ;;  %v629_v54 = vadd.f32 %v628_v51, %v564_v50  ;;  %v892_v55 = vpop.f32.mrb[4].mxu0 }
 0x102   : > { %v893_v57 = vpop.f32.mrb[5].mxu0 }
 0x103   : > { %v678_v58 = vadd.f32 %v1153_v52, %v663_v53  ;;  %v664_v59 = vmul.f32 %v1148_v47, %v629_v54  ;;  %v894_v60 = vadd.f32 %v893_v57, %v892_v55  ;;  %v895_v61 = vpop.f32.mrb[6].mxu0  ;;  %v944_v0 = vpop.f32.mrb[4].mxu1 }
 0x104   : > { %v896_v63 = vpop.f32.mrb[7].mxu0  ;;  %v641_v5 = vpop.f32.mrb[5].mxu1 }
 0x105   : > { %v686_v1 = vmax.f32 %v678_v58, 0.0  ;;  %v679_v2 = vadd.f32 %v1153_v52, %v664_v59  ;;  %v569_v3 = vadd.f32 %v894_v60, %v312_v56  ;;  %v897_v4 = vadd.f32 %v896_v63, %v895_v61  ;;  %v945_v6 = vpop.f32.mrb[6].mxu1 }
 0x106   : > { %v644_v11 = vpop.f32.mrb[7].mxu1 }
 0x107   : > { %v862_v7 = vpack.c.bf16 %v686_v1, %v686_v1  ;;  %v687_v8 = vmax.f32 %v679_v2, 0.0  ;;  %v634_v9 = vadd.f32 %v940_v42, %v569_v3  ;;  %v572_v10 = vadd.f32 %v897_v4, %v313_v62  ;;  %v317_v42 = vld [vmem:[%s1141_s29 + $0x38] sm:$0xff] }
 0x109   : > { %727 = vst.msk [vmem:[%s1165_s19] sm:$0xf] %vm726_vm0, %v862_v7  ;;  %v863_v12 = vpack.c.bf16 %v687_v8, %v687_v8  ;;  %v665_v13 = vmul.f32 %v1148_v47, %v634_v9  ;;  %v637_v14 = vadd.f32 %v941_v48, %v572_v10  ;;  %v898_v15 = vpop.f32.mrb[8].mxu0 }
 0x10a   : > { %v899_v16 = vpop.f32.mrb[9].mxu0 }
 0x10b   : > { %728 = vst.msk [vmem:[%s1165_s19 + $0x4] sm:$0xf] %vm726_vm0, %v863_v12  ;;  %v680_v18 = vadd.f32 %v1153_v52, %v665_v13  ;;  %v666_v19 = vmul.f32 %v1148_v47, %v637_v14  ;;  %v900_v20 = vadd.f32 %v899_v16, %v898_v15  ;;  %v901_v21 = vpop.f32.mrb[10].mxu0 }
 0x10c   : > { %v902_v22 = vpop.f32.mrb[11].mxu0 }
 0x10d   : > { %v688_v24 = vmax.f32 %v680_v18, 0.0  ;;  %v681_v25 = vadd.f32 %v1153_v52, %v666_v19  ;;  %v903_v26 = vadd.f32 %v902_v22, %v901_v21  ;;  %v577_v27 = vadd.f32 %v900_v20, %v314_v17 }
 0x10f   : > { %v864_v28 = vpack.c.bf16 %v688_v24, %v688_v24  ;;  %v689_v29 = vmax.f32 %v681_v25, 0.0  ;;  %v642_v30 = vadd.f32 %v641_v5, %v577_v27  ;;  %v580_v31 = vadd.f32 %v903_v26, %v315_v23 }
 0x111   : > { %729 = vst.msk [vmem:[%s1165_s19 + $0x8] sm:$0xf] %vm726_vm0, %v864_v28  ;;  %v865_v32 = vpack.c.bf16 %v689_v29, %v689_v29  ;;  %v667_v33 = vmul.f32 %v1148_v47, %v642_v30  ;;  %v645_v34 = vadd.f32 %v644_v11, %v580_v31  ;;  %v904_v35 = vpop.f32.mrb[12].mxu0 }
 0x112   : > { %v905_v37 = vpop.f32.mrb[13].mxu0 }
 0x113   : > { %730 = vst.msk [vmem:[%s1165_s19 + $0xc] sm:$0xf] %vm726_vm0, %v865_v32  ;;  %v682_v38 = vadd.f32 %v1153_v52, %v667_v33  ;;  %v668_v39 = vmul.f32 %v1148_v47, %v645_v34  ;;  %v906_v40 = vadd.f32 %v905_v37, %v904_v35  ;;  %v907_v41 = vpop.f32.mrb[14].mxu0 }
 0x114   : > { %v908_v43 = vpop.f32.mrb[15].mxu0 }
 0x115   : > { %v690_v44 = vmax.f32 %v682_v38, 0.0  ;;  %v683_v45 = vadd.f32 %v1153_v52, %v668_v39  ;;  %v585_v46 = vadd.f32 %v906_v40, %v316_v36  ;;  %v909_v48 = vadd.f32 %v908_v43, %v907_v41 }
 0x117   : > { %v866_v49 = vpack.c.bf16 %v690_v44, %v690_v44  ;;  %v691_v50 = vmax.f32 %v683_v45, 0.0  ;;  %v650_v51 = vadd.f32 %v944_v0, %v585_v46  ;;  %v588_v53 = vadd.f32 %v909_v48, %v317_v42 }
 0x119   : > { %731 = vst.msk [vmem:[%s1165_s19 + $0x10] sm:$0xf] %vm726_vm0, %v866_v49  ;;  %v867_v54 = vpack.c.bf16 %v691_v50, %v691_v50  ;;  %v669_v55 = vmul.f32 %v1148_v47, %v650_v51  ;;  %v653_v56 = vadd.f32 %v945_v6, %v588_v53 }
 0x11b   : > { %732 = vst.msk [vmem:[%s1165_s19 + $0x14] sm:$0xf] %vm726_vm0, %v867_v54  ;;  %v684_v57 = vadd.f32 %v1153_v52, %v669_v55  ;;  %v670_v58 = vmul.f32 %v1148_v47, %v653_v56 }
 0x11d   : > { %v692_v59 = vmax.f32 %v684_v57, 0.0  ;;  %v685_v60 = vadd.f32 %v1153_v52, %v670_v58 }
 0x11f   : > { %v868_v61 = vpack.c.bf16 %v692_v59, %v692_v59  ;;  %v693_v62 = vmax.f32 %v685_v60, 0.0 }
 0x121   : > { %733 = vst.msk [vmem:[%s1165_s19 + $0x18] sm:$0xf] %vm726_vm0, %v868_v61  ;;  %v869_v63 = vpack.c.bf16 %v693_v62, %v693_v62 }
 0x123   : > { %734 = vst.msk [vmem:[%s1165_s19 + $0x1c] sm:$0xf] %vm726_vm0, %v869_v63 }
 0x124 PF: > { %s15_s18 = sadd.s32 1, %s1001_s18  }
 0x125   : > { %p12_p4 = scmp.ge.s32.totalorder %s15_s18, 4  }
 0x127   :  { %14 = sbr.rel (!%p12_p4) target bundleno = 1 (0x1), region = 73 }

// kernel: _lambda_.17
= control target key start
LH: loop header
LB: loop body
LE: loop exit
PB: predicated region body
PF: predicated region fallthrough
CT: control target
= control target key end

     0   :  { %s410_s9 = smov 0   ;;  %s451_s0 = inlined_call_operand.vmem [shape: bf16[2,16,128], index: 0, kind: input, shape index: {}]   ;;  %s452_s1 = inlined_call_operand.vmem [shape: bf16[128,128], index: 1, kind: input, shape index: {}]   ;;  %s453_s2 = inlined_call_operand.vmem [shape: f32[2,16,128], index: 2, kind: output, shape index: {}]  }
   0x1 LB: > { %s315_s10 = sadd.s32 4294967295, %s391_s9   ;;  %p319_p0 = scmp.ge.s32.totalorder %s391_s9, 1  ;;  %s391_s9 = sphi %s410_s9, %s12_s9  }
   0x2   : > { %p112_p1 = scmp.lt.s32.totalorder %s391_s9, 3 }
   0x4   : > { %p113_p2 = pnand %p319_p0, %p112_p1 }
   0x5   : > { %v376_v0 = vld [vmem:[%s452_s1] sm:$0xff] (!%p113_p2)   ;;  %v393_v1 = vmov (!%p113_p2), 0.0   ;;  %v377_v2 = vld [vmem:[%s452_s1 + $0x8] sm:$0xff] (!%p113_p2)   ;;  %vm394_vm0 = vmmov (!%p113_p2), 0   ;;  %p134_p3 = scmp.lt.s32.totalorder (!%p113_p2), %s315_s10, 1  ;;  %v378_v3 = vld [vmem:[%s452_s1 + $0x10] sm:$0xff] (!%p113_p2)  }
   0x6   : > { %116 = sbr.rel (%p113_p2) target bundleno = 253 (0xfd), region = 28  ;;  %346 = vmatprep.subr.bf16.mxu0 (!%p113_p2), %v393_v1  ;;  %362 = vmatprep.mubr.msk.bf16.mxu0 (!%p113_p2), %vm394_vm0, %v393_v1  ;;  %v379_v4 = vld [vmem:[%s452_s1 + $0x18] sm:$0xff] (!%p113_p2)   ;;  %v380_v5 = vld [vmem:[%s452_s1 + $0x20] sm:$0xff] (!%p113_p2)   ;;  %v381_v6 = vld [vmem:[%s452_s1 + $0x28] sm:$0xff] (!%p113_p2)  }
   0x7   : > { %347 = vmatpush3.bf16.msra.mxu0 (!%p113_p2), %v376_v0  ;;  %v382_v7 = vld [vmem:[%s452_s1 + $0x30] sm:$0xff] (!%p113_p2)   ;;  %v383_v8 = vld [vmem:[%s452_s1 + $0x38] sm:$0xff] (!%p113_p2)  }
   0x8   : > { %348 = vmatprep.subr.bf16.mxu0 (!%p113_p2), %v393_v1 }
   0xb   : > { %349 = vmatpush3.bf16.msra.mxu0 (!%p113_p2), %v377_v2 }
   0xc   : > { %350 = vmatprep.subr.bf16.mxu0 (!%p113_p2), %v393_v1 }
   0xd   : > { %s455_s10 = smov (!%p134_p3, %s315_s10), 1 }
   0xe   : > { %s335_s17 = sshll.u32 %s455_s10, 3  ;;  %s336_s3 = sshll.u32 %s455_s10, 4 }
   0xf   : > { %s138_s20 = scalar_lea.vmem %s451_s0, %s335_s17  ;;  %351 = vmatpush3.bf16.msra.mxu0 %v378_v3  ;;  %s143_s6 = scalar_lea.vmem %s453_s2, %s336_s3 }
  0x10   : > { %352 = vmatprep.subr.bf16.mxu0 %v393_v1  ;;  %v384_v9 = vld [vmem:[%s138_s20] sm:$0xff]  }
  0x13   : > { %353 = vmatpush3.bf16.msra.mxu0 %v379_v4 }
  0x14   : > { %354 = vmatprep.subr.bf16.mxu0 %v393_v1 }
  0x17   : > { %355 = vmatpush3.bf16.msra.mxu0 %v380_v5 }
  0x18   : > { %356 = vmatprep.subr.bf16.mxu0 %v393_v1 }
  0x1b   : > { %357 = vmatpush3.bf16.msra.mxu0 %v381_v6 }
  0x1c   : > { %358 = vmatprep.subr.bf16.mxu0 %v393_v1 }
  0x1f   : > { %359 = vmatpush3.bf16.msra.mxu0 %v382_v7 }
  0x20   : > { %360 = vmatprep.subr.bf16.mxu0 %v393_v1 }
  0x23   : > { %361 = vmatpush3.bf16.msra.mxu0 %v383_v8 }
  0x26   : > { %363 = vmatmul.mubr.bf16.vlgmr.msra.gmra.mrb[0].mxu0 %v384_v9 }
  0xf9   : > { %v251_v10 = vpop.f32.mrb[0].mxu0 }
  0xfa   : > { %258 = vst [vmem:[%s143_s6] sm:$0xff] %v251_v10  ;;  %v364_v11 = vpop.f32.mrb[1].mxu0 }
  0xfb   : > { %v254_v12 = vpop.f32.mrb[2].mxu0 }
  0xfc   : > { %259 = vst [vmem:[%s143_s6 + $0x8] sm:$0xff] %v254_v12  ;;  %v365_v13 = vpop.f32.mrb[3].mxu0 }
  0xfd PF: > { %s12_s9 = sadd.s32 1, %s391_s9  }
  0xfe   : > { %p9_p4 = scmp.ge.s32.totalorder %s12_s9, 4  }
 0x100   :  { %11 = sbr.rel (!%p9_p4) target bundleno = 1 (0x1), region = 58 }

// kernel: _lambda_.16
= control target key start
LH: loop header
LB: loop body
LE: loop exit
PB: predicated region body
PF: predicated region fallthrough
CT: control target
= control target key end

     0   :  { %s706_s12 = smov 0   ;;  %s806_s0 = inlined_call_operand.vmem [shape: bf16[2,16,384], index: 0, kind: input, shape index: {}]   ;;  %s807_s1 = inlined_call_operand.vmem [shape: bf16[384,128], index: 1, kind: input, shape index: {}]   ;;  %s808_s2 = inlined_call_operand.vmem [shape: f32[1,128], index: 2, kind: input, shape index: {}]   ;;  %s809_s3 = inlined_call_operand.vmem [shape: bf16[2,16,64], index: 3, kind: output, shape index: {}]  }
   0x1 LB: > { %s543_s13 = sadd.s32 4294967295, %s682_s12   ;;  %p547_p0 = scmp.ge.s32.totalorder %s682_s12, 1  ;;  %s682_s12 = sphi %s706_s12, %s13_s12  }
   0x2   : > { %p137_p1 = scmp.lt.s32.totalorder %s682_s12, 3 }
   0x4   : > { %p138_p2 = pnand %p547_p0, %p137_p1 }
   0x5   : > { %v648_v0 = vld [vmem:[%s807_s1 + $0x40] sm:$0xff] (!%p138_p2)   ;;  %v684_v2 = vmov (!%p138_p2), 0.0   ;;  %v651_v4 = vld [vmem:[%s807_s1 + $0x48] sm:$0xff] (!%p138_p2)   ;;  %vm685_vm0 = vmmov (!%p138_p2), 0   ;;  %v654_v7 = vld [vmem:[%s807_s1 + $0x50] sm:$0xff] (!%p138_p2)   ;;  %p161_p3 = scmp.lt.s32.totalorder (!%p138_p2), %s543_s13, 1 }
   0x6   : > { %141 = sbr.rel (%p138_p2) target bundleno = 266 (0x10a), region = 32  ;;  %v649_v1 = vld [vmem:[%s807_s1] sm:$0xff] (!%p138_p2)   ;;  %617 = vmatprep.subr.bf16.mxu1 (!%p138_p2), %v684_v2  ;;  %586 = vmatprep.subr.bf16.mxu0 (!%p138_p2), %v648_v0  ;;  %v652_v5 = vld [vmem:[%s807_s1 + $0x8] sm:$0xff] (!%p138_p2)   ;;  %v655_v8 = vld [vmem:[%s807_s1 + $0x10] sm:$0xff] (!%p138_p2)   ;;  %vm485_vm1 = vcmask (!%p138_p2), 519168  }
   0x7   : > { %v650_v3 = vld [vmem:[%s807_s1 + $0x80] sm:$0xff] (!%p138_p2)   ;;  %587 = vmatpush3.bf16.msra.mxu0 (!%p138_p2), %v649_v1  ;;  %633 = vmatprep.mubr.msk.bf16.mxu1 (!%p138_p2), %vm685_vm0, %v684_v2  ;;  %v653_v6 = vld [vmem:[%s807_s1 + $0x88] sm:$0xff] (!%p138_p2)   ;;  %v656_v9 = vld [vmem:[%s807_s1 + $0x90] sm:$0xff] (!%p138_p2)  }
   0x8   : > { %618 = vmatpush3.bf16.msra.mxu1 (!%p138_p2), %v650_v3  ;;  %588 = vmatprep.subr.bf16.mxu0 (!%p138_p2), %v651_v4  ;;  %v657_v10 = vld [vmem:[%s807_s1 + $0x58] sm:$0xff] (!%p138_p2)   ;;  %v660_v13 = vld [vmem:[%s807_s1 + $0x60] sm:$0xff] (!%p138_p2)   ;;  %v663_v16 = vld [vmem:[%s807_s1 + $0x68] sm:$0xff] (!%p138_p2)  }
   0x9   : > { %619 = vmatprep.subr.bf16.mxu1 (!%p138_p2), %v684_v2  ;;  %v658_v11 = vld [vmem:[%s807_s1 + $0x18] sm:$0xff] (!%p138_p2)   ;;  %v661_v14 = vld [vmem:[%s807_s1 + $0x20] sm:$0xff] (!%p138_p2)   ;;  %v664_v17 = vld [vmem:[%s807_s1 + $0x28] sm:$0xff] (!%p138_p2)  }
   0xa   : > { %v659_v12 = vld [vmem:[%s807_s1 + $0x98] sm:$0xff] (!%p138_p2)   ;;  %v662_v15 = vld [vmem:[%s807_s1 + $0xa0] sm:$0xff] (!%p138_p2)   ;;  %v665_v18 = vld [vmem:[%s807_s1 + $0xa8] sm:$0xff] (!%p138_p2)  }
   0xb   : > { %589 = vmatpush3.bf16.msra.mxu0 (!%p138_p2), %v652_v5  ;;  %v666_v19 = vld [vmem:[%s807_s1 + $0x70] sm:$0xff] (!%p138_p2)   ;;  %v669_v22 = vld [vmem:[%s807_s1 + $0x78] sm:$0xff] (!%p138_p2)   ;;  %v551_v30 = vld [vmem:[%s808_s2] ss:$0 sm:$0xff] (!%p138_p2) }
   0xc   : > { %620 = vmatpush3.bf16.msra.mxu1 (!%p138_p2), %v653_v6  ;;  %590 = vmatprep.subr.bf16.mxu0 (!%p138_p2), %v654_v7  ;;  %v667_v20 = vld [vmem:[%s807_s1 + $0x30] sm:$0xff] (!%p138_p2)   ;;  %v670_v24 = vld [vmem:[%s807_s1 + $0x38] sm:$0xff] (!%p138_p2)  }
   0xd   : > { %621 = vmatprep.subr.bf16.mxu1 %v684_v2  ;;  %s811_s13 = smov (!%p161_p3, %s543_s13), 1  ;;  %v668_v21 = vld [vmem:[%s807_s1 + $0xb0] sm:$0xff]   ;;  %v674_v25 = vld [vmem:[%s807_s1 + $0xb8] sm:$0xff]  }
   0xe   : > { %s637_s21 = smul.u32 24, %s811_s13  ;;  %s583_s18 = sshll.u32 %s811_s13, 3 }
   0xf   : > { %591 = vmatpush3.bf16.msra.mxu0 %v655_v8 }
  0x10   : > { %622 = vmatpush3.bf16.msra.mxu1 %v656_v9  ;;  %592 = vmatprep.subr.bf16.mxu0 %v657_v10  ;;  %s165_s5 = scalar_lea.vmem %s806_s0, %s637_s21  ;;  %s170_s21 = scalar_lea.vmem %s809_s3, %s583_s18 }
  0x11   : > { %623 = vmatprep.subr.bf16.mxu1 %v684_v2  ;;  %v673_v23 = vld [vmem:[%s165_s5 + $0x4] ss:$12 sps:$4 sm:$0xff]   ;;  %v671_v26 = vld [vmem:[%s165_s5] ss:$12 sps:$4 sm:$0xff]   ;;  %v675_v27 = vld [vmem:[%s165_s5 + $0x8] ss:$12 sps:$4 sm:$0xff]  }
  0x12   : > { %423 = vmatprep.mubr.bf16.mxu0 %v673_v23 }
  0x13   : > { %593 = vmatpush3.bf16.msra.mxu0 %v658_v11 }
  0x14   : > { %624 = vmatpush3.bf16.msra.mxu1 %v659_v12  ;;  %594 = vmatprep.subr.bf16.mxu0 %v660_v13 }
  0x15   : > { %625 = vmatprep.subr.bf16.mxu1 %v684_v2 }
  0x17   : > { %595 = vmatpush3.bf16.msra.mxu0 %v661_v14 }
  0x18   : > { %626 = vmatpush3.bf16.msra.mxu1 %v662_v15  ;;  %596 = vmatprep.subr.bf16.mxu0 %v663_v16 }
  0x19   : > { %627 = vmatprep.subr.bf16.mxu1 %v684_v2 }
  0x1b   : > { %597 = vmatpush3.bf16.msra.mxu0 %v664_v17 }
  0x1c   : > { %628 = vmatpush3.bf16.msra.mxu1 %v665_v18  ;;  %598 = vmatprep.subr.bf16.mxu0 %v666_v19 }
  0x1d   : > { %629 = vmatprep.subr.bf16.mxu1 %v684_v2 }
  0x1f   : > { %599 = vmatpush3.bf16.msra.mxu0 %v667_v20 }
  0x20   : > { %630 = vmatpush3.bf16.msra.mxu1 %v668_v21  ;;  %600 = vmatprep.subr.bf16.mxu0 %v669_v22 }
  0x21   : > { %631 = vmatprep.subr.bf16.mxu1 %v684_v2 }
  0x23   : > { %601 = vmatpush3.bf16.msra.mxu0 %v670_v24 }
  0x24   : > { %632 = vmatpush3.bf16.msra.mxu1 %v674_v25 }
  0x26   : > { %424 = vmatmul.mubr.bf16.vlgmr.msra.gmra.mrb[0].mxu0 %v671_v26 }
  0x27   : > { %634 = vmatmul.mubr.bf16.vlgmr.msra.gmra.mrb[0].mxu1 %v675_v27 }
  0xf9   : > { %v602_v28 = vpop.f32.mrb[0].mxu0 }
  0xfa   : > { %v603_v29 = vpop.f32.mrb[1].mxu0  ;;  %v466_v31 = vpop.f32.mrb[0].mxu1 }
  0xfb   : > { %v604_v32 = vadd.f32 %v603_v29, %v602_v28  ;;  %v605_v33 = vpop.f32.mrb[2].mxu0  ;;  %v635_v34 = vpop.f32.mrb[1].mxu1 }
  0xfc   : > { %v606_v35 = vpop.f32.mrb[3].mxu0  ;;  %v469_v36 = vpop.f32.mrb[2].mxu1 }
  0xfd   : > { %v426_v37 = vadd.f32 %v604_v32, %v551_v30  ;;  %v607_v38 = vadd.f32 %v606_v35, %v605_v33  ;;  %v636_v39 = vpop.f32.mrb[3].mxu1 }
  0xff   : > { %v467_v40 = vadd.f32 %v466_v31, %v426_v37  ;;  %v429_v41 = vadd.f32 %v607_v38, %v551_v30 }
 0x101   : > { %v473_v42 = vmax.f32 %v467_v40, 0.0  ;;  %v470_v43 = vadd.f32 %v469_v36, %v429_v41 }
 0x103   : > { %v475_v44 = vmax.f32 %v473_v42, 0.0  ;;  %v474_v45 = vmax.f32 %v470_v43, 0.0 }
 0x105   : > { %v584_v46 = vpack.c.bf16 %v475_v44, %v475_v44  ;;  %v476_v47 = vmax.f32 %v474_v45, 0.0 }
 0x107   : > { %486 = vst.msk [vmem:[%s170_s21] sm:$0xf] %vm485_vm1, %v584_v46  ;;  %v585_v48 = vpack.c.bf16 %v476_v47, %v476_v47 }
 0x109   : > { %487 = vst.msk [vmem:[%s170_s21 + $0x4] sm:$0xf] %vm485_vm1, %v585_v48 }
 0x10a PF: > { %s13_s12 = sadd.s32 1, %s682_s12  }
 0x10b   : > { %p10_p4 = scmp.ge.s32.totalorder %s13_s12, 4  }
 0x10d   :  { %12 = sbr.rel (!%p10_p4) target bundleno = 1 (0x1), region = 62 }

// kernel: _lambda_.18
= control target key start
LH: loop header
LB: loop body
LE: loop exit
PB: predicated region body
PF: predicated region fallthrough
CT: control target
= control target key end

     0   :  { %s1057_s18 = smov 0   ;;  %s1219_s0 = inlined_call_operand.vmem [shape: bf16[2,16,640], index: 0, kind: input, shape index: {}]   ;;  %s1220_s1 = inlined_call_operand.vmem [shape: bf16[640,128], index: 1, kind: input, shape index: {}]   ;;  %s1221_s2 = inlined_call_operand.vmem [shape: f32[1,128], index: 2, kind: input, shape index: {}]   ;;  %s1222_s3 = inlined_call_operand.vmem [shape: f32[1,128], index: 3, kind: input, shape index: {}]   ;;  %s1223_s4 = inlined_call_operand.vmem [shape: f32[2,16,128], index: 4, kind: input, shape index: {}]   ;;  %s1224_s5 = inlined_call_operand.vmem [shape: bf16[2,16,64], index: 5, kind: output, shape index: {}]  }
   0x1 LB: > { %s821_s19 = sadd.s32 4294967295, %s1023_s18   ;;  %p825_p0 = scmp.ge.s32.totalorder %s1023_s18, 1  ;;  %s1023_s18 = sphi %s1057_s18, %s15_s18  }
   0x2   : > { %p197_p1 = scmp.lt.s32.totalorder %s1023_s18, 3 }
   0x4   : > { %p198_p2 = pnand %p825_p0, %p197_p1 }
   0x5   : > { %v970_v0 = vld [vmem:[%s1220_s1 + $0x40] sm:$0xff] (!%p198_p2)   ;;  %v974_v4 = vld [vmem:[%s1220_s1 + $0x48] sm:$0xff] (!%p198_p2)   ;;  %v978_v8 = vld [vmem:[%s1220_s1 + $0x50] sm:$0xff] (!%p198_p2)   ;;  %p230_p3 = scmp.lt.s32.totalorder (!%p198_p2), %s821_s19, 1  ;;  %v1025_v33 = vmov (!%p198_p2), 0.0   ;;  %vm1026_vm0 = vmmov (!%p198_p2), 0  }
   0x6   : > { %201 = sbr.rel (%p198_p2) target bundleno = 295 (0x127), region = 40  ;;  %v971_v1 = vld [vmem:[%s1220_s1] sm:$0xff] (!%p198_p2)   ;;  %886 = vmatprep.subr.bf16.mxu0 (!%p198_p2), %v970_v0  ;;  %v975_v5 = vld [vmem:[%s1220_s1 + $0x8] sm:$0xff] (!%p198_p2)   ;;  %v979_v9 = vld [vmem:[%s1220_s1 + $0x10] sm:$0xff] (!%p198_p2)   ;;  %vm751_vm1 = vcmask (!%p198_p2), 519168  }
   0x7   : > { %v972_v2 = vld [vmem:[%s1220_s1 + $0xc0] sm:$0xff] (!%p198_p2)   ;;  %887 = vmatpush3.bf16.msra.mxu0 (!%p198_p2), %v971_v1  ;;  %v976_v6 = vld [vmem:[%s1220_s1 + $0xc8] sm:$0xff] (!%p198_p2)   ;;  %v980_v10 = vld [vmem:[%s1220_s1 + $0xd0] sm:$0xff] (!%p198_p2)  }
   0x8   : > { %v973_v3 = vld [vmem:[%s1220_s1 + $0x80] sm:$0xff] (!%p198_p2)   ;;  %908 = vmatprep.subr.bf16.mxu1 (!%p198_p2), %v972_v2  ;;  %888 = vmatprep.subr.bf16.mxu0 (!%p198_p2), %v974_v4  ;;  %v977_v7 = vld [vmem:[%s1220_s1 + $0x88] sm:$0xff] (!%p198_p2)   ;;  %v981_v11 = vld [vmem:[%s1220_s1 + $0x90] sm:$0xff] (!%p198_p2)  }
   0x9   : > { %909 = vmatpush3.bf16.msra.mxu1 (!%p198_p2), %v973_v3  ;;  %v982_v12 = vld [vmem:[%s1220_s1 + $0x58] sm:$0xff] (!%p198_p2)   ;;  %v986_v16 = vld [vmem:[%s1220_s1 + $0x60] sm:$0xff] (!%p198_p2)   ;;  %v990_v20 = vld [vmem:[%s1220_s1 + $0x68] sm:$0xff] (!%p198_p2)  }
   0xa   : > { %910 = vmatprep.subr.bf16.mxu1 (!%p198_p2), %v976_v6  ;;  %v983_v13 = vld [vmem:[%s1220_s1 + $0x18] sm:$0xff] (!%p198_p2)   ;;  %v987_v17 = vld [vmem:[%s1220_s1 + $0x20] sm:$0xff] (!%p198_p2)   ;;  %v991_v21 = vld [vmem:[%s1220_s1 + $0x28] sm:$0xff] (!%p198_p2)  }
   0xb   : > { %889 = vmatpush3.bf16.msra.mxu0 (!%p198_p2), %v975_v5  ;;  %v984_v14 = vld [vmem:[%s1220_s1 + $0xd8] sm:$0xff] (!%p198_p2)   ;;  %v988_v18 = vld [vmem:[%s1220_s1 + $0xe0] sm:$0xff] (!%p198_p2)   ;;  %v992_v22 = vld [vmem:[%s1220_s1 + $0xe8] sm:$0xff] (!%p198_p2)  }
   0xc   : > { %890 = vmatprep.subr.bf16.mxu0 (!%p198_p2), %v978_v8  ;;  %v985_v15 = vld [vmem:[%s1220_s1 + $0x98] sm:$0xff] (!%p198_p2)   ;;  %v989_v19 = vld [vmem:[%s1220_s1 + $0xa0] sm:$0xff] (!%p198_p2)   ;;  %v993_v23 = vld [vmem:[%s1220_s1 + $0xa8] sm:$0xff] (!%p198_p2)  }
   0xd   : > { %911 = vmatpush3.bf16.msra.mxu1 %v977_v7  ;;  %s1226_s19 = smov (!%p230_p3, %s821_s19), 1  ;;  %v994_v24 = vld [vmem:[%s1220_s1 + $0x70] sm:$0xff]   ;;  %v998_v28 = vld [vmem:[%s1220_s1 + $0x78] sm:$0xff]   ;;  %v1008_v37 = vld [vmem:[%s1220_s1 + $0x100] sm:$0xff]  }
   0xe   : > { %912 = vmatprep.subr.bf16.mxu1 %v980_v10  ;;  %s959_s24 = smul.u32 40, %s1226_s19  ;;  %v995_v25 = vld [vmem:[%s1220_s1 + $0x30] sm:$0xff]   ;;  %v999_v29 = vld [vmem:[%s1220_s1 + $0x38] sm:$0xff]   ;;  %v1009_v38 = vld [vmem:[%s1220_s1 + $0x108] sm:$0xff]   ;;  %s882_s11 = sshll.u32 %s1226_s19, 4 }
   0xf   : > { %891 = vmatpush3.bf16.msra.mxu0 %v979_v9  ;;  %v996_v26 = vld [vmem:[%s1220_s1 + $0xf0] sm:$0xff]   ;;  %v1000_v30 = vld [vmem:[%s1220_s1 + $0xf8] sm:$0xff]   ;;  %v1012_v41 = vld [vmem:[%s1220_s1 + $0x120] sm:$0xff]   ;;  %s239_s14 = scalar_lea.vmem %s1223_s4, %s882_s11  ;;  %s883_s20 = sshll.u32 %s1226_s19, 3 }
  0x10   : > { %892 = vmatprep.subr.bf16.mxu0 %v982_v12  ;;  %v997_v27 = vld [vmem:[%s1220_s1 + $0xb0] sm:$0xff]   ;;  %s1162_s10 = scalar_lea.vmem %s1219_s0, %s959_s24  ;;  %v1004_v34 = vld [vmem:[%s1220_s1 + $0xb8] sm:$0xff]   ;;  %v1013_v42 = vld [vmem:[%s1220_s1 + $0x128] sm:$0xff]   ;;  %s244_s23 = scalar_lea.vmem %s1224_s5, %s883_s20 }
  0x11   : > { %913 = vmatpush3.bf16.msra.mxu1 %v981_v11  ;;  %v1001_v31 = vld [vmem:[%s1162_s10] ss:$20 sps:$4 sm:$0xff]   ;;  %v1003_v32 = vld [vmem:[%s1162_s10 + $0x4] ss:$20 sps:$4 sm:$0xff]   ;;  %v1005_v35 = vld [vmem:[%s1162_s10 + $0x8] ss:$20 sps:$4 sm:$0xff]  }
  0x12   : > { %914 = vmatprep.subr.bf16.mxu1 %v984_v14  ;;  %632 = vmatprep.mubr.bf16.mxu0 %v1003_v32  ;;  %v1007_v36 = vld [vmem:[%s1162_s10 + $0xc] ss:$20 sps:$4 sm:$0xff]   ;;  %v1010_v39 = vld [vmem:[%s1220_s1 + $0x110] sm:$0xff]   ;;  %v1011_v40 = vld [vmem:[%s1220_s1 + $0x118] sm:$0xff]  }
  0x13   : > { %893 = vmatpush3.bf16.msra.mxu0 %v983_v13  ;;  %673 = vmatprep.mubr.bf16.mxu1 %v1007_v36  ;;  %v1014_v43 = vld [vmem:[%s1220_s1 + $0x130] sm:$0xff]   ;;  %v1015_v44 = vld [vmem:[%s1220_s1 + $0x138] sm:$0xff]   ;;  %v332_v47 = vld [vmem:[%s239_s14] sm:$0xff] }
  0x14   : > { %894 = vmatprep.subr.bf16.mxu0 %v986_v16  ;;  %v1016_v45 = vld [vmem:[%s1162_s10 + $0x10] ss:$20 sps:$4 sm:$0xff]   ;;  %v333_v52 = vld [vmem:[%s239_s14 + $0x8] sm:$0xff]  ;;  %v876_v1 = vld [vmem:[%s1221_s2] ss:$0 sm:$0xff] }
  0x15   : > { %915 = vmatpush3.bf16.msra.mxu1 %v985_v15  ;;  %v877_v4 = vld [vmem:[%s1222_s3] ss:$0 sm:$0xff] }
  0x16   : > { %916 = vmatprep.subr.bf16.mxu1 %v988_v18 }
  0x17   : > { %895 = vmatpush3.bf16.msra.mxu0 %v987_v17 }
  0x18   : > { %896 = vmatprep.subr.bf16.mxu0 %v990_v20 }
  0x19   : > { %917 = vmatpush3.bf16.msra.mxu1 %v989_v19 }
  0x1a   : > { %918 = vmatprep.subr.bf16.mxu1 %v992_v22 }
  0x1b   : > { %897 = vmatpush3.bf16.msra.mxu0 %v991_v21 }
  0x1c   : > { %898 = vmatprep.subr.bf16.mxu0 %v994_v24 }
  0x1d   : > { %919 = vmatpush3.bf16.msra.mxu1 %v993_v23 }
  0x1e   : > { %920 = vmatprep.subr.bf16.mxu1 %v996_v26 }
  0x1f   : > { %899 = vmatpush3.bf16.msra.mxu0 %v995_v25 }
  0x20   : > { %900 = vmatprep.subr.bf16.mxu0 %v998_v28 }
  0x21   : > { %921 = vmatpush3.bf16.msra.mxu1 %v997_v27 }
  0x22   : > { %922 = vmatprep.subr.bf16.mxu1 %v1000_v30 }
  0x23   : > { %901 = vmatpush3.bf16.msra.mxu0 %v999_v29 }
  0x24   : > { %939 = vmatprep.subr.bf16.mxu0 %v1025_v33 }
  0x25   : > { %923 = vmatpush3.bf16.msra.mxu1 %v1004_v34 }
  0x26   : > { %633 = vmatmul.mubr.bf16.vlgmr.msra.gmra.mrb[0].mxu0 %v1001_v31 }
  0x27   : > { %955 = vmatprep.mubr.msk.bf16.mxu0 %vm1026_vm0, %v1025_v33  ;;  %940 = vmatpush3.bf16.msra.mxu0 %v1008_v37 }
  0x28   : > { %674 = vmatmul.mubr.bf16.vlgmr.msra.gmra.mrb[0].mxu1 %v1005_v35  ;;  %941 = vmatprep.subr.bf16.mxu0 %v1025_v33 }
  0x2b   : > { %942 = vmatpush3.bf16.msra.mxu0 %v1009_v38 }
  0x2c   : > { %943 = vmatprep.subr.bf16.mxu0 %v1025_v33 }
  0x2f   : > { %944 = vmatpush3.bf16.msra.mxu0 %v1010_v39 }
  0x30   : > { %945 = vmatprep.subr.bf16.mxu0 %v1025_v33 }
  0x33   : > { %946 = vmatpush3.bf16.msra.mxu0 %v1011_v40 }
  0x34   : > { %947 = vmatprep.subr.bf16.mxu0 %v1025_v33 }
  0x37   : > { %948 = vmatpush3.bf16.msra.mxu0 %v1012_v41 }
  0x38   : > { %949 = vmatprep.subr.bf16.mxu0 %v1025_v33 }
  0x3b   : > { %950 = vmatpush3.bf16.msra.mxu0 %v1013_v42 }
  0x3c   : > { %951 = vmatprep.subr.bf16.mxu0 %v1025_v33 }
  0x3f   : > { %952 = vmatpush3.bf16.msra.mxu0 %v1014_v43 }
  0x40   : > { %953 = vmatprep.subr.bf16.mxu0 %v1025_v33 }
  0x43   : > { %954 = vmatpush3.bf16.msra.mxu0 %v1015_v44 }
  0x46   : > { %956 = vmatmul.mubr.bf16.vlgmr.msra.gmra.mrb[4].mxu0 %v1016_v45 }
  0xf9   : > { %v902_v46 = vpop.f32.mrb[0].mxu0 }
  0xfa   : > { %v903_v48 = vpop.f32.mrb[1].mxu0 }
  0xfb   : > { %v904_v49 = vadd.f32 %v903_v48, %v902_v46  ;;  %v905_v50 = vpop.f32.mrb[2].mxu0  ;;  %v924_v51 = vpop.f32.mrb[0].mxu1 }
  0xfc   : > { %v906_v53 = vpop.f32.mrb[3].mxu0  ;;  %v925_v56 = vpop.f32.mrb[1].mxu1 }
  0xfd   : > { %v635_v54 = vadd.f32 %v904_v49, %v332_v47  ;;  %v907_v55 = vadd.f32 %v906_v53, %v905_v50  ;;  %v926_v57 = vadd.f32 %v925_v56, %v924_v51  ;;  %v927_v58 = vpop.f32.mrb[2].mxu1 }
  0xfe   : > { %v928_v60 = vpop.f32.mrb[3].mxu1 }
  0xff   : > { %v638_v59 = vadd.f32 %v907_v55, %v333_v52  ;;  %v929_v61 = vadd.f32 %v928_v60, %v927_v58  ;;  %v676_v62 = vadd.f32 %v926_v57, %v635_v54 }
 0x101   : > { %v679_v63 = vadd.f32 %v929_v61, %v638_v59 }
 0x119   : > { %v716_v0 = vpop.f32.mrb[4].mxu0 }
 0x11a   : > { %v717_v2 = vadd.f32 %v716_v0, %v676_v62  ;;  %v957_v3 = vpop.f32.mrb[5].mxu0 }
 0x11b   : > { %v719_v5 = vpop.f32.mrb[6].mxu0 }
 0x11c   : > { %v730_v6 = vmul.f32 %v876_v1, %v717_v2  ;;  %v720_v7 = vadd.f32 %v719_v5, %v679_v63  ;;  %v958_v8 = vpop.f32.mrb[7].mxu0 }
 0x11e   : > { %v739_v9 = vadd.f32 %v877_v4, %v730_v6  ;;  %v731_v10 = vmul.f32 %v876_v1, %v720_v7 }
 0x120   : > { %v741_v11 = vmax.f32 %v739_v9, 0.0  ;;  %v740_v12 = vadd.f32 %v877_v4, %v731_v10 }
 0x122   : > { %v884_v13 = vpack.c.bf16 %v741_v11, %v741_v11  ;;  %v742_v14 = vmax.f32 %v740_v12, 0.0 }
 0x124   : > { %752 = vst.msk [vmem:[%s244_s23] sm:$0xf] %vm751_vm1, %v884_v13  ;;  %v885_v15 = vpack.c.bf16 %v742_v14, %v742_v14 }
 0x126   : > { %753 = vst.msk [vmem:[%s244_s23 + $0x4] sm:$0xf] %vm751_vm1, %v885_v15 }
 0x127 PF: > { %s15_s18 = sadd.s32 1, %s1023_s18  }
 0x128   : > { %p12_p4 = scmp.ge.s32.totalorder %s15_s18, 4  }
 0x12a   :  { %14 = sbr.rel (!%p12_p4) target bundleno = 1 (0x1), region = 73 }

// kernel: _lambda_.19
= control target key start
LH: loop header
LB: loop body
LE: loop exit
PB: predicated region body
PF: predicated region fallthrough
CT: control target
= control target key end

     0   :  { %v230_v3 = vmov 0.0|0.0   ;;  %vm231_vm0 = vmmov 0   ;;  %v232_v6 = vmov 0.0   ;;  %vm23_vm1 = vcmask 523264   ;;  %s304_s0 = inlined_call_operand.vmem [shape: bf16[2,16,64], index: 0, kind: input, shape index: {}]   ;;  %s305_s1 = inlined_call_operand.vmem [shape: f32[64,128], index: 1, kind: input, shape index: {}]   ;;  %s306_s2 = inlined_call_operand.vmem [shape: f32[1,128], index: 2, kind: input, shape index: {}]   ;;  %s307_s3 = inlined_call_operand.hbm [shape: f32[2,128], index: 3, kind: output, shape index: {}]  }
   0x1   :  { %v45_v0 = vld [vmem:[%s305_s1] sm:$0xff]  ;;  %v46_v1 = vld [vmem:[%s305_s1 + $0x8] sm:$0xff]  ;;  %v47_v2 = vld [vmem:[%s305_s1 + $0x10] sm:$0xff]  ;;  %190 = vmatprep.subr.bf16.mxu0 %v230_v3  ;;  %187 = vmatprep.mubr.msk.f32.mxu0 %vm231_vm0, %v232_v6 }
   0x2   :  { %v191_v4 = vpack.c.bf16 %v46_v1, %v45_v0  ;;  %v48_v5 = vld [vmem:[%s305_s1 + $0x18] sm:$0xff]  ;;  %v154_v7 = vld [vmem:[%s304_s0] sm:$0xff]   ;;  %v161_v11 = vld [vmem:[%s304_s0 + $0x8] sm:$0xff]  }
   0x3   :  { %v194_v8 = vpack.c.bf16 %v48_v5, %v47_v2  ;;  %v155_v9 = vunpack.c.l.bf16 %v154_v7  ;;  %v156_v10 = vunpack.c.h.bf16 %v154_v7 }
   0x4   :  { %192 = vmatpush3.bf16.msra.mxu0 %v191_v4 }
   0x5   :  { %8 = vsyncpa [#allocation3], 0  ;;  %193 = vmatprep.subr.bf16.mxu0 %v230_v3  ;;  %v49_v12 = vld [vmem:[%s305_s1 + $0x20] sm:$0xff]  ;;  %v50_v13 = vld [vmem:[%s305_s1 + $0x28] sm:$0xff]  ;;  %v159_v14 = vunpack.c.l.bf16 %v161_v11  ;;  %v160_v15 = vunpack.c.h.bf16 %v161_v11  ;;  %v24_v16 = vsel %vm23_vm1, %v155_v9, 0.0  ;;  %v25_v17 = vsel %vm23_vm1, %v156_v10, 0.0 }
   0x6   :  { %v26_v18 = vadd.f32 %v25_v17, %v24_v16  ;;  %v197_v21 = vpack.c.bf16 %v50_v13, %v49_v12  ;;  %v51_v23 = vld [vmem:[%s305_s1 + $0x30] sm:$0xff]  ;;  %v52_v24 = vld [vmem:[%s305_s1 + $0x38] sm:$0xff]  ;;  %vm62_vm2 = vcmask 1041409   ;;  %v151_v41 = vld [vmem:[%s306_s2] ss:$0 sm:$0xff]  ;;  %s233_s5 = smov [#allocation2]  }
   0x7   :  { %v33_v19 = vsel %vm23_vm1, %v159_v14, 0.0  ;;  %v34_v20 = vsel %vm23_vm1, %v160_v15, 0.0  ;;  %v200_v28 = vpack.c.bf16 %v52_v24, %v51_v23  ;;  %s143_s6 = sshll.u32 %s233_s5, 4  ;;  %s144_s6 = int_to_ptr.vmem [resolvable:$true] %s143_s6 }
   0x8   :  { %195 = vmatpush3.bf16.msra.mxu0 %v194_v8  ;;  %v35_v22 = vadd.f32 %v34_v20, %v33_v19  ;;  %v27_v25 = vrot.slane %v26_v18, 4  ;;  %s206_s7 = scalar_lea.vmem %s144_s6, 32  ;;  %p211_p1 = scmp.lt.s32.totalorder %s144_s6, %s144_s6 }
   0x9   :  { %196 = vmatprep.subr.bf16.mxu0 %v230_v3  ;;  %p207_p0 = scmp.ne.s32.totalorder %s144_s6, %s206_s7  ;;  %p212_p2 = scmp.lt.s32.totalorder %s206_s7, %s206_s7 }
   0xa   :  { %v36_v26 = vrot.slane %v35_v22, 4  ;;  %v28_v27 = vadd.f32 %v27_v25, %v26_v18 }
   0xb   :  { %p213_p3 = por %p212_p2, %p211_p1 }
   0xc   :  { %198 = vmatpush3.bf16.msra.mxu0 %v197_v21  ;;  %v37_v29 = vadd.f32 %v36_v26, %v35_v22  ;;  %v29_v30 = vrot.slane %v28_v27, 2 }
   0xd   :  { %199 = vmatprep.subr.bf16.mxu0 %v230_v3  ;;  %p214_p4 = pnand %p213_p3, %p207_p0 }
   0xe   :  { %v38_v31 = vrot.slane %v37_v29, 2  ;;  %v30_v32 = vadd.f32 %v29_v30, %v28_v27 }
  0x10   :  { %201 = vmatpush3.bf16.msra.mxu0 %v200_v28  ;;  %v39_v33 = vadd.f32 %v38_v31, %v37_v29  ;;  %v31_v34 = vrot.slane %v30_v32, 1 }
  0x12   :  { %v40_v35 = vrot.slane %v39_v33, 1  ;;  %v32_v36 = vadd.f32 %v31_v34, %v30_v32 }
  0x14   :  { %v41_v37 = vadd.f32 %v40_v35, %v39_v33  ;;  %v43_v38 = vmul.f32 0.0625, %v32_v36 }
  0x16   :  { %v44_v39 = vmul.f32 0.0625, %v41_v37 }
  0x18   :  { %v63_v40 = vsel %vm62_vm2, %v44_v39, %v43_v38 }
  0x19   :  { %188 = vmatmul.mubr.msk.f32.vlgmr.msra.gmra.mrb[0].mxu0 %vm23_vm1, %v63_v40 }
  0xec   :  { %v132_v42 = vpop.f32.mrb[0].mxu0 }
  0xed   :  { %v133_v43 = vadd.f32 %v151_v41, %v132_v42  ;;  %v189_v44 = vpop.f32.mrb[1].mxu0 }
  0xef   :  { %136 = vst [vmem:[#allocation2] sm:$0x3] %v133_v43 }
  0xf0   :  { %217 = shalt.err (!%p214_p4)
}
  0xf1   :  { %s218_s10 = scalar_lea.hbm %s307_s3, 32 }
  0xf2   :  { %p219_p5 = scmp.ne.s32.totalorder %s307_s3, %s218_s10  ;;  %p222_p6 = scmp.lt.u32.totalorder %s218_s10, %s307_s3 }
  0xf4   :  { %p224_p7 = pnand %p222_p6, %p219_p5 }
  0xf6   :  { %227 = shalt.err (!%p224_p7)
}
  0xf7   :  { %146 = dma.vmem_to_hbm [thread:$0]  %s144_s6, 32, %s307_s3, [#allocation3]  }
  0xf8   :  { %228 = dma.done.wait [#allocation3], 32  }
  0xf9   :  { %229 = vsyncadd [#allocation3], 4294967264 }
  0xfa   :  { %150 = vsyncpa [#allocation3], 1 }

</bundles_post_ra>
